<compile_context>
chip_gen: v7x
topology: tpu7x:2x2x1
jax: 0.10.0
libtpu: 0.0.40
codegen_flags: <defaults>
</compile_context>

<pallas_src>
import functools

import numpy as np
import jax
import jax.numpy as jnp
from jax.experimental import pallas as pl
from jax.experimental.pallas import tpu as pltpu

VMEM_SPEC = pl.BlockSpec(memory_space=pltpu.MemorySpace.VMEM)
NEG_INF = -1e9


# --------------------------- in-kernel helpers -----------------------------

def _mm(a, w):
    """MXU matmul: bf16 operands (weights pre-cast to bf16), f32 accumulation."""
    return jnp.dot(a.astype(jnp.bfloat16), w.astype(jnp.bfloat16),
                   preferred_element_type=jnp.float32)


def _sel(m, x):
    """Exact f32 matmul for 0/1 selection / scatter / tiling matrices."""
    return jnp.dot(m, x, preferred_element_type=jnp.float32)


def _ln(x, g, b):
    mu = jnp.mean(x, axis=-1, keepdims=True)
    var = jnp.mean(jnp.square(x - mu), axis=-1, keepdims=True)
    return (x - mu) * jax.lax.rsqrt(var + 1e-5) * g + b


def _mha(q, k, v, tile_m, head_m, bias, dh):
    """Multi-head attention on flattened [R, D] slabs, single softmax pass.

    tile_m : [H*R, R]   vertical stack of H identities (row h*R+j selects k[j])
    head_m : [H*R, D]   1 where row-block h meets lane-block h (head mask)
    bias   : [R, H*R]   0 / -1e9 combined batch-block (+ causal) mask, tiled
                        identically for every head block.
    """
    scale = 1.0 / (dh ** 0.5)
    k_st = _sel(tile_m, k) * head_m                     # [H*R, D] per-head-masked K
    v_st = _sel(tile_m, v) * head_m                     # [H*R, D] per-head-masked V
    s = jax.lax.dot_general(q.astype(jnp.bfloat16), k_st.astype(jnp.bfloat16),
                            (((1,), (1,)), ((), ())),
                            preferred_element_type=jnp.float32) * scale + bias
    m = jnp.max(s, axis=-1, keepdims=True)              # global row max (safe shift)
    p = jnp.exp(s - m)                                  # masked entries underflow to 0
    o_un = jnp.dot(p.astype(jnp.bfloat16), v_st.astype(jnp.bfloat16),
                   preferred_element_type=jnp.float32)  # [R, D] merged heads (unnorm.)
    denom = jnp.maximum(_sel(p, head_m), 1e-30)         # per-head softmax denominator
    return o_un * pl.reciprocal(denom, approx=True)


# ------------------------------ fused kernel --------------------------------

def _fwd_kernel(*refs, enc_layers, dec_layers, dh_enc, dh_dec, dv, de):
    (patches, x_dec_in, enc_base,
     sel_patch, extcls, exprows,
     tile_enc, mhead_enc, bias_enc,
     tile_dec, mhead_dec, bias_dec,
     patch_w, patch_b, enc_ln, enc_qkv_w, enc_qkv_b, enc_wo, enc_bo,
     enc_w1, enc_b1, enc_w2, enc_b2, lnf, vproj_w, vproj_b,
     dec_ln, dec_qkv_w, dec_qkv_b, dec_swo, dec_sbo, dec_cw, dec_cb,
     dec_w1, dec_b1, dec_w2, dec_b2, head_w, head_b,
     out_ref) = refs

    # ------------------------- ViT encoder ---------------------------------
    pe = _mm(patches[...], patch_w[...]) + patch_b[...]          # [B*nP, Dv]
    # scatter patch rows to token rows; cls token + positions are in enc_base
    x = _sel(sel_patch[...], pe) + enc_base[...]                 # [B*T, Dv]

    t_e, mh_e, bi_e = tile_enc[...], mhead_enc[...], bias_enc[...]
    for i in range(enc_layers):                                  # unrolled (L=2)
        ln = enc_ln[i]                                           # [4, Dv]
        h = _ln(x, ln[0:1], ln[1:2])
        qkv = _mm(h, enc_qkv_w[i]) + enc_qkv_b[i]                # fused QKV
        q, k, v = qkv[:, :dv], qkv[:, dv:2 * dv], qkv[:, 2 * dv:3 * dv]
        a = _mha(q, k, v, t_e, mh_e, bi_e, dh_enc)
        x = x + _mm(a, enc_wo[i]) + enc_bo[i]
        h2 = _ln(x, ln[2:3], ln[3:4])
        mid = jax.nn.gelu(_mm(h2, enc_w1[i]) + enc_b1[i], approximate=True)
        x = x + _mm(mid, enc_w2[i]) + enc_b2[i]

    # CLS rows -> final LN -> vision_proj  (encorder_image; F.normalize unused)
    cls_feat = _sel(extcls[...], x)                              # [B, Dv]
    lnf_v = lnf[...]
    mem = _mm(_ln(cls_feat, lnf_v[0:1], lnf_v[1:2]), vproj_w[...]) + vproj_b[...]
    mem_rows = _sel(exprows[...], mem)                           # [B*Tg, De]

    # ---------------------- transformer decoder ----------------------------
    y = x_dec_in[...]                                            # [B*Tg, De]
    t_d, mh_d, bi_d = tile_dec[...], mhead_dec[...], bias_dec[...]
    for i in range(dec_layers):                                  # unrolled (L=2)
        ln = dec_ln[i]                                           # [6, De]
        qkv = _mm(y, dec_qkv_w[i]) + dec_qkv_b[i]
        q, k, v = qkv[:, :de], qkv[:, de:2 * de], qkv[:, 2 * de:3 * de]
        sa = _mha(q, k, v, t_d, mh_d, bi_d, dh_dec)              # causal+batch mask
        y = _ln(y + _mm(sa, dec_swo[i]) + dec_sbo[i], ln[0:1], ln[1:2])
        # cross-attn to a single memory token: softmax == 1, q/k path dead;
        # c_wv @ c_wo (+ bias) pre-folded into dec_cw / dec_cb.
        y = _ln(y + _mm(mem_rows, dec_cw[i]) + dec_cb[i], ln[2:3], ln[3:4])
        mid = jax.nn.gelu(_mm(y, dec_w1[i]) + dec_b1[i], approximate=True)
        y = _ln(y + _mm(mid, dec_w2[i]) + dec_b2[i], ln[4:5], ln[5:6])

    # lane-dense (128-wide) logits head; sliced back to vocab outside
    out_ref[...] = _mm(y, head_w[...]) + head_b[...]


# ------------------------------ JAX wrapper ----------------------------------

def mymodel_forward(image, gene, params, consts, cfg):
    B, C, H, W = image.shape
    P, T, Tg = cfg['patch'], cfg['num_tokens'], cfg['gene_len']
    nP = (H // P) * (W // P)
    Dv, De = cfg['vision_width'], cfg['embed_dim']

    # patch unfold (pure layout glue, == stride-P conv unfold)
    patches = image.reshape(B, C, H // P, P, W // P, P)
    patches = patches.transpose(0, 2, 4, 1, 3, 5).reshape(B * nP, C * P * P)

    # cls-token + positional rows for the encoder (parameter-derived, tiny)
    enc_base = jnp.tile(params['pos_embed'], (B, 1)) \
        + consts['cls_rowmask'] * params['cls_token']

    # decoder token embeddings + positions (gather stays in XLA)
    tok = jnp.take(params['tok_embed'], gene, axis=0) + params['dec_pos_embed'][None]
    x_dec_in = tok.reshape(B * Tg, De)

    kernel = functools.partial(
        _fwd_kernel,
        enc_layers=cfg['enc_depth'], dec_layers=cfg['dec_depth'],
        dh_enc=Dv // cfg['heads'], dh_dec=De // cfg['dec_heads'],
        dv=Dv, de=De)

    inputs = (
        patches, x_dec_in, enc_base,
        consts['sel_patch'], consts['extcls'], consts['exprows'],
        consts['tile_enc'], consts['mhead_enc'], consts['bias_enc'],
        consts['tile_dec'], consts['mhead_dec'], consts['bias_dec'],
        params['patch_w'], params['patch_b'], params['enc_ln'],
        params['enc_qkv_w'], params['enc_qkv_b'], params['enc_wo'], params['enc_bo'],
        params['enc_w1'], params['enc_b1'], params['enc_w2'], params['enc_b2'],
        params['lnf'], params['vproj_w'], params['vproj_b'],
        params['dec_ln'], params['dec_qkv_w'], params['dec_qkv_b'],
        params['dec_swo'], params['dec_sbo'], params['dec_cw'], params['dec_cb'],
        params['dec_w1'], params['dec_b1'], params['dec_w2'], params['dec_b2'],
        params['head_w'], params['head_b'],
    )

    logits = pl.pallas_call(
        kernel,
        out_shape=jax.ShapeDtypeStruct((B * Tg, cfg['vocab_padded']), jnp.float32),
        in_specs=[VMEM_SPEC] * len(inputs),
        out_specs=VMEM_SPEC,
    )(*inputs)

    return logits[:, :cfg['vocab']].reshape(B, Tg, cfg['vocab'])


# --------------------- constant selection / mask matrices --------------------

def build_consts(cfg, B):
    T, Tg = cfg['num_tokens'], cfg['gene_len']
    nP = T - 1
    Dv, De = cfg['vision_width'], cfg['embed_dim']
    He, Hd = cfg['heads'], cfg['dec_heads']
    Re, Rd = B * T, B * Tg

    sel_patch = np.zeros((Re, B * nP), np.float32)       # pe row -> encoder row
    for b in range(B):
        for p in range(nP):
            sel_patch[b * T + 1 + p, b * nP + p] = 1.0

    cls_rowmask = np.zeros((Re, 1), np.float32)          # 1 at cls rows
    extcls = np.zeros((B, Re), np.float32)               # extract cls rows
    for b in range(B):
        cls_rowmask[b * T, 0] = 1.0
        extcls[b, b * T] = 1.0

    exprows = np.zeros((Rd, B), np.float32)              # broadcast mem -> dec rows
    for b in range(B):
        exprows[b * Tg:(b + 1) * Tg, b] = 1.0

    def head_consts(R, D, H, dh, tok_per_batch, causal):
        tile = np.tile(np.eye(R, dtype=np.float32), (H, 1))          # [H*R, R]
        mhead = np.zeros((H * R, D), np.float32)                     # head mask
        for h in range(H):
            mhead[h * R:(h + 1) * R, h * dh:(h + 1) * dh] = 1.0
        bi = np.arange(R) // tok_per_batch
        ti = np.arange(R) % tok_per_batch
        allow = bi[:, None] == bi[None, :]
        if causal:
            allow &= ti[:, None] >= ti[None, :]
        bias = np.where(allow, 0.0, NEG_INF).astype(np.float32)      # [R, R]
        return tile, mhead, np.tile(bias, (1, H))                    # slab [R, H*R]

    tile_enc, mhead_enc, bias_enc = head_consts(Re, Dv, He, Dv // He, T, False)
    tile_dec, mhead_dec, bias_dec = head_consts(Rd, De, Hd, De // Hd, Tg, True)

    consts = dict(sel_patch=sel_patch, cls_rowmask=cls_rowmask, extcls=extcls,
                  exprows=exprows, tile_enc=tile_enc, mhead_enc=mhead_enc,
                  bias_enc=bias_enc, tile_dec=tile_dec, mhead_dec=mhead_dec,
                  bias_dec=bias_dec)
    return {k: jnp.asarray(v) for k, v in consts.items()}


# -------------------------------- params init --------------------------------

def init_params(key, cfg):
    Dv, De = cfg['vision_width'], cfg['embed_dim']
    FFe, FFd = cfg['enc_ff'], cfg['dec_ff']
    Le, Ld = cfg['enc_depth'], cfg['dec_depth']
    V, Vp = cfg['vocab'], cfg['vocab_padded']
    T, Tg = cfg['num_tokens'], cfg['gene_len']
    C, P = cfg['in_ch'], cfg['patch']

    keys = iter(jax.random.split(key, 64))

    def nrm(shape, s=0.02):
        return jax.random.normal(next(keys), shape, jnp.float32) * s

    def stack_nrm(L, shape):
        return jnp.stack([nrm(shape) for _ in range(L)], axis=0)

    bf = lambda x: x.astype(jnp.bfloat16)                # matmul weights: bf16 in HBM
    ones_v = lambda d: jnp.ones((d,), jnp.float32)
    zeros_v = lambda d: jnp.zeros((d,), jnp.float32)

    enc_ln = jnp.tile(jnp.stack([ones_v(Dv), zeros_v(Dv),
                                 ones_v(Dv), zeros_v(Dv)])[None], (Le, 1, 1))
    dec_ln = jnp.tile(jnp.stack([ones_v(De), zeros_v(De)] * 3)[None], (Ld, 1, 1))

    # cross-attention (value/output) projections, pre-folded offline:
    # single memory token => softmax == 1 => q/k projections are dead weights.
    c_wv, c_wo = stack_nrm(Ld, (De, De)), stack_nrm(Ld, (De, De))
    c_bv, c_bo = jnp.zeros((Ld, 1, De)), jnp.zeros((Ld, 1, De))
    dec_cw = jnp.einsum('lij,ljk->lik', c_wv, c_wo)
    dec_cb = jnp.einsum('lij,ljk->lik', c_bv, c_wo) + c_bo

    return dict(
        # --- ViT encoder ---
        patch_w=bf(nrm((C * P * P, Dv))),
        patch_b=jnp.zeros((1, Dv), jnp.float32),
        cls_token=nrm((1, Dv)),
        pos_embed=nrm((T, Dv)),
        enc_ln=enc_ln,
        enc_qkv_w=bf(stack_nrm(Le, (Dv, 3 * Dv))),
        enc_qkv_b=jnp.zeros((Le, 1, 3 * Dv), jnp.float32),
        enc_wo=bf(stack_nrm(Le, (Dv, Dv))),
        enc_bo=jnp.zeros((Le, 1, Dv), jnp.float32),
        enc_w1=bf(stack_nrm(Le, (Dv, FFe))),
        enc_b1=jnp.zeros((Le, 1, FFe), jnp.float32),
        enc_w2=bf(stack_nrm(Le, (FFe, Dv))),
        enc_b2=jnp.zeros((Le, 1, Dv), jnp.float32),
        lnf=jnp.stack([ones_v(Dv), zeros_v(Dv)]),
        vproj_w=bf(nrm((Dv, De))),
        vproj_b=jnp.zeros((1, De), jnp.float32),
        # --- decoder ---
        tok_embed=nrm((V, De)),
        dec_pos_embed=nrm((Tg, De)),
        dec_ln=dec_ln,
        dec_qkv_w=bf(stack_nrm(Ld, (De, 3 * De))),
        dec_qkv_b=jnp.zeros((Ld, 1, 3 * De), jnp.float32),
        dec_swo=bf(stack_nrm(Ld, (De, De))),
        dec_sbo=jnp.zeros((Ld, 1, De), jnp.float32),
        dec_cw=bf(dec_cw),
        dec_cb=dec_cb,
        dec_w1=bf(stack_nrm(Ld, (De, FFd))),
        dec_b1=jnp.zeros((Ld, 1, FFd), jnp.float32),
        dec_w2=bf(stack_nrm(Ld, (FFd, De))),
        dec_b2=jnp.zeros((Ld, 1, De), jnp.float32),
        head_w=bf(jnp.pad(nrm((De, V)), ((0, 0), (0, Vp - V)))),   # lane-dense pad
        head_b=jnp.zeros((1, Vp), jnp.float32),
    )


# ----------------------------------- main ------------------------------------

if __name__ == "__main__":
    cfg = dict(
        in_ch=3, patch=8, image_size=16,
        vision_width=32, enc_depth=2, enc_ff=64, heads=4,
        embed_dim=32,
        dec_depth=2, dec_ff=64, dec_heads=4, vocab=50, gene_len=8,
    )
    cfg['num_tokens'] = 1 + (cfg['image_size'] // cfg['patch']) ** 2  # cls + patches
    cfg['vocab_padded'] = 128                                         # lane-dense head
    B = 2

    root = jax.random.PRNGKey(0)
    k_img, k_gene, k_param = jax.random.split(root, 3)
    image = jax.random.normal(k_img, (B, 3, 16, 16), jnp.float32)     # NCHW
    gene = jax.random.randint(k_gene, (B, cfg['gene_len']), 0, cfg['vocab'], jnp.int32)
    params = init_params(k_param, cfg)
    consts = build_consts(cfg, B)

    fwd = jax.jit(functools.partial(mymodel_forward, cfg=cfg))
    out = jax.block_until_ready(fwd(image, gene, params, consts))
    assert out.shape == (B, cfg['gene_len'], cfg['vocab'])
    assert bool(jnp.all(jnp.isfinite(out)))
    print("KERNEL_OK")
</pallas_src>

<mosaic_0001>
module attributes {stable_mosaic.version = 11 : i64} {
  func.func @_fwd_kernel(%arg0: memref<8x192xf32, #tpu.memory_space<vmem>>, %arg1: memref<16x32xf32, #tpu.memory_space<vmem>>, %arg2: memref<10x32xf32, #tpu.memory_space<vmem>>, %arg3: memref<10x8xf32, #tpu.memory_space<vmem>>, %arg4: memref<2x10xf32, #tpu.memory_space<vmem>>, %arg5: memref<16x2xf32, #tpu.memory_space<vmem>>, %arg6: memref<40x10xf32, #tpu.memory_space<vmem>>, %arg7: memref<40x32xf32, #tpu.memory_space<vmem>>, %arg8: memref<10x40xf32, #tpu.memory_space<vmem>>, %arg9: memref<64x16xf32, #tpu.memory_space<vmem>>, %arg10: memref<64x32xf32, #tpu.memory_space<vmem>>, %arg11: memref<16x64xf32, #tpu.memory_space<vmem>>, %arg12: memref<192x32xbf16, #tpu.memory_space<vmem>>, %arg13: memref<1x32xf32, #tpu.memory_space<vmem>>, %arg14: memref<2x4x32xf32, #tpu.memory_space<vmem>>, %arg15: memref<2x32x96xbf16, #tpu.memory_space<vmem>>, %arg16: memref<2x1x96xf32, #tpu.memory_space<vmem>>, %arg17: memref<2x32x32xbf16, #tpu.memory_space<vmem>>, %arg18: memref<2x1x32xf32, #tpu.memory_space<vmem>>, %arg19: memref<2x32x64xbf16, #tpu.memory_space<vmem>>, %arg20: memref<2x1x64xf32, #tpu.memory_space<vmem>>, %arg21: memref<2x64x32xbf16, #tpu.memory_space<vmem>>, %arg22: memref<2x1x32xf32, #tpu.memory_space<vmem>>, %arg23: memref<2x32xf32, #tpu.memory_space<vmem>>, %arg24: memref<32x32xbf16, #tpu.memory_space<vmem>>, %arg25: memref<1x32xf32, #tpu.memory_space<vmem>>, %arg26: memref<2x6x32xf32, #tpu.memory_space<vmem>>, %arg27: memref<2x32x96xbf16, #tpu.memory_space<vmem>>, %arg28: memref<2x1x96xf32, #tpu.memory_space<vmem>>, %arg29: memref<2x32x32xbf16, #tpu.memory_space<vmem>>, %arg30: memref<2x1x32xf32, #tpu.memory_space<vmem>>, %arg31: memref<2x32x32xbf16, #tpu.memory_space<vmem>>, %arg32: memref<2x1x32xf32, #tpu.memory_space<vmem>>, %arg33: memref<2x32x64xbf16, #tpu.memory_space<vmem>>, %arg34: memref<2x1x64xf32, #tpu.memory_space<vmem>>, %arg35: memref<2x64x32xbf16, #tpu.memory_space<vmem>>, %arg36: memref<2x1x32xf32, #tpu.memory_space<vmem>>, %arg37: memref<32x128xbf16, #tpu.memory_space<vmem>>, %arg38: memref<1x128xf32, #tpu.memory_space<vmem>>, %arg39: memref<16x128xf32, #tpu.memory_space<vmem>>) attributes {dimension_semantics = [], scalar_prefetch = 0 : i64, scratch_operands = 0 : i64, tpu.core_type = #tpu.core_type<tc>} {
    %c0 = arith.constant 0 : index
    %c0_0 = arith.constant 0 : index
    %0 = vector.load %arg0[%c0, %c0_0] : memref<8x192xf32, #tpu.memory_space<vmem>>, vector<8x192xf32>
    %c0_1 = arith.constant 0 : index
    %c0_2 = arith.constant 0 : index
    %1 = vector.load %arg12[%c0_1, %c0_2] : memref<192x32xbf16, #tpu.memory_space<vmem>>, vector<192x32xbf16>
    %2 = arith.truncf %0 : vector<8x192xf32> to vector<8x192xbf16>
    %cst = arith.constant dense<0.000000e+00> : vector<8x32xf32>
    %3 = tpu.matmul %2, %1, %cst {dimension_numbers = #tpu.dot_dimension_numbers<[1], [0], [0], [1], [0, 0, 1, 1], [], []>} : vector<8x192xbf16>, vector<192x32xbf16>, vector<8x32xf32> -> vector<8x32xf32>
    %c0_3 = arith.constant 0 : index
    %c0_4 = arith.constant 0 : index
    %4 = vector.load %arg13[%c0_3, %c0_4] : memref<1x32xf32, #tpu.memory_space<vmem>>, vector<1x32xf32>
    %5 = vector.broadcast %4 : vector<1x32xf32> to vector<8x32xf32>
    %6 = arith.addf %3, %5 : vector<8x32xf32>
    %c0_5 = arith.constant 0 : index
    %c0_6 = arith.constant 0 : index
    %7 = vector.load %arg3[%c0_5, %c0_6] : memref<10x8xf32, #tpu.memory_space<vmem>>, vector<10x8xf32>
    %cst_7 = arith.constant dense<0.000000e+00> : vector<10x32xf32>
    %8 = tpu.matmul %7, %6, %cst_7 {dimension_numbers = #tpu.dot_dimension_numbers<[1], [0], [0], [1], [0, 0, 1, 1], [], []>} : vector<10x8xf32>, vector<8x32xf32>, vector<10x32xf32> -> vector<10x32xf32>
    %c0_8 = arith.constant 0 : index
    %c0_9 = arith.constant 0 : index
    %9 = vector.load %arg2[%c0_8, %c0_9] : memref<10x32xf32, #tpu.memory_space<vmem>>, vector<10x32xf32>
    %10 = arith.addf %8, %9 : vector<10x32xf32>
    %c0_10 = arith.constant 0 : index
    %c0_11 = arith.constant 0 : index
    %11 = vector.load %arg6[%c0_10, %c0_11] : memref<40x10xf32, #tpu.memory_space<vmem>>, vector<40x10xf32>
    %c0_12 = arith.constant 0 : index
    %c0_13 = arith.constant 0 : index
    %12 = vector.load %arg7[%c0_12, %c0_13] : memref<40x32xf32, #tpu.memory_space<vmem>>, vector<40x32xf32>
    %c0_14 = arith.constant 0 : index
    %c0_15 = arith.constant 0 : index
    %13 = vector.load %arg8[%c0_14, %c0_15] : memref<10x40xf32, #tpu.memory_space<vmem>>, vector<10x40xf32>
    %c0_16 = arith.constant 0 : index
    %c0_17 = arith.constant 0 : index
    %c0_18 = arith.constant 0 : index
    %14 = vector.load %arg14[%c0_16, %c0_17, %c0_18] : memref<2x4x32xf32, #tpu.memory_space<vmem>>, vector<1x4x32xf32>
    %15 = vector.shape_cast %14 : vector<1x4x32xf32> to vector<4x32xf32>
    %16 = vector.extract_strided_slice %15 {offsets = [0, 0], sizes = [1, 32], strides = [1, 1]} : vector<4x32xf32> to vector<1x32xf32>
    %17 = vector.extract_strided_slice %15 {offsets = [1, 0], sizes = [1, 32], strides = [1, 1]} : vector<4x32xf32> to vector<1x32xf32>
    %cst_19 = arith.constant dense<0.000000e+00> : vector<10xf32>
    %18 = vector.multi_reduction <add>, %10, %cst_19 [1] : vector<10x32xf32> to vector<10xf32>
    %19 = vector.shape_cast %18 : vector<10xf32> to vector<10x1xf32>
    %cst_20 = arith.constant 3.200000e+01 : f32
    %20 = vector.broadcast %cst_20 : f32 to vector<10x1xf32>
    %21 = arith.divf %19, %20 : vector<10x1xf32>
    %22 = vector.broadcast %21 : vector<10x1xf32> to vector<10x32xf32>
    %23 = arith.subf %10, %22 : vector<10x32xf32>
    %24 = arith.mulf %23, %23 : vector<10x32xf32>
    %cst_21 = arith.constant dense<0.000000e+00> : vector<10xf32>
    %25 = vector.multi_reduction <add>, %24, %cst_21 [1] : vector<10x32xf32> to vector<10xf32>
    %26 = vector.shape_cast %25 : vector<10xf32> to vector<10x1xf32>
    %cst_22 = arith.constant 3.200000e+01 : f32
    %27 = vector.broadcast %cst_22 : f32 to vector<10x1xf32>
    %28 = arith.divf %26, %27 : vector<10x1xf32>
    %29 = vector.broadcast %21 : vector<10x1xf32> to vector<10x32xf32>
    %30 = arith.subf %10, %29 : vector<10x32xf32>
    %cst_23 = arith.constant 9.99999974E-6 : f32
    %31 = vector.broadcast %cst_23 : f32 to vector<10x1xf32>
    %32 = arith.addf %28, %31 : vector<10x1xf32>
    %33 = math.rsqrt %32 : vector<10x1xf32>
    %34 = vector.broadcast %33 : vector<10x1xf32> to vector<10x32xf32>
    %35 = arith.mulf %30, %34 : vector<10x32xf32>
    %36 = vector.broadcast %16 : vector<1x32xf32> to vector<10x32xf32>
    %37 = arith.mulf %35, %36 : vector<10x32xf32>
    %38 = vector.broadcast %17 : vector<1x32xf32> to vector<10x32xf32>
    %39 = arith.addf %37, %38 : vector<10x32xf32>
    %c0_24 = arith.constant 0 : index
    %c0_25 = arith.constant 0 : index
    %c0_26 = arith.constant 0 : index
    %40 = vector.load %arg15[%c0_24, %c0_25, %c0_26] : memref<2x32x96xbf16, #tpu.memory_space<vmem>>, vector<1x32x96xbf16>
    %41 = vector.shape_cast %40 : vector<1x32x96xbf16> to vector<32x96xbf16>
    %42 = arith.truncf %39 : vector<10x32xf32> to vector<10x32xbf16>
    %cst_27 = arith.constant dense<0.000000e+00> : vector<10x96xf32>
    %43 = tpu.matmul %42, %41, %cst_27 {dimension_numbers = #tpu.dot_dimension_numbers<[1], [0], [0], [1], [0, 0, 1, 1], [], []>} : vector<10x32xbf16>, vector<32x96xbf16>, vector<10x96xf32> -> vector<10x96xf32>
    %c0_28 = arith.constant 0 : index
    %c0_29 = arith.constant 0 : index
    %c0_30 = arith.constant 0 : index
    %44 = vector.load %arg16[%c0_28, %c0_29, %c0_30] : memref<2x1x96xf32, #tpu.memory_space<vmem>>, vector<1x1x96xf32>
    %45 = vector.shape_cast %44 : vector<1x1x96xf32> to vector<1x96xf32>
    %46 = vector.broadcast %45 : vector<1x96xf32> to vector<10x96xf32>
    %47 = arith.addf %43, %46 : vector<10x96xf32>
    %48 = vector.extract_strided_slice %47 {offsets = [0, 0], sizes = [10, 32], strides = [1, 1]} : vector<10x96xf32> to vector<10x32xf32>
    %49 = vector.extract_strided_slice %47 {offsets = [0, 32], sizes = [10, 32], strides = [1, 1]} : vector<10x96xf32> to vector<10x32xf32>
    %50 = vector.extract_strided_slice %47 {offsets = [0, 64], sizes = [10, 32], strides = [1, 1]} : vector<10x96xf32> to vector<10x32xf32>
    %cst_31 = arith.constant dense<0.000000e+00> : vector<40x32xf32>
    %51 = tpu.matmul %11, %49, %cst_31 {dimension_numbers = #tpu.dot_dimension_numbers<[1], [0], [0], [1], [0, 0, 1, 1], [], []>} : vector<40x10xf32>, vector<10x32xf32>, vector<40x32xf32> -> vector<40x32xf32>
    %52 = arith.mulf %51, %12 : vector<40x32xf32>
    %cst_32 = arith.constant dense<0.000000e+00> : vector<40x32xf32>
    %53 = tpu.matmul %11, %50, %cst_32 {dimension_numbers = #tpu.dot_dimension_numbers<[1], [0], [0], [1], [0, 0, 1, 1], [], []>} : vector<40x10xf32>, vector<10x32xf32>, vector<40x32xf32> -> vector<40x32xf32>
    %54 = arith.mulf %53, %12 : vector<40x32xf32>
    %55 = arith.truncf %48 : vector<10x32xf32> to vector<10x32xbf16>
    %56 = arith.truncf %52 : vector<40x32xf32> to vector<40x32xbf16>
    %cst_33 = arith.constant dense<0.000000e+00> : vector<10x40xf32>
    %57 = tpu.matmul %55, %56, %cst_33 {dimension_numbers = #tpu.dot_dimension_numbers<[1], [1], [0], [0], [0, 0, 1, 0], [], []>} : vector<10x32xbf16>, vector<40x32xbf16>, vector<10x40xf32> -> vector<10x40xf32>
    %cst_34 = arith.constant 0.353553385 : f32
    %58 = vector.broadcast %cst_34 : f32 to vector<10x40xf32>
    %59 = arith.mulf %57, %58 : vector<10x40xf32>
    %60 = arith.addf %59, %13 : vector<10x40xf32>
    %cst_35 = arith.constant dense<0xFF800000> : vector<10xf32>
    %61 = vector.multi_reduction <maximumf>, %60, %cst_35 [1] : vector<10x40xf32> to vector<10xf32>
    %62 = vector.shape_cast %61 : vector<10xf32> to vector<10x1xf32>
    %63 = vector.broadcast %62 : vector<10x1xf32> to vector<10x40xf32>
    %64 = arith.subf %60, %63 : vector<10x40xf32>
    %65 = math.exp %64 : vector<10x40xf32>
    %66 = arith.truncf %65 : vector<10x40xf32> to vector<10x40xbf16>
    %67 = arith.truncf %54 : vector<40x32xf32> to vector<40x32xbf16>
    %cst_36 = arith.constant dense<0.000000e+00> : vector<10x32xf32>
    %68 = tpu.matmul %66, %67, %cst_36 {dimension_numbers = #tpu.dot_dimension_numbers<[1], [0], [0], [1], [0, 0, 1, 1], [], []>} : vector<10x40xbf16>, vector<40x32xbf16>, vector<10x32xf32> -> vector<10x32xf32>
    %cst_37 = arith.constant dense<0.000000e+00> : vector<10x32xf32>
    %69 = tpu.matmul %65, %12, %cst_37 {dimension_numbers = #tpu.dot_dimension_numbers<[1], [0], [0], [1], [0, 0, 1, 1], [], []>} : vector<10x40xf32>, vector<40x32xf32>, vector<10x32xf32> -> vector<10x32xf32>
    %cst_38 = arith.constant 1.000000e-30 : f32
    %70 = vector.broadcast %cst_38 : f32 to vector<10x32xf32>
    %71 = arith.maximumf %69, %70 : vector<10x32xf32>
    %72 = tpu.reciprocal %71 {approx = true} : vector<10x32xf32> -> vector<10x32xf32>
    %73 = arith.mulf %68, %72 : vector<10x32xf32>
    %c0_39 = arith.constant 0 : index
    %c0_40 = arith.constant 0 : index
    %c0_41 = arith.constant 0 : index
    %74 = vector.load %arg17[%c0_39, %c0_40, %c0_41] : memref<2x32x32xbf16, #tpu.memory_space<vmem>>, vector<1x32x32xbf16>
    %75 = vector.shape_cast %74 : vector<1x32x32xbf16> to vector<32x32xbf16>
    %76 = arith.truncf %73 : vector<10x32xf32> to vector<10x32xbf16>
    %cst_42 = arith.constant dense<0.000000e+00> : vector<10x32xf32>
    %77 = tpu.matmul %76, %75, %cst_42 {dimension_numbers = #tpu.dot_dimension_numbers<[1], [0], [0], [1], [0, 0, 1, 1], [], []>} : vector<10x32xbf16>, vector<32x32xbf16>, vector<10x32xf32> -> vector<10x32xf32>
    %78 = arith.addf %10, %77 : vector<10x32xf32>
    %c0_43 = arith.constant 0 : index
    %c0_44 = arith.constant 0 : index
    %c0_45 = arith.constant 0 : index
    %79 = vector.load %arg18[%c0_43, %c0_44, %c0_45] : memref<2x1x32xf32, #tpu.memory_space<vmem>>, vector<1x1x32xf32>
    %80 = vector.shape_cast %79 : vector<1x1x32xf32> to vector<1x32xf32>
    %81 = vector.broadcast %80 : vector<1x32xf32> to vector<10x32xf32>
    %82 = arith.addf %78, %81 : vector<10x32xf32>
    %83 = vector.extract_strided_slice %15 {offsets = [2, 0], sizes = [1, 32], strides = [1, 1]} : vector<4x32xf32> to vector<1x32xf32>
    %84 = vector.extract_strided_slice %15 {offsets = [3, 0], sizes = [1, 32], strides = [1, 1]} : vector<4x32xf32> to vector<1x32xf32>
    %cst_46 = arith.constant dense<0.000000e+00> : vector<10xf32>
    %85 = vector.multi_reduction <add>, %82, %cst_46 [1] : vector<10x32xf32> to vector<10xf32>
    %86 = vector.shape_cast %85 : vector<10xf32> to vector<10x1xf32>
    %cst_47 = arith.constant 3.200000e+01 : f32
    %87 = vector.broadcast %cst_47 : f32 to vector<10x1xf32>
    %88 = arith.divf %86, %87 : vector<10x1xf32>
    %89 = vector.broadcast %88 : vector<10x1xf32> to vector<10x32xf32>
    %90 = arith.subf %82, %89 : vector<10x32xf32>
    %91 = arith.mulf %90, %90 : vector<10x32xf32>
    %cst_48 = arith.constant dense<0.000000e+00> : vector<10xf32>
    %92 = vector.multi_reduction <add>, %91, %cst_48 [1] : vector<10x32xf32> to vector<10xf32>
    %93 = vector.shape_cast %92 : vector<10xf32> to vector<10x1xf32>
    %cst_49 = arith.constant 3.200000e+01 : f32
    %94 = vector.broadcast %cst_49 : f32 to vector<10x1xf32>
    %95 = arith.divf %93, %94 : vector<10x1xf32>
    %96 = vector.broadcast %88 : vector<10x1xf32> to vector<10x32xf32>
    %97 = arith.subf %82, %96 : vector<10x32xf32>
    %cst_50 = arith.constant 9.99999974E-6 : f32
    %98 = vector.broadcast %cst_50 : f32 to vector<10x1xf32>
    %99 = arith.addf %95, %98 : vector<10x1xf32>
    %100 = math.rsqrt %99 : vector<10x1xf32>
    %101 = vector.broadcast %100 : vector<10x1xf32> to vector<10x32xf32>
    %102 = arith.mulf %97, %101 : vector<10x32xf32>
    %103 = vector.broadcast %83 : vector<1x32xf32> to vector<10x32xf32>
    %104 = arith.mulf %102, %103 : vector<10x32xf32>
    %105 = vector.broadcast %84 : vector<1x32xf32> to vector<10x32xf32>
    %106 = arith.addf %104, %105 : vector<10x32xf32>
    %c0_51 = arith.constant 0 : index
    %c0_52 = arith.constant 0 : index
    %c0_53 = arith.constant 0 : index
    %107 = vector.load %arg19[%c0_51, %c0_52, %c0_53] : memref<2x32x64xbf16, #tpu.memory_space<vmem>>, vector<1x32x64xbf16>
    %108 = vector.shape_cast %107 : vector<1x32x64xbf16> to vector<32x64xbf16>
    %109 = arith.truncf %106 : vector<10x32xf32> to vector<10x32xbf16>
    %cst_54 = arith.constant dense<0.000000e+00> : vector<10x64xf32>
    %110 = tpu.matmul %109, %108, %cst_54 {dimension_numbers = #tpu.dot_dimension_numbers<[1], [0], [0], [1], [0, 0, 1, 1], [], []>} : vector<10x32xbf16>, vector<32x64xbf16>, vector<10x64xf32> -> vector<10x64xf32>
    %c0_55 = arith.constant 0 : index
    %c0_56 = arith.constant 0 : index
    %c0_57 = arith.constant 0 : index
    %111 = vector.load %arg20[%c0_55, %c0_56, %c0_57] : memref<2x1x64xf32, #tpu.memory_space<vmem>>, vector<1x1x64xf32>
    %112 = vector.shape_cast %111 : vector<1x1x64xf32> to vector<1x64xf32>
    %113 = vector.broadcast %112 : vector<1x64xf32> to vector<10x64xf32>
    %114 = arith.addf %110, %113 : vector<10x64xf32>
    %115 = arith.mulf %114, %114 : vector<10x64xf32>
    %116 = arith.mulf %114, %115 : vector<10x64xf32>
    %cst_58 = arith.constant 4.471500e-02 : f32
    %117 = vector.broadcast %cst_58 : f32 to vector<10x64xf32>
    %118 = arith.mulf %117, %116 : vector<10x64xf32>
    %119 = arith.addf %114, %118 : vector<10x64xf32>
    %cst_59 = arith.constant 0.797884583 : f32
    %120 = vector.broadcast %cst_59 : f32 to vector<10x64xf32>
    %121 = arith.mulf %120, %119 : vector<10x64xf32>
    %122 = math.tanh %121 : vector<10x64xf32>
    %cst_60 = arith.constant 1.000000e+00 : f32
    %123 = vector.broadcast %cst_60 : f32 to vector<10x64xf32>
    %124 = arith.addf %123, %122 : vector<10x64xf32>
    %cst_61 = arith.constant 5.000000e-01 : f32
    %125 = vector.broadcast %cst_61 : f32 to vector<10x64xf32>
    %126 = arith.mulf %125, %124 : vector<10x64xf32>
    %127 = arith.mulf %114, %126 : vector<10x64xf32>
    %c0_62 = arith.constant 0 : index
    %c0_63 = arith.constant 0 : index
    %c0_64 = arith.constant 0 : index
    %128 = vector.load %arg21[%c0_62, %c0_63, %c0_64] : memref<2x64x32xbf16, #tpu.memory_space<vmem>>, vector<1x64x32xbf16>
    %129 = vector.shape_cast %128 : vector<1x64x32xbf16> to vector<64x32xbf16>
    %130 = arith.truncf %127 : vector<10x64xf32> to vector<10x64xbf16>
    %cst_65 = arith.constant dense<0.000000e+00> : vector<10x32xf32>
    %131 = tpu.matmul %130, %129, %cst_65 {dimension_numbers = #tpu.dot_dimension_numbers<[1], [0], [0], [1], [0, 0, 1, 1], [], []>} : vector<10x64xbf16>, vector<64x32xbf16>, vector<10x32xf32> -> vector<10x32xf32>
    %132 = arith.addf %82, %131 : vector<10x32xf32>
    %c0_66 = arith.constant 0 : index
    %c0_67 = arith.constant 0 : index
    %c0_68 = arith.constant 0 : index
    %133 = vector.load %arg22[%c0_66, %c0_67, %c0_68] : memref<2x1x32xf32, #tpu.memory_space<vmem>>, vector<1x1x32xf32>
    %134 = vector.shape_cast %133 : vector<1x1x32xf32> to vector<1x32xf32>
    %135 = vector.broadcast %134 : vector<1x32xf32> to vector<10x32xf32>
    %136 = arith.addf %132, %135 : vector<10x32xf32>
    %c1 = arith.constant 1 : index
    %c0_69 = arith.constant 0 : index
    %c0_70 = arith.constant 0 : index
    %137 = vector.load %arg14[%c1, %c0_69, %c0_70] : memref<2x4x32xf32, #tpu.memory_space<vmem>>, vector<1x4x32xf32>
    %138 = vector.shape_cast %137 : vector<1x4x32xf32> to vector<4x32xf32>
    %139 = vector.extract_strided_slice %138 {offsets = [0, 0], sizes = [1, 32], strides = [1, 1]} : vector<4x32xf32> to vector<1x32xf32>
    %140 = vector.extract_strided_slice %138 {offsets = [1, 0], sizes = [1, 32], strides = [1, 1]} : vector<4x32xf32> to vector<1x32xf32>
    %cst_71 = arith.constant dense<0.000000e+00> : vector<10xf32>
    %141 = vector.multi_reduction <add>, %136, %cst_71 [1] : vector<10x32xf32> to vector<10xf32>
    %142 = vector.shape_cast %141 : vector<10xf32> to vector<10x1xf32>
    %cst_72 = arith.constant 3.200000e+01 : f32
    %143 = vector.broadcast %cst_72 : f32 to vector<10x1xf32>
    %144 = arith.divf %142, %143 : vector<10x1xf32>
    %145 = vector.broadcast %144 : vector<10x1xf32> to vector<10x32xf32>
    %146 = arith.subf %136, %145 : vector<10x32xf32>
    %147 = arith.mulf %146, %146 : vector<10x32xf32>
    %cst_73 = arith.constant dense<0.000000e+00> : vector<10xf32>
    %148 = vector.multi_reduction <add>, %147, %cst_73 [1] : vector<10x32xf32> to vector<10xf32>
    %149 = vector.shape_cast %148 : vector<10xf32> to vector<10x1xf32>
    %cst_74 = arith.constant 3.200000e+01 : f32
    %150 = vector.broadcast %cst_74 : f32 to vector<10x1xf32>
    %151 = arith.divf %149, %150 : vector<10x1xf32>
    %152 = vector.broadcast %144 : vector<10x1xf32> to vector<10x32xf32>
    %153 = arith.subf %136, %152 : vector<10x32xf32>
    %cst_75 = arith.constant 9.99999974E-6 : f32
    %154 = vector.broadcast %cst_75 : f32 to vector<10x1xf32>
    %155 = arith.addf %151, %154 : vector<10x1xf32>
    %156 = math.rsqrt %155 : vector<10x1xf32>
    %157 = vector.broadcast %156 : vector<10x1xf32> to vector<10x32xf32>
    %158 = arith.mulf %153, %157 : vector<10x32xf32>
    %159 = vector.broadcast %139 : vector<1x32xf32> to vector<10x32xf32>
    %160 = arith.mulf %158, %159 : vector<10x32xf32>
    %161 = vector.broadcast %140 : vector<1x32xf32> to vector<10x32xf32>
    %162 = arith.addf %160, %161 : vector<10x32xf32>
    %c1_76 = arith.constant 1 : index
    %c0_77 = arith.constant 0 : index
    %c0_78 = arith.constant 0 : index
    %163 = vector.load %arg15[%c1_76, %c0_77, %c0_78] : memref<2x32x96xbf16, #tpu.memory_space<vmem>>, vector<1x32x96xbf16>
    %164 = vector.shape_cast %163 : vector<1x32x96xbf16> to vector<32x96xbf16>
    %165 = arith.truncf %162 : vector<10x32xf32> to vector<10x32xbf16>
    %cst_79 = arith.constant dense<0.000000e+00> : vector<10x96xf32>
    %166 = tpu.matmul %165, %164, %cst_79 {dimension_numbers = #tpu.dot_dimension_numbers<[1], [0], [0], [1], [0, 0, 1, 1], [], []>} : vector<10x32xbf16>, vector<32x96xbf16>, vector<10x96xf32> -> vector<10x96xf32>
    %c1_80 = arith.constant 1 : index
    %c0_81 = arith.constant 0 : index
    %c0_82 = arith.constant 0 : index
    %167 = vector.load %arg16[%c1_80, %c0_81, %c0_82] : memref<2x1x96xf32, #tpu.memory_space<vmem>>, vector<1x1x96xf32>
    %168 = vector.shape_cast %167 : vector<1x1x96xf32> to vector<1x96xf32>
    %169 = vector.broadcast %168 : vector<1x96xf32> to vector<10x96xf32>
    %170 = arith.addf %166, %169 : vector<10x96xf32>
    %171 = vector.extract_strided_slice %170 {offsets = [0, 0], sizes = [10, 32], strides = [1, 1]} : vector<10x96xf32> to vector<10x32xf32>
    %172 = vector.extract_strided_slice %170 {offsets = [0, 32], sizes = [10, 32], strides = [1, 1]} : vector<10x96xf32> to vector<10x32xf32>
    %173 = vector.extract_strided_slice %170 {offsets = [0, 64], sizes = [10, 32], strides = [1, 1]} : vector<10x96xf32> to vector<10x32xf32>
    %cst_83 = arith.constant dense<0.000000e+00> : vector<40x32xf32>
    %174 = tpu.matmul %11, %172, %cst_83 {dimension_numbers = #tpu.dot_dimension_numbers<[1], [0], [0], [1], [0, 0, 1, 1], [], []>} : vector<40x10xf32>, vector<10x32xf32>, vector<40x32xf32> -> vector<40x32xf32>
    %175 = arith.mulf %174, %12 : vector<40x32xf32>
    %cst_84 = arith.constant dense<0.000000e+00> : vector<40x32xf32>
    %176 = tpu.matmul %11, %173, %cst_84 {dimension_numbers = #tpu.dot_dimension_numbers<[1], [0], [0], [1], [0, 0, 1, 1], [], []>} : vector<40x10xf32>, vector<10x32xf32>, vector<40x32xf32> -> vector<40x32xf32>
    %177 = arith.mulf %176, %12 : vector<40x32xf32>
    %178 = arith.truncf %171 : vector<10x32xf32> to vector<10x32xbf16>
    %179 = arith.truncf %175 : vector<40x32xf32> to vector<40x32xbf16>
    %cst_85 = arith.constant dense<0.000000e+00> : vector<10x40xf32>
    %180 = tpu.matmul %178, %179, %cst_85 {dimension_numbers = #tpu.dot_dimension_numbers<[1], [1], [0], [0], [0, 0, 1, 0], [], []>} : vector<10x32xbf16>, vector<40x32xbf16>, vector<10x40xf32> -> vector<10x40xf32>
    %cst_86 = arith.constant 0.353553385 : f32
    %181 = vector.broadcast %cst_86 : f32 to vector<10x40xf32>
    %182 = arith.mulf %180, %181 : vector<10x40xf32>
    %183 = arith.addf %182, %13 : vector<10x40xf32>
    %cst_87 = arith.constant dense<0xFF800000> : vector<10xf32>
    %184 = vector.multi_reduction <maximumf>, %183, %cst_87 [1] : vector<10x40xf32> to vector<10xf32>
    %185 = vector.shape_cast %184 : vector<10xf32> to vector<10x1xf32>
    %186 = vector.broadcast %185 : vector<10x1xf32> to vector<10x40xf32>
    %187 = arith.subf %183, %186 : vector<10x40xf32>
    %188 = math.exp %187 : vector<10x40xf32>
    %189 = arith.truncf %188 : vector<10x40xf32> to vector<10x40xbf16>
    %190 = arith.truncf %177 : vector<40x32xf32> to vector<40x32xbf16>
    %cst_88 = arith.constant dense<0.000000e+00> : vector<10x32xf32>
    %191 = tpu.matmul %189, %190, %cst_88 {dimension_numbers = #tpu.dot_dimension_numbers<[1], [0], [0], [1], [0, 0, 1, 1], [], []>} : vector<10x40xbf16>, vector<40x32xbf16>, vector<10x32xf32> -> vector<10x32xf32>
    %cst_89 = arith.constant dense<0.000000e+00> : vector<10x32xf32>
    %192 = tpu.matmul %188, %12, %cst_89 {dimension_numbers = #tpu.dot_dimension_numbers<[1], [0], [0], [1], [0, 0, 1, 1], [], []>} : vector<10x40xf32>, vector<40x32xf32>, vector<10x32xf32> -> vector<10x32xf32>
    %cst_90 = arith.constant 1.000000e-30 : f32
    %193 = vector.broadcast %cst_90 : f32 to vector<10x32xf32>
    %194 = arith.maximumf %192, %193 : vector<10x32xf32>
    %195 = tpu.reciprocal %194 {approx = true} : vector<10x32xf32> -> vector<10x32xf32>
    %196 = arith.mulf %191, %195 : vector<10x32xf32>
    %c1_91 = arith.constant 1 : index
    %c0_92 = arith.constant 0 : index
    %c0_93 = arith.constant 0 : index
    %197 = vector.load %arg17[%c1_91, %c0_92, %c0_93] : memref<2x32x32xbf16, #tpu.memory_space<vmem>>, vector<1x32x32xbf16>
    %198 = vector.shape_cast %197 : vector<1x32x32xbf16> to vector<32x32xbf16>
    %199 = arith.truncf %196 : vector<10x32xf32> to vector<10x32xbf16>
    %cst_94 = arith.constant dense<0.000000e+00> : vector<10x32xf32>
    %200 = tpu.matmul %199, %198, %cst_94 {dimension_numbers = #tpu.dot_dimension_numbers<[1], [0], [0], [1], [0, 0, 1, 1], [], []>} : vector<10x32xbf16>, vector<32x32xbf16>, vector<10x32xf32> -> vector<10x32xf32>
    %201 = arith.addf %136, %200 : vector<10x32xf32>
    %c1_95 = arith.constant 1 : index
    %c0_96 = arith.constant 0 : index
    %c0_97 = arith.constant 0 : index
    %202 = vector.load %arg18[%c1_95, %c0_96, %c0_97] : memref<2x1x32xf32, #tpu.memory_space<vmem>>, vector<1x1x32xf32>
    %203 = vector.shape_cast %202 : vector<1x1x32xf32> to vector<1x32xf32>
    %204 = vector.broadcast %203 : vector<1x32xf32> to vector<10x32xf32>
    %205 = arith.addf %201, %204 : vector<10x32xf32>
    %206 = vector.extract_strided_slice %138 {offsets = [2, 0], sizes = [1, 32], strides = [1, 1]} : vector<4x32xf32> to vector<1x32xf32>
    %207 = vector.extract_strided_slice %138 {offsets = [3, 0], sizes = [1, 32], strides = [1, 1]} : vector<4x32xf32> to vector<1x32xf32>
    %cst_98 = arith.constant dense<0.000000e+00> : vector<10xf32>
    %208 = vector.multi_reduction <add>, %205, %cst_98 [1] : vector<10x32xf32> to vector<10xf32>
    %209 = vector.shape_cast %208 : vector<10xf32> to vector<10x1xf32>
    %cst_99 = arith.constant 3.200000e+01 : f32
    %210 = vector.broadcast %cst_99 : f32 to vector<10x1xf32>
    %211 = arith.divf %209, %210 : vector<10x1xf32>
    %212 = vector.broadcast %211 : vector<10x1xf32> to vector<10x32xf32>
    %213 = arith.subf %205, %212 : vector<10x32xf32>
    %214 = arith.mulf %213, %213 : vector<10x32xf32>
    %cst_100 = arith.constant dense<0.000000e+00> : vector<10xf32>
    %215 = vector.multi_reduction <add>, %214, %cst_100 [1] : vector<10x32xf32> to vector<10xf32>
    %216 = vector.shape_cast %215 : vector<10xf32> to vector<10x1xf32>
    %cst_101 = arith.constant 3.200000e+01 : f32
    %217 = vector.broadcast %cst_101 : f32 to vector<10x1xf32>
    %218 = arith.divf %216, %217 : vector<10x1xf32>
    %219 = vector.broadcast %211 : vector<10x1xf32> to vector<10x32xf32>
    %220 = arith.subf %205, %219 : vector<10x32xf32>
    %cst_102 = arith.constant 9.99999974E-6 : f32
    %221 = vector.broadcast %cst_102 : f32 to vector<10x1xf32>
    %222 = arith.addf %218, %221 : vector<10x1xf32>
    %223 = math.rsqrt %222 : vector<10x1xf32>
    %224 = vector.broadcast %223 : vector<10x1xf32> to vector<10x32xf32>
    %225 = arith.mulf %220, %224 : vector<10x32xf32>
    %226 = vector.broadcast %206 : vector<1x32xf32> to vector<10x32xf32>
    %227 = arith.mulf %225, %226 : vector<10x32xf32>
    %228 = vector.broadcast %207 : vector<1x32xf32> to vector<10x32xf32>
    %229 = arith.addf %227, %228 : vector<10x32xf32>
    %c1_103 = arith.constant 1 : index
    %c0_104 = arith.constant 0 : index
    %c0_105 = arith.constant 0 : index
    %230 = vector.load %arg19[%c1_103, %c0_104, %c0_105] : memref<2x32x64xbf16, #tpu.memory_space<vmem>>, vector<1x32x64xbf16>
    %231 = vector.shape_cast %230 : vector<1x32x64xbf16> to vector<32x64xbf16>
    %232 = arith.truncf %229 : vector<10x32xf32> to vector<10x32xbf16>
    %cst_106 = arith.constant dense<0.000000e+00> : vector<10x64xf32>
    %233 = tpu.matmul %232, %231, %cst_106 {dimension_numbers = #tpu.dot_dimension_numbers<[1], [0], [0], [1], [0, 0, 1, 1], [], []>} : vector<10x32xbf16>, vector<32x64xbf16>, vector<10x64xf32> -> vector<10x64xf32>
    %c1_107 = arith.constant 1 : index
    %c0_108 = arith.constant 0 : index
    %c0_109 = arith.constant 0 : index
    %234 = vector.load %arg20[%c1_107, %c0_108, %c0_109] : memref<2x1x64xf32, #tpu.memory_space<vmem>>, vector<1x1x64xf32>
    %235 = vector.shape_cast %234 : vector<1x1x64xf32> to vector<1x64xf32>
    %236 = vector.broadcast %235 : vector<1x64xf32> to vector<10x64xf32>
    %237 = arith.addf %233, %236 : vector<10x64xf32>
    %238 = arith.mulf %237, %237 : vector<10x64xf32>
    %239 = arith.mulf %237, %238 : vector<10x64xf32>
    %cst_110 = arith.constant 4.471500e-02 : f32
    %240 = vector.broadcast %cst_110 : f32 to vector<10x64xf32>
    %241 = arith.mulf %240, %239 : vector<10x64xf32>
    %242 = arith.addf %237, %241 : vector<10x64xf32>
    %cst_111 = arith.constant 0.797884583 : f32
    %243 = vector.broadcast %cst_111 : f32 to vector<10x64xf32>
    %244 = arith.mulf %243, %242 : vector<10x64xf32>
    %245 = math.tanh %244 : vector<10x64xf32>
    %cst_112 = arith.constant 1.000000e+00 : f32
    %246 = vector.broadcast %cst_112 : f32 to vector<10x64xf32>
    %247 = arith.addf %246, %245 : vector<10x64xf32>
    %cst_113 = arith.constant 5.000000e-01 : f32
    %248 = vector.broadcast %cst_113 : f32 to vector<10x64xf32>
    %249 = arith.mulf %248, %247 : vector<10x64xf32>
    %250 = arith.mulf %237, %249 : vector<10x64xf32>
    %c1_114 = arith.constant 1 : index
    %c0_115 = arith.constant 0 : index
    %c0_116 = arith.constant 0 : index
    %251 = vector.load %arg21[%c1_114, %c0_115, %c0_116] : memref<2x64x32xbf16, #tpu.memory_space<vmem>>, vector<1x64x32xbf16>
    %252 = vector.shape_cast %251 : vector<1x64x32xbf16> to vector<64x32xbf16>
    %253 = arith.truncf %250 : vector<10x64xf32> to vector<10x64xbf16>
    %cst_117 = arith.constant dense<0.000000e+00> : vector<10x32xf32>
    %254 = tpu.matmul %253, %252, %cst_117 {dimension_numbers = #tpu.dot_dimension_numbers<[1], [0], [0], [1], [0, 0, 1, 1], [], []>} : vector<10x64xbf16>, vector<64x32xbf16>, vector<10x32xf32> -> vector<10x32xf32>
    %255 = arith.addf %205, %254 : vector<10x32xf32>
    %c1_118 = arith.constant 1 : index
    %c0_119 = arith.constant 0 : index
    %c0_120 = arith.constant 0 : index
    %256 = vector.load %arg22[%c1_118, %c0_119, %c0_120] : memref<2x1x32xf32, #tpu.memory_space<vmem>>, vector<1x1x32xf32>
    %257 = vector.shape_cast %256 : vector<1x1x32xf32> to vector<1x32xf32>
    %258 = vector.broadcast %257 : vector<1x32xf32> to vector<10x32xf32>
    %259 = arith.addf %255, %258 : vector<10x32xf32>
    %c0_121 = arith.constant 0 : index
    %c0_122 = arith.constant 0 : index
    %260 = vector.load %arg4[%c0_121, %c0_122] : memref<2x10xf32, #tpu.memory_space<vmem>>, vector<2x10xf32>
    %cst_123 = arith.constant dense<0.000000e+00> : vector<2x32xf32>
    %261 = tpu.matmul %260, %259, %cst_123 {dimension_numbers = #tpu.dot_dimension_numbers<[1], [0], [0], [1], [0, 0, 1, 1], [], []>} : vector<2x10xf32>, vector<10x32xf32>, vector<2x32xf32> -> vector<2x32xf32>
    %c0_124 = arith.constant 0 : index
    %c0_125 = arith.constant 0 : index
    %262 = vector.load %arg23[%c0_124, %c0_125] : memref<2x32xf32, #tpu.memory_space<vmem>>, vector<2x32xf32>
    %263 = vector.extract_strided_slice %262 {offsets = [0, 0], sizes = [1, 32], strides = [1, 1]} : vector<2x32xf32> to vector<1x32xf32>
    %264 = vector.extract_strided_slice %262 {offsets = [1, 0], sizes = [1, 32], strides = [1, 1]} : vector<2x32xf32> to vector<1x32xf32>
    %cst_126 = arith.constant dense<0.000000e+00> : vector<2xf32>
    %265 = vector.multi_reduction <add>, %261, %cst_126 [1] : vector<2x32xf32> to vector<2xf32>
    %266 = vector.shape_cast %265 : vector<2xf32> to vector<2x1xf32>
    %cst_127 = arith.constant 3.200000e+01 : f32
    %267 = vector.broadcast %cst_127 : f32 to vector<2x1xf32>
    %268 = arith.divf %266, %267 : vector<2x1xf32>
    %269 = vector.broadcast %268 : vector<2x1xf32> to vector<2x32xf32>
    %270 = arith.subf %261, %269 : vector<2x32xf32>
    %271 = arith.mulf %270, %270 : vector<2x32xf32>
    %cst_128 = arith.constant dense<0.000000e+00> : vector<2xf32>
    %272 = vector.multi_reduction <add>, %271, %cst_128 [1] : vector<2x32xf32> to vector<2xf32>
    %273 = vector.shape_cast %272 : vector<2xf32> to vector<2x1xf32>
    %cst_129 = arith.constant 3.200000e+01 : f32
    %274 = vector.broadcast %cst_129 : f32 to vector<2x1xf32>
    %275 = arith.divf %273, %274 : vector<2x1xf32>
    %276 = vector.broadcast %268 : vector<2x1xf32> to vector<2x32xf32>
    %277 = arith.subf %261, %276 : vector<2x32xf32>
    %cst_130 = arith.constant 9.99999974E-6 : f32
    %278 = vector.broadcast %cst_130 : f32 to vector<2x1xf32>
    %279 = arith.addf %275, %278 : vector<2x1xf32>
    %280 = math.rsqrt %279 : vector<2x1xf32>
    %281 = vector.broadcast %280 : vector<2x1xf32> to vector<2x32xf32>
    %282 = arith.mulf %277, %281 : vector<2x32xf32>
    %283 = vector.broadcast %263 : vector<1x32xf32> to vector<2x32xf32>
    %284 = arith.mulf %282, %283 : vector<2x32xf32>
    %285 = vector.broadcast %264 : vector<1x32xf32> to vector<2x32xf32>
    %286 = arith.addf %284, %285 : vector<2x32xf32>
    %c0_131 = arith.constant 0 : index
    %c0_132 = arith.constant 0 : index
    %287 = vector.load %arg24[%c0_131, %c0_132] : memref<32x32xbf16, #tpu.memory_space<vmem>>, vector<32x32xbf16>
    %288 = arith.truncf %286 : vector<2x32xf32> to vector<2x32xbf16>
    %cst_133 = arith.constant dense<0.000000e+00> : vector<2x32xf32>
    %289 = tpu.matmul %288, %287, %cst_133 {dimension_numbers = #tpu.dot_dimension_numbers<[1], [0], [0], [1], [0, 0, 1, 1], [], []>} : vector<2x32xbf16>, vector<32x32xbf16>, vector<2x32xf32> -> vector<2x32xf32>
    %c0_134 = arith.constant 0 : index
    %c0_135 = arith.constant 0 : index
    %290 = vector.load %arg25[%c0_134, %c0_135] : memref<1x32xf32, #tpu.memory_space<vmem>>, vector<1x32xf32>
    %291 = vector.broadcast %290 : vector<1x32xf32> to vector<2x32xf32>
    %292 = arith.addf %289, %291 : vector<2x32xf32>
    %c0_136 = arith.constant 0 : index
    %c0_137 = arith.constant 0 : index
    %293 = vector.load %arg5[%c0_136, %c0_137] : memref<16x2xf32, #tpu.memory_space<vmem>>, vector<16x2xf32>
    %cst_138 = arith.constant dense<0.000000e+00> : vector<16x32xf32>
    %294 = tpu.matmul %293, %292, %cst_138 {dimension_numbers = #tpu.dot_dimension_numbers<[1], [0], [0], [1], [0, 0, 1, 1], [], []>} : vector<16x2xf32>, vector<2x32xf32>, vector<16x32xf32> -> vector<16x32xf32>
    %c0_139 = arith.constant 0 : index
    %c0_140 = arith.constant 0 : index
    %295 = vector.load %arg1[%c0_139, %c0_140] : memref<16x32xf32, #tpu.memory_space<vmem>>, vector<16x32xf32>
    %c0_141 = arith.constant 0 : index
    %c0_142 = arith.constant 0 : index
    %296 = vector.load %arg9[%c0_141, %c0_142] : memref<64x16xf32, #tpu.memory_space<vmem>>, vector<64x16xf32>
    %c0_143 = arith.constant 0 : index
    %c0_144 = arith.constant 0 : index
    %297 = vector.load %arg10[%c0_143, %c0_144] : memref<64x32xf32, #tpu.memory_space<vmem>>, vector<64x32xf32>
    %c0_145 = arith.constant 0 : index
    %c0_146 = arith.constant 0 : index
    %298 = vector.load %arg11[%c0_145, %c0_146] : memref<16x64xf32, #tpu.memory_space<vmem>>, vector<16x64xf32>
    %c0_147 = arith.constant 0 : index
    %c0_148 = arith.constant 0 : index
    %c0_149 = arith.constant 0 : index
    %299 = vector.load %arg26[%c0_147, %c0_148, %c0_149] : memref<2x6x32xf32, #tpu.memory_space<vmem>>, vector<1x6x32xf32>
    %300 = vector.shape_cast %299 : vector<1x6x32xf32> to vector<6x32xf32>
    %c0_150 = arith.constant 0 : index
    %c0_151 = arith.constant 0 : index
    %c0_152 = arith.constant 0 : index
    %301 = vector.load %arg27[%c0_150, %c0_151, %c0_152] : memref<2x32x96xbf16, #tpu.memory_space<vmem>>, vector<1x32x96xbf16>
    %302 = vector.shape_cast %301 : vector<1x32x96xbf16> to vector<32x96xbf16>
    %303 = arith.truncf %295 : vector<16x32xf32> to vector<16x32xbf16>
    %cst_153 = arith.constant dense<0.000000e+00> : vector<16x96xf32>
    %304 = tpu.matmul %303, %302, %cst_153 {dimension_numbers = #tpu.dot_dimension_numbers<[1], [0], [0], [1], [0, 0, 1, 1], [], []>} : vector<16x32xbf16>, vector<32x96xbf16>, vector<16x96xf32> -> vector<16x96xf32>
    %c0_154 = arith.constant 0 : index
    %c0_155 = arith.constant 0 : index
    %c0_156 = arith.constant 0 : index
    %305 = vector.load %arg28[%c0_154, %c0_155, %c0_156] : memref<2x1x96xf32, #tpu.memory_space<vmem>>, vector<1x1x96xf32>
    %306 = vector.shape_cast %305 : vector<1x1x96xf32> to vector<1x96xf32>
    %307 = vector.broadcast %306 : vector<1x96xf32> to vector<16x96xf32>
    %308 = arith.addf %304, %307 : vector<16x96xf32>
    %309 = vector.extract_strided_slice %308 {offsets = [0, 0], sizes = [16, 32], strides = [1, 1]} : vector<16x96xf32> to vector<16x32xf32>
    %310 = vector.extract_strided_slice %308 {offsets = [0, 32], sizes = [16, 32], strides = [1, 1]} : vector<16x96xf32> to vector<16x32xf32>
    %311 = vector.extract_strided_slice %308 {offsets = [0, 64], sizes = [16, 32], strides = [1, 1]} : vector<16x96xf32> to vector<16x32xf32>
    %cst_157 = arith.constant dense<0.000000e+00> : vector<64x32xf32>
    %312 = tpu.matmul %296, %310, %cst_157 {dimension_numbers = #tpu.dot_dimension_numbers<[1], [0], [0], [1], [0, 0, 1, 1], [], []>} : vector<64x16xf32>, vector<16x32xf32>, vector<64x32xf32> -> vector<64x32xf32>
    %313 = arith.mulf %312, %297 : vector<64x32xf32>
    %cst_158 = arith.constant dense<0.000000e+00> : vector<64x32xf32>
    %314 = tpu.matmul %296, %311, %cst_158 {dimension_numbers = #tpu.dot_dimension_numbers<[1], [0], [0], [1], [0, 0, 1, 1], [], []>} : vector<64x16xf32>, vector<16x32xf32>, vector<64x32xf32> -> vector<64x32xf32>
    %315 = arith.mulf %314, %297 : vector<64x32xf32>
    %316 = arith.truncf %309 : vector<16x32xf32> to vector<16x32xbf16>
    %317 = arith.truncf %313 : vector<64x32xf32> to vector<64x32xbf16>
    %cst_159 = arith.constant dense<0.000000e+00> : vector<16x64xf32>
    %318 = tpu.matmul %316, %317, %cst_159 {dimension_numbers = #tpu.dot_dimension_numbers<[1], [1], [0], [0], [0, 0, 1, 0], [], []>} : vector<16x32xbf16>, vector<64x32xbf16>, vector<16x64xf32> -> vector<16x64xf32>
    %cst_160 = arith.constant 0.353553385 : f32
    %319 = vector.broadcast %cst_160 : f32 to vector<16x64xf32>
    %320 = arith.mulf %318, %319 : vector<16x64xf32>
    %321 = arith.addf %320, %298 : vector<16x64xf32>
    %cst_161 = arith.constant dense<0xFF800000> : vector<16xf32>
    %322 = vector.multi_reduction <maximumf>, %321, %cst_161 [1] : vector<16x64xf32> to vector<16xf32>
    %323 = vector.shape_cast %322 : vector<16xf32> to vector<16x1xf32>
    %324 = vector.broadcast %323 : vector<16x1xf32> to vector<16x64xf32>
    %325 = arith.subf %321, %324 : vector<16x64xf32>
    %326 = math.exp %325 : vector<16x64xf32>
    %327 = arith.truncf %326 : vector<16x64xf32> to vector<16x64xbf16>
    %328 = arith.truncf %315 : vector<64x32xf32> to vector<64x32xbf16>
    %cst_162 = arith.constant dense<0.000000e+00> : vector<16x32xf32>
    %329 = tpu.matmul %327, %328, %cst_162 {dimension_numbers = #tpu.dot_dimension_numbers<[1], [0], [0], [1], [0, 0, 1, 1], [], []>} : vector<16x64xbf16>, vector<64x32xbf16>, vector<16x32xf32> -> vector<16x32xf32>
    %cst_163 = arith.constant dense<0.000000e+00> : vector<16x32xf32>
    %330 = tpu.matmul %326, %297, %cst_163 {dimension_numbers = #tpu.dot_dimension_numbers<[1], [0], [0], [1], [0, 0, 1, 1], [], []>} : vector<16x64xf32>, vector<64x32xf32>, vector<16x32xf32> -> vector<16x32xf32>
    %cst_164 = arith.constant 1.000000e-30 : f32
    %331 = vector.broadcast %cst_164 : f32 to vector<16x32xf32>
    %332 = arith.maximumf %330, %331 : vector<16x32xf32>
    %333 = tpu.reciprocal %332 {approx = true} : vector<16x32xf32> -> vector<16x32xf32>
    %334 = arith.mulf %329, %333 : vector<16x32xf32>
    %c0_165 = arith.constant 0 : index
    %c0_166 = arith.constant 0 : index
    %c0_167 = arith.constant 0 : index
    %335 = vector.load %arg29[%c0_165, %c0_166, %c0_167] : memref<2x32x32xbf16, #tpu.memory_space<vmem>>, vector<1x32x32xbf16>
    %336 = vector.shape_cast %335 : vector<1x32x32xbf16> to vector<32x32xbf16>
    %337 = arith.truncf %334 : vector<16x32xf32> to vector<16x32xbf16>
    %cst_168 = arith.constant dense<0.000000e+00> : vector<16x32xf32>
    %338 = tpu.matmul %337, %336, %cst_168 {dimension_numbers = #tpu.dot_dimension_numbers<[1], [0], [0], [1], [0, 0, 1, 1], [], []>} : vector<16x32xbf16>, vector<32x32xbf16>, vector<16x32xf32> -> vector<16x32xf32>
    %339 = arith.addf %295, %338 : vector<16x32xf32>
    %c0_169 = arith.constant 0 : index
    %c0_170 = arith.constant 0 : index
    %c0_171 = arith.constant 0 : index
    %340 = vector.load %arg30[%c0_169, %c0_170, %c0_171] : memref<2x1x32xf32, #tpu.memory_space<vmem>>, vector<1x1x32xf32>
    %341 = vector.shape_cast %340 : vector<1x1x32xf32> to vector<1x32xf32>
    %342 = vector.broadcast %341 : vector<1x32xf32> to vector<16x32xf32>
    %343 = arith.addf %339, %342 : vector<16x32xf32>
    %344 = vector.extract_strided_slice %300 {offsets = [0, 0], sizes = [1, 32], strides = [1, 1]} : vector<6x32xf32> to vector<1x32xf32>
    %345 = vector.extract_strided_slice %300 {offsets = [1, 0], sizes = [1, 32], strides = [1, 1]} : vector<6x32xf32> to vector<1x32xf32>
    %cst_172 = arith.constant dense<0.000000e+00> : vector<16xf32>
    %346 = vector.multi_reduction <add>, %343, %cst_172 [1] : vector<16x32xf32> to vector<16xf32>
    %347 = vector.shape_cast %346 : vector<16xf32> to vector<16x1xf32>
    %cst_173 = arith.constant 3.200000e+01 : f32
    %348 = vector.broadcast %cst_173 : f32 to vector<16x1xf32>
    %349 = arith.divf %347, %348 : vector<16x1xf32>
    %350 = vector.broadcast %349 : vector<16x1xf32> to vector<16x32xf32>
    %351 = arith.subf %343, %350 : vector<16x32xf32>
    %352 = arith.mulf %351, %351 : vector<16x32xf32>
    %cst_174 = arith.constant dense<0.000000e+00> : vector<16xf32>
    %353 = vector.multi_reduction <add>, %352, %cst_174 [1] : vector<16x32xf32> to vector<16xf32>
    %354 = vector.shape_cast %353 : vector<16xf32> to vector<16x1xf32>
    %cst_175 = arith.constant 3.200000e+01 : f32
    %355 = vector.broadcast %cst_175 : f32 to vector<16x1xf32>
    %356 = arith.divf %354, %355 : vector<16x1xf32>
    %357 = vector.broadcast %349 : vector<16x1xf32> to vector<16x32xf32>
    %358 = arith.subf %343, %357 : vector<16x32xf32>
    %cst_176 = arith.constant 9.99999974E-6 : f32
    %359 = vector.broadcast %cst_176 : f32 to vector<16x1xf32>
    %360 = arith.addf %356, %359 : vector<16x1xf32>
    %361 = math.rsqrt %360 : vector<16x1xf32>
    %362 = vector.broadcast %361 : vector<16x1xf32> to vector<16x32xf32>
    %363 = arith.mulf %358, %362 : vector<16x32xf32>
    %364 = vector.broadcast %344 : vector<1x32xf32> to vector<16x32xf32>
    %365 = arith.mulf %363, %364 : vector<16x32xf32>
    %366 = vector.broadcast %345 : vector<1x32xf32> to vector<16x32xf32>
    %367 = arith.addf %365, %366 : vector<16x32xf32>
    %c0_177 = arith.constant 0 : index
    %c0_178 = arith.constant 0 : index
    %c0_179 = arith.constant 0 : index
    %368 = vector.load %arg31[%c0_177, %c0_178, %c0_179] : memref<2x32x32xbf16, #tpu.memory_space<vmem>>, vector<1x32x32xbf16>
    %369 = vector.shape_cast %368 : vector<1x32x32xbf16> to vector<32x32xbf16>
    %370 = arith.truncf %294 : vector<16x32xf32> to vector<16x32xbf16>
    %cst_180 = arith.constant dense<0.000000e+00> : vector<16x32xf32>
    %371 = tpu.matmul %370, %369, %cst_180 {dimension_numbers = #tpu.dot_dimension_numbers<[1], [0], [0], [1], [0, 0, 1, 1], [], []>} : vector<16x32xbf16>, vector<32x32xbf16>, vector<16x32xf32> -> vector<16x32xf32>
    %372 = arith.addf %367, %371 : vector<16x32xf32>
    %c0_181 = arith.constant 0 : index
    %c0_182 = arith.constant 0 : index
    %c0_183 = arith.constant 0 : index
    %373 = vector.load %arg32[%c0_181, %c0_182, %c0_183] : memref<2x1x32xf32, #tpu.memory_space<vmem>>, vector<1x1x32xf32>
    %374 = vector.shape_cast %373 : vector<1x1x32xf32> to vector<1x32xf32>
    %375 = vector.broadcast %374 : vector<1x32xf32> to vector<16x32xf32>
    %376 = arith.addf %372, %375 : vector<16x32xf32>
    %377 = vector.extract_strided_slice %300 {offsets = [2, 0], sizes = [1, 32], strides = [1, 1]} : vector<6x32xf32> to vector<1x32xf32>
    %378 = vector.extract_strided_slice %300 {offsets = [3, 0], sizes = [1, 32], strides = [1, 1]} : vector<6x32xf32> to vector<1x32xf32>
    %cst_184 = arith.constant dense<0.000000e+00> : vector<16xf32>
    %379 = vector.multi_reduction <add>, %376, %cst_184 [1] : vector<16x32xf32> to vector<16xf32>
    %380 = vector.shape_cast %379 : vector<16xf32> to vector<16x1xf32>
    %cst_185 = arith.constant 3.200000e+01 : f32
    %381 = vector.broadcast %cst_185 : f32 to vector<16x1xf32>
    %382 = arith.divf %380, %381 : vector<16x1xf32>
    %383 = vector.broadcast %382 : vector<16x1xf32> to vector<16x32xf32>
    %384 = arith.subf %376, %383 : vector<16x32xf32>
    %385 = arith.mulf %384, %384 : vector<16x32xf32>
    %cst_186 = arith.constant dense<0.000000e+00> : vector<16xf32>
    %386 = vector.multi_reduction <add>, %385, %cst_186 [1] : vector<16x32xf32> to vector<16xf32>
    %387 = vector.shape_cast %386 : vector<16xf32> to vector<16x1xf32>
    %cst_187 = arith.constant 3.200000e+01 : f32
    %388 = vector.broadcast %cst_187 : f32 to vector<16x1xf32>
    %389 = arith.divf %387, %388 : vector<16x1xf32>
    %390 = vector.broadcast %382 : vector<16x1xf32> to vector<16x32xf32>
    %391 = arith.subf %376, %390 : vector<16x32xf32>
    %cst_188 = arith.constant 9.99999974E-6 : f32
    %392 = vector.broadcast %cst_188 : f32 to vector<16x1xf32>
    %393 = arith.addf %389, %392 : vector<16x1xf32>
    %394 = math.rsqrt %393 : vector<16x1xf32>
    %395 = vector.broadcast %394 : vector<16x1xf32> to vector<16x32xf32>
    %396 = arith.mulf %391, %395 : vector<16x32xf32>
    %397 = vector.broadcast %377 : vector<1x32xf32> to vector<16x32xf32>
    %398 = arith.mulf %396, %397 : vector<16x32xf32>
    %399 = vector.broadcast %378 : vector<1x32xf32> to vector<16x32xf32>
    %400 = arith.addf %398, %399 : vector<16x32xf32>
    %c0_189 = arith.constant 0 : index
    %c0_190 = arith.constant 0 : index
    %c0_191 = arith.constant 0 : index
    %401 = vector.load %arg33[%c0_189, %c0_190, %c0_191] : memref<2x32x64xbf16, #tpu.memory_space<vmem>>, vector<1x32x64xbf16>
    %402 = vector.shape_cast %401 : vector<1x32x64xbf16> to vector<32x64xbf16>
    %403 = arith.truncf %400 : vector<16x32xf32> to vector<16x32xbf16>
    %cst_192 = arith.constant dense<0.000000e+00> : vector<16x64xf32>
    %404 = tpu.matmul %403, %402, %cst_192 {dimension_numbers = #tpu.dot_dimension_numbers<[1], [0], [0], [1], [0, 0, 1, 1], [], []>} : vector<16x32xbf16>, vector<32x64xbf16>, vector<16x64xf32> -> vector<16x64xf32>
    %c0_193 = arith.constant 0 : index
    %c0_194 = arith.constant 0 : index
    %c0_195 = arith.constant 0 : index
    %405 = vector.load %arg34[%c0_193, %c0_194, %c0_195] : memref<2x1x64xf32, #tpu.memory_space<vmem>>, vector<1x1x64xf32>
    %406 = vector.shape_cast %405 : vector<1x1x64xf32> to vector<1x64xf32>
    %407 = vector.broadcast %406 : vector<1x64xf32> to vector<16x64xf32>
    %408 = arith.addf %404, %407 : vector<16x64xf32>
    %409 = arith.mulf %408, %408 : vector<16x64xf32>
    %410 = arith.mulf %408, %409 : vector<16x64xf32>
    %cst_196 = arith.constant 4.471500e-02 : f32
    %411 = vector.broadcast %cst_196 : f32 to vector<16x64xf32>
    %412 = arith.mulf %411, %410 : vector<16x64xf32>
    %413 = arith.addf %408, %412 : vector<16x64xf32>
    %cst_197 = arith.constant 0.797884583 : f32
    %414 = vector.broadcast %cst_197 : f32 to vector<16x64xf32>
    %415 = arith.mulf %414, %413 : vector<16x64xf32>
    %416 = math.tanh %415 : vector<16x64xf32>
    %cst_198 = arith.constant 1.000000e+00 : f32
    %417 = vector.broadcast %cst_198 : f32 to vector<16x64xf32>
    %418 = arith.addf %417, %416 : vector<16x64xf32>
    %cst_199 = arith.constant 5.000000e-01 : f32
    %419 = vector.broadcast %cst_199 : f32 to vector<16x64xf32>
    %420 = arith.mulf %419, %418 : vector<16x64xf32>
    %421 = arith.mulf %408, %420 : vector<16x64xf32>
    %c0_200 = arith.constant 0 : index
    %c0_201 = arith.constant 0 : index
    %c0_202 = arith.constant 0 : index
    %422 = vector.load %arg35[%c0_200, %c0_201, %c0_202] : memref<2x64x32xbf16, #tpu.memory_space<vmem>>, vector<1x64x32xbf16>
    %423 = vector.shape_cast %422 : vector<1x64x32xbf16> to vector<64x32xbf16>
    %424 = arith.truncf %421 : vector<16x64xf32> to vector<16x64xbf16>
    %cst_203 = arith.constant dense<0.000000e+00> : vector<16x32xf32>
    %425 = tpu.matmul %424, %423, %cst_203 {dimension_numbers = #tpu.dot_dimension_numbers<[1], [0], [0], [1], [0, 0, 1, 1], [], []>} : vector<16x64xbf16>, vector<64x32xbf16>, vector<16x32xf32> -> vector<16x32xf32>
    %426 = arith.addf %400, %425 : vector<16x32xf32>
    %c0_204 = arith.constant 0 : index
    %c0_205 = arith.constant 0 : index
    %c0_206 = arith.constant 0 : index
    %427 = vector.load %arg36[%c0_204, %c0_205, %c0_206] : memref<2x1x32xf32, #tpu.memory_space<vmem>>, vector<1x1x32xf32>
    %428 = vector.shape_cast %427 : vector<1x1x32xf32> to vector<1x32xf32>
    %429 = vector.broadcast %428 : vector<1x32xf32> to vector<16x32xf32>
    %430 = arith.addf %426, %429 : vector<16x32xf32>
    %431 = vector.extract_strided_slice %300 {offsets = [4, 0], sizes = [1, 32], strides = [1, 1]} : vector<6x32xf32> to vector<1x32xf32>
    %432 = vector.extract_strided_slice %300 {offsets = [5, 0], sizes = [1, 32], strides = [1, 1]} : vector<6x32xf32> to vector<1x32xf32>
    %cst_207 = arith.constant dense<0.000000e+00> : vector<16xf32>
    %433 = vector.multi_reduction <add>, %430, %cst_207 [1] : vector<16x32xf32> to vector<16xf32>
    %434 = vector.shape_cast %433 : vector<16xf32> to vector<16x1xf32>
    %cst_208 = arith.constant 3.200000e+01 : f32
    %435 = vector.broadcast %cst_208 : f32 to vector<16x1xf32>
    %436 = arith.divf %434, %435 : vector<16x1xf32>
    %437 = vector.broadcast %436 : vector<16x1xf32> to vector<16x32xf32>
    %438 = arith.subf %430, %437 : vector<16x32xf32>
    %439 = arith.mulf %438, %438 : vector<16x32xf32>
    %cst_209 = arith.constant dense<0.000000e+00> : vector<16xf32>
    %440 = vector.multi_reduction <add>, %439, %cst_209 [1] : vector<16x32xf32> to vector<16xf32>
    %441 = vector.shape_cast %440 : vector<16xf32> to vector<16x1xf32>
    %cst_210 = arith.constant 3.200000e+01 : f32
    %442 = vector.broadcast %cst_210 : f32 to vector<16x1xf32>
    %443 = arith.divf %441, %442 : vector<16x1xf32>
    %444 = vector.broadcast %436 : vector<16x1xf32> to vector<16x32xf32>
    %445 = arith.subf %430, %444 : vector<16x32xf32>
    %cst_211 = arith.constant 9.99999974E-6 : f32
    %446 = vector.broadcast %cst_211 : f32 to vector<16x1xf32>
    %447 = arith.addf %443, %446 : vector<16x1xf32>
    %448 = math.rsqrt %447 : vector<16x1xf32>
    %449 = vector.broadcast %448 : vector<16x1xf32> to vector<16x32xf32>
    %450 = arith.mulf %445, %449 : vector<16x32xf32>
    %451 = vector.broadcast %431 : vector<1x32xf32> to vector<16x32xf32>
    %452 = arith.mulf %450, %451 : vector<16x32xf32>
    %453 = vector.broadcast %432 : vector<1x32xf32> to vector<16x32xf32>
    %454 = arith.addf %452, %453 : vector<16x32xf32>
    %c1_212 = arith.constant 1 : index
    %c0_213 = arith.constant 0 : index
    %c0_214 = arith.constant 0 : index
    %455 = vector.load %arg26[%c1_212, %c0_213, %c0_214] : memref<2x6x32xf32, #tpu.memory_space<vmem>>, vector<1x6x32xf32>
    %456 = vector.shape_cast %455 : vector<1x6x32xf32> to vector<6x32xf32>
    %c1_215 = arith.constant 1 : index
    %c0_216 = arith.constant 0 : index
    %c0_217 = arith.constant 0 : index
    %457 = vector.load %arg27[%c1_215, %c0_216, %c0_217] : memref<2x32x96xbf16, #tpu.memory_space<vmem>>, vector<1x32x96xbf16>
    %458 = vector.shape_cast %457 : vector<1x32x96xbf16> to vector<32x96xbf16>
    %459 = arith.truncf %454 : vector<16x32xf32> to vector<16x32xbf16>
    %cst_218 = arith.constant dense<0.000000e+00> : vector<16x96xf32>
    %460 = tpu.matmul %459, %458, %cst_218 {dimension_numbers = #tpu.dot_dimension_numbers<[1], [0], [0], [1], [0, 0, 1, 1], [], []>} : vector<16x32xbf16>, vector<32x96xbf16>, vector<16x96xf32> -> vector<16x96xf32>
    %c1_219 = arith.constant 1 : index
    %c0_220 = arith.constant 0 : index
    %c0_221 = arith.constant 0 : index
    %461 = vector.load %arg28[%c1_219, %c0_220, %c0_221] : memref<2x1x96xf32, #tpu.memory_space<vmem>>, vector<1x1x96xf32>
    %462 = vector.shape_cast %461 : vector<1x1x96xf32> to vector<1x96xf32>
    %463 = vector.broadcast %462 : vector<1x96xf32> to vector<16x96xf32>
    %464 = arith.addf %460, %463 : vector<16x96xf32>
    %465 = vector.extract_strided_slice %464 {offsets = [0, 0], sizes = [16, 32], strides = [1, 1]} : vector<16x96xf32> to vector<16x32xf32>
    %466 = vector.extract_strided_slice %464 {offsets = [0, 32], sizes = [16, 32], strides = [1, 1]} : vector<16x96xf32> to vector<16x32xf32>
    %467 = vector.extract_strided_slice %464 {offsets = [0, 64], sizes = [16, 32], strides = [1, 1]} : vector<16x96xf32> to vector<16x32xf32>
    %cst_222 = arith.constant dense<0.000000e+00> : vector<64x32xf32>
    %468 = tpu.matmul %296, %466, %cst_222 {dimension_numbers = #tpu.dot_dimension_numbers<[1], [0], [0], [1], [0, 0, 1, 1], [], []>} : vector<64x16xf32>, vector<16x32xf32>, vector<64x32xf32> -> vector<64x32xf32>
    %469 = arith.mulf %468, %297 : vector<64x32xf32>
    %cst_223 = arith.constant dense<0.000000e+00> : vector<64x32xf32>
    %470 = tpu.matmul %296, %467, %cst_223 {dimension_numbers = #tpu.dot_dimension_numbers<[1], [0], [0], [1], [0, 0, 1, 1], [], []>} : vector<64x16xf32>, vector<16x32xf32>, vector<64x32xf32> -> vector<64x32xf32>
    %471 = arith.mulf %470, %297 : vector<64x32xf32>
    %472 = arith.truncf %465 : vector<16x32xf32> to vector<16x32xbf16>
    %473 = arith.truncf %469 : vector<64x32xf32> to vector<64x32xbf16>
    %cst_224 = arith.constant dense<0.000000e+00> : vector<16x64xf32>
    %474 = tpu.matmul %472, %473, %cst_224 {dimension_numbers = #tpu.dot_dimension_numbers<[1], [1], [0], [0], [0, 0, 1, 0], [], []>} : vector<16x32xbf16>, vector<64x32xbf16>, vector<16x64xf32> -> vector<16x64xf32>
    %cst_225 = arith.constant 0.353553385 : f32
    %475 = vector.broadcast %cst_225 : f32 to vector<16x64xf32>
    %476 = arith.mulf %474, %475 : vector<16x64xf32>
    %477 = arith.addf %476, %298 : vector<16x64xf32>
    %cst_226 = arith.constant dense<0xFF800000> : vector<16xf32>
    %478 = vector.multi_reduction <maximumf>, %477, %cst_226 [1] : vector<16x64xf32> to vector<16xf32>
    %479 = vector.shape_cast %478 : vector<16xf32> to vector<16x1xf32>
    %480 = vector.broadcast %479 : vector<16x1xf32> to vector<16x64xf32>
    %481 = arith.subf %477, %480 : vector<16x64xf32>
    %482 = math.exp %481 : vector<16x64xf32>
    %483 = arith.truncf %482 : vector<16x64xf32> to vector<16x64xbf16>
    %484 = arith.truncf %471 : vector<64x32xf32> to vector<64x32xbf16>
    %cst_227 = arith.constant dense<0.000000e+00> : vector<16x32xf32>
    %485 = tpu.matmul %483, %484, %cst_227 {dimension_numbers = #tpu.dot_dimension_numbers<[1], [0], [0], [1], [0, 0, 1, 1], [], []>} : vector<16x64xbf16>, vector<64x32xbf16>, vector<16x32xf32> -> vector<16x32xf32>
    %cst_228 = arith.constant dense<0.000000e+00> : vector<16x32xf32>
    %486 = tpu.matmul %482, %297, %cst_228 {dimension_numbers = #tpu.dot_dimension_numbers<[1], [0], [0], [1], [0, 0, 1, 1], [], []>} : vector<16x64xf32>, vector<64x32xf32>, vector<16x32xf32> -> vector<16x32xf32>
    %cst_229 = arith.constant 1.000000e-30 : f32
    %487 = vector.broadcast %cst_229 : f32 to vector<16x32xf32>
    %488 = arith.maximumf %486, %487 : vector<16x32xf32>
    %489 = tpu.reciprocal %488 {approx = true} : vector<16x32xf32> -> vector<16x32xf32>
    %490 = arith.mulf %485, %489 : vector<16x32xf32>
    %c1_230 = arith.constant 1 : index
    %c0_231 = arith.constant 0 : index
    %c0_232 = arith.constant 0 : index
    %491 = vector.load %arg29[%c1_230, %c0_231, %c0_232] : memref<2x32x32xbf16, #tpu.memory_space<vmem>>, vector<1x32x32xbf16>
    %492 = vector.shape_cast %491 : vector<1x32x32xbf16> to vector<32x32xbf16>
    %493 = arith.truncf %490 : vector<16x32xf32> to vector<16x32xbf16>
    %cst_233 = arith.constant dense<0.000000e+00> : vector<16x32xf32>
    %494 = tpu.matmul %493, %492, %cst_233 {dimension_numbers = #tpu.dot_dimension_numbers<[1], [0], [0], [1], [0, 0, 1, 1], [], []>} : vector<16x32xbf16>, vector<32x32xbf16>, vector<16x32xf32> -> vector<16x32xf32>
    %495 = arith.addf %454, %494 : vector<16x32xf32>
    %c1_234 = arith.constant 1 : index
    %c0_235 = arith.constant 0 : index
    %c0_236 = arith.constant 0 : index
    %496 = vector.load %arg30[%c1_234, %c0_235, %c0_236] : memref<2x1x32xf32, #tpu.memory_space<vmem>>, vector<1x1x32xf32>
    %497 = vector.shape_cast %496 : vector<1x1x32xf32> to vector<1x32xf32>
    %498 = vector.broadcast %497 : vector<1x32xf32> to vector<16x32xf32>
    %499 = arith.addf %495, %498 : vector<16x32xf32>
    %500 = vector.extract_strided_slice %456 {offsets = [0, 0], sizes = [1, 32], strides = [1, 1]} : vector<6x32xf32> to vector<1x32xf32>
    %501 = vector.extract_strided_slice %456 {offsets = [1, 0], sizes = [1, 32], strides = [1, 1]} : vector<6x32xf32> to vector<1x32xf32>
    %cst_237 = arith.constant dense<0.000000e+00> : vector<16xf32>
    %502 = vector.multi_reduction <add>, %499, %cst_237 [1] : vector<16x32xf32> to vector<16xf32>
    %503 = vector.shape_cast %502 : vector<16xf32> to vector<16x1xf32>
    %cst_238 = arith.constant 3.200000e+01 : f32
    %504 = vector.broadcast %cst_238 : f32 to vector<16x1xf32>
    %505 = arith.divf %503, %504 : vector<16x1xf32>
    %506 = vector.broadcast %505 : vector<16x1xf32> to vector<16x32xf32>
    %507 = arith.subf %499, %506 : vector<16x32xf32>
    %508 = arith.mulf %507, %507 : vector<16x32xf32>
    %cst_239 = arith.constant dense<0.000000e+00> : vector<16xf32>
    %509 = vector.multi_reduction <add>, %508, %cst_239 [1] : vector<16x32xf32> to vector<16xf32>
    %510 = vector.shape_cast %509 : vector<16xf32> to vector<16x1xf32>
    %cst_240 = arith.constant 3.200000e+01 : f32
    %511 = vector.broadcast %cst_240 : f32 to vector<16x1xf32>
    %512 = arith.divf %510, %511 : vector<16x1xf32>
    %513 = vector.broadcast %505 : vector<16x1xf32> to vector<16x32xf32>
    %514 = arith.subf %499, %513 : vector<16x32xf32>
    %cst_241 = arith.constant 9.99999974E-6 : f32
    %515 = vector.broadcast %cst_241 : f32 to vector<16x1xf32>
    %516 = arith.addf %512, %515 : vector<16x1xf32>
    %517 = math.rsqrt %516 : vector<16x1xf32>
    %518 = vector.broadcast %517 : vector<16x1xf32> to vector<16x32xf32>
    %519 = arith.mulf %514, %518 : vector<16x32xf32>
    %520 = vector.broadcast %500 : vector<1x32xf32> to vector<16x32xf32>
    %521 = arith.mulf %519, %520 : vector<16x32xf32>
    %522 = vector.broadcast %501 : vector<1x32xf32> to vector<16x32xf32>
    %523 = arith.addf %521, %522 : vector<16x32xf32>
    %c1_242 = arith.constant 1 : index
    %c0_243 = arith.constant 0 : index
    %c0_244 = arith.constant 0 : index
    %524 = vector.load %arg31[%c1_242, %c0_243, %c0_244] : memref<2x32x32xbf16, #tpu.memory_space<vmem>>, vector<1x32x32xbf16>
    %525 = vector.shape_cast %524 : vector<1x32x32xbf16> to vector<32x32xbf16>
    %526 = arith.truncf %294 : vector<16x32xf32> to vector<16x32xbf16>
    %cst_245 = arith.constant dense<0.000000e+00> : vector<16x32xf32>
    %527 = tpu.matmul %526, %525, %cst_245 {dimension_numbers = #tpu.dot_dimension_numbers<[1], [0], [0], [1], [0, 0, 1, 1], [], []>} : vector<16x32xbf16>, vector<32x32xbf16>, vector<16x32xf32> -> vector<16x32xf32>
    %528 = arith.addf %523, %527 : vector<16x32xf32>
    %c1_246 = arith.constant 1 : index
    %c0_247 = arith.constant 0 : index
    %c0_248 = arith.constant 0 : index
    %529 = vector.load %arg32[%c1_246, %c0_247, %c0_248] : memref<2x1x32xf32, #tpu.memory_space<vmem>>, vector<1x1x32xf32>
    %530 = vector.shape_cast %529 : vector<1x1x32xf32> to vector<1x32xf32>
    %531 = vector.broadcast %530 : vector<1x32xf32> to vector<16x32xf32>
    %532 = arith.addf %528, %531 : vector<16x32xf32>
    %533 = vector.extract_strided_slice %456 {offsets = [2, 0], sizes = [1, 32], strides = [1, 1]} : vector<6x32xf32> to vector<1x32xf32>
    %534 = vector.extract_strided_slice %456 {offsets = [3, 0], sizes = [1, 32], strides = [1, 1]} : vector<6x32xf32> to vector<1x32xf32>
    %cst_249 = arith.constant dense<0.000000e+00> : vector<16xf32>
    %535 = vector.multi_reduction <add>, %532, %cst_249 [1] : vector<16x32xf32> to vector<16xf32>
    %536 = vector.shape_cast %535 : vector<16xf32> to vector<16x1xf32>
    %cst_250 = arith.constant 3.200000e+01 : f32
    %537 = vector.broadcast %cst_250 : f32 to vector<16x1xf32>
    %538 = arith.divf %536, %537 : vector<16x1xf32>
    %539 = vector.broadcast %538 : vector<16x1xf32> to vector<16x32xf32>
    %540 = arith.subf %532, %539 : vector<16x32xf32>
    %541 = arith.mulf %540, %540 : vector<16x32xf32>
    %cst_251 = arith.constant dense<0.000000e+00> : vector<16xf32>
    %542 = vector.multi_reduction <add>, %541, %cst_251 [1] : vector<16x32xf32> to vector<16xf32>
    %543 = vector.shape_cast %542 : vector<16xf32> to vector<16x1xf32>
    %cst_252 = arith.constant 3.200000e+01 : f32
    %544 = vector.broadcast %cst_252 : f32 to vector<16x1xf32>
    %545 = arith.divf %543, %544 : vector<16x1xf32>
    %546 = vector.broadcast %538 : vector<16x1xf32> to vector<16x32xf32>
    %547 = arith.subf %532, %546 : vector<16x32xf32>
    %cst_253 = arith.constant 9.99999974E-6 : f32
    %548 = vector.broadcast %cst_253 : f32 to vector<16x1xf32>
    %549 = arith.addf %545, %548 : vector<16x1xf32>
    %550 = math.rsqrt %549 : vector<16x1xf32>
    %551 = vector.broadcast %550 : vector<16x1xf32> to vector<16x32xf32>
    %552 = arith.mulf %547, %551 : vector<16x32xf32>
    %553 = vector.broadcast %533 : vector<1x32xf32> to vector<16x32xf32>
    %554 = arith.mulf %552, %553 : vector<16x32xf32>
    %555 = vector.broadcast %534 : vector<1x32xf32> to vector<16x32xf32>
    %556 = arith.addf %554, %555 : vector<16x32xf32>
    %c1_254 = arith.constant 1 : index
    %c0_255 = arith.constant 0 : index
    %c0_256 = arith.constant 0 : index
    %557 = vector.load %arg33[%c1_254, %c0_255, %c0_256] : memref<2x32x64xbf16, #tpu.memory_space<vmem>>, vector<1x32x64xbf16>
    %558 = vector.shape_cast %557 : vector<1x32x64xbf16> to vector<32x64xbf16>
    %559 = arith.truncf %556 : vector<16x32xf32> to vector<16x32xbf16>
    %cst_257 = arith.constant dense<0.000000e+00> : vector<16x64xf32>
    %560 = tpu.matmul %559, %558, %cst_257 {dimension_numbers = #tpu.dot_dimension_numbers<[1], [0], [0], [1], [0, 0, 1, 1], [], []>} : vector<16x32xbf16>, vector<32x64xbf16>, vector<16x64xf32> -> vector<16x64xf32>
    %c1_258 = arith.constant 1 : index
    %c0_259 = arith.constant 0 : index
    %c0_260 = arith.constant 0 : index
    %561 = vector.load %arg34[%c1_258, %c0_259, %c0_260] : memref<2x1x64xf32, #tpu.memory_space<vmem>>, vector<1x1x64xf32>
    %562 = vector.shape_cast %561 : vector<1x1x64xf32> to vector<1x64xf32>
    %563 = vector.broadcast %562 : vector<1x64xf32> to vector<16x64xf32>
    %564 = arith.addf %560, %563 : vector<16x64xf32>
    %565 = arith.mulf %564, %564 : vector<16x64xf32>
    %566 = arith.mulf %564, %565 : vector<16x64xf32>
    %cst_261 = arith.constant 4.471500e-02 : f32
    %567 = vector.broadcast %cst_261 : f32 to vector<16x64xf32>
    %568 = arith.mulf %567, %566 : vector<16x64xf32>
    %569 = arith.addf %564, %568 : vector<16x64xf32>
    %cst_262 = arith.constant 0.797884583 : f32
    %570 = vector.broadcast %cst_262 : f32 to vector<16x64xf32>
    %571 = arith.mulf %570, %569 : vector<16x64xf32>
    %572 = math.tanh %571 : vector<16x64xf32>
    %cst_263 = arith.constant 1.000000e+00 : f32
    %573 = vector.broadcast %cst_263 : f32 to vector<16x64xf32>
    %574 = arith.addf %573, %572 : vector<16x64xf32>
    %cst_264 = arith.constant 5.000000e-01 : f32
    %575 = vector.broadcast %cst_264 : f32 to vector<16x64xf32>
    %576 = arith.mulf %575, %574 : vector<16x64xf32>
    %577 = arith.mulf %564, %576 : vector<16x64xf32>
    %c1_265 = arith.constant 1 : index
    %c0_266 = arith.constant 0 : index
    %c0_267 = arith.constant 0 : index
    %578 = vector.load %arg35[%c1_265, %c0_266, %c0_267] : memref<2x64x32xbf16, #tpu.memory_space<vmem>>, vector<1x64x32xbf16>
    %579 = vector.shape_cast %578 : vector<1x64x32xbf16> to vector<64x32xbf16>
    %580 = arith.truncf %577 : vector<16x64xf32> to vector<16x64xbf16>
    %cst_268 = arith.constant dense<0.000000e+00> : vector<16x32xf32>
    %581 = tpu.matmul %580, %579, %cst_268 {dimension_numbers = #tpu.dot_dimension_numbers<[1], [0], [0], [1], [0, 0, 1, 1], [], []>} : vector<16x64xbf16>, vector<64x32xbf16>, vector<16x32xf32> -> vector<16x32xf32>
    %582 = arith.addf %556, %581 : vector<16x32xf32>
    %c1_269 = arith.constant 1 : index
    %c0_270 = arith.constant 0 : index
    %c0_271 = arith.constant 0 : index
    %583 = vector.load %arg36[%c1_269, %c0_270, %c0_271] : memref<2x1x32xf32, #tpu.memory_space<vmem>>, vector<1x1x32xf32>
    %584 = vector.shape_cast %583 : vector<1x1x32xf32> to vector<1x32xf32>
    %585 = vector.broadcast %584 : vector<1x32xf32> to vector<16x32xf32>
    %586 = arith.addf %582, %585 : vector<16x32xf32>
    %587 = vector.extract_strided_slice %456 {offsets = [4, 0], sizes = [1, 32], strides = [1, 1]} : vector<6x32xf32> to vector<1x32xf32>
    %588 = vector.extract_strided_slice %456 {offsets = [5, 0], sizes = [1, 32], strides = [1, 1]} : vector<6x32xf32> to vector<1x32xf32>
    %cst_272 = arith.constant dense<0.000000e+00> : vector<16xf32>
    %589 = vector.multi_reduction <add>, %586, %cst_272 [1] : vector<16x32xf32> to vector<16xf32>
    %590 = vector.shape_cast %589 : vector<16xf32> to vector<16x1xf32>
    %cst_273 = arith.constant 3.200000e+01 : f32
    %591 = vector.broadcast %cst_273 : f32 to vector<16x1xf32>
    %592 = arith.divf %590, %591 : vector<16x1xf32>
    %593 = vector.broadcast %592 : vector<16x1xf32> to vector<16x32xf32>
    %594 = arith.subf %586, %593 : vector<16x32xf32>
    %595 = arith.mulf %594, %594 : vector<16x32xf32>
    %cst_274 = arith.constant dense<0.000000e+00> : vector<16xf32>
    %596 = vector.multi_reduction <add>, %595, %cst_274 [1] : vector<16x32xf32> to vector<16xf32>
    %597 = vector.shape_cast %596 : vector<16xf32> to vector<16x1xf32>
    %cst_275 = arith.constant 3.200000e+01 : f32
    %598 = vector.broadcast %cst_275 : f32 to vector<16x1xf32>
    %599 = arith.divf %597, %598 : vector<16x1xf32>
    %600 = vector.broadcast %592 : vector<16x1xf32> to vector<16x32xf32>
    %601 = arith.subf %586, %600 : vector<16x32xf32>
    %cst_276 = arith.constant 9.99999974E-6 : f32
    %602 = vector.broadcast %cst_276 : f32 to vector<16x1xf32>
    %603 = arith.addf %599, %602 : vector<16x1xf32>
    %604 = math.rsqrt %603 : vector<16x1xf32>
    %605 = vector.broadcast %604 : vector<16x1xf32> to vector<16x32xf32>
    %606 = arith.mulf %601, %605 : vector<16x32xf32>
    %607 = vector.broadcast %587 : vector<1x32xf32> to vector<16x32xf32>
    %608 = arith.mulf %606, %607 : vector<16x32xf32>
    %609 = vector.broadcast %588 : vector<1x32xf32> to vector<16x32xf32>
    %610 = arith.addf %608, %609 : vector<16x32xf32>
    %c0_277 = arith.constant 0 : index
    %c0_278 = arith.constant 0 : index
    %611 = vector.load %arg37[%c0_277, %c0_278] : memref<32x128xbf16, #tpu.memory_space<vmem>>, vector<32x128xbf16>
    %612 = arith.truncf %610 : vector<16x32xf32> to vector<16x32xbf16>
    %cst_279 = arith.constant dense<0.000000e+00> : vector<16x128xf32>
    %613 = tpu.matmul %612, %611, %cst_279 {dimension_numbers = #tpu.dot_dimension_numbers<[1], [0], [0], [1], [0, 0, 1, 1], [], []>} : vector<16x32xbf16>, vector<32x128xbf16>, vector<16x128xf32> -> vector<16x128xf32>
    %c0_280 = arith.constant 0 : index
    %c0_281 = arith.constant 0 : index
    %614 = vector.load %arg38[%c0_280, %c0_281] : memref<1x128xf32, #tpu.memory_space<vmem>>, vector<1x128xf32>
    %615 = vector.broadcast %614 : vector<1x128xf32> to vector<16x128xf32>
    %616 = arith.addf %613, %615 : vector<16x128xf32>
    %c0_282 = arith.constant 0 : index
    %c0_283 = arith.constant 0 : index
    %617 = vector.load %arg39[%c0_282, %c0_283] : memref<16x128xf32, #tpu.memory_space<vmem>>, vector<16x128xf32>
    tpu.vector_store %arg39[%c0_282, %c0_283], %616 {strides = array<i32>} : memref<16x128xf32, #tpu.memory_space<vmem>>, vector<16x128xf32>,
    return
  }
}

</mosaic_0001>

<bundles_post_ra>
// kernel: tile.9
= control target key start
LH: loop header
LB: loop body
LE: loop exit
PB: predicated region body
PF: predicated region fallthrough
CT: control target
= control target key end

     0   :  { %vm3_vm0 = vcmask 261120   ;;  %s34_s0 = inlined_call_operand.vmem [shape: f32[2,5,32], index: 0, kind: input, shape index: {}]   ;;  %s35_s1 = inlined_call_operand.vmem [shape: f32[10,32], index: 1, kind: output, shape index: {}]  }
   0x1   :  { %v2_v0 = vld [vmem:[%s34_s0] sm:$0x1f]   ;;  %v10_v1 = vld [vmem:[%s34_s0 + $0x8] sm:$0x1f]  }
   0x2   :  { %4 = vst.msk [vmem:[%s35_s1] sm:$0x1f] %vm3_vm0, %v2_v0   ;;  %11 = vst.msk [vmem:[%s35_s1 + $0x5] sm:$0x1f] %vm3_vm0, %v10_v1  }

// kernel: mymodel_forward.1
= control target key start
LH: loop header
LB: loop body
LE: loop exit
PB: predicated region body
PF: predicated region fallthrough
CT: control target
= control target key end

     0   :  { %v5644_v0 = vmov 0   ;;  %s5645_s3 = smov 12   ;;  %vm270_vm0 = vcmask 523264   ;;  %s5646_s10 = smov 3   ;;  %vm318_vm1 = vcmask 64512   ;;  %vm413_vm2 = vcmask 261120   ;;  %s6707_s0 = inlined_call_operand.smem [shape: u32[40], index: -1, kind: input, shape index: {}] }
   0x1   :  { %274 = vmatprep.subr.bf16.mxu0 %v5644_v0  ;;  %s5698_s6 = sld [smem:[%s6707_s0 + %s5645_s3]]   ;;  %s5647_s14 = smov 13   ;;  %vm417_vm3 = vcmask 254976   ;;  %v5650_v44 = vmov 0.0   ;;  %vm5651_vm4 = vmmov 0   ;;  %v442_v49 = vlaneseq }
   0x2   :  { %s5705_s9 = sld [smem:[%s6707_s0]]   ;;  %s5648_s18 = smov 2   ;;  %vm545_vm5 = vcmask 1041408   ;;  %vm5658_vm6 = vmmov 1   ;;  %vm529_vm8 = vcmask 80896   ;;  %vm827_vm9 = vcmask 1043456  }
   0x3   :  { %s4351_s13 = sld [smem:[%s6707_s0 + %s5646_s10]]   ;;  %s5649_s22 = smov 15   ;;  %v5760_v53 = vshrl.u32 %v442_v49, 7  ;;  %vm5799_vm7 = vmpackc.low %vm545_vm5, %vm5658_vm6  ;;  %vm806_vm10 = vcmask 326656   ;;  %vm810_vm11 = vcmask 320512   ;;  %vm2230_vm12 = vcmask 15360  }
   0x4   :  { %s4361_s17 = sld [smem:[%s6707_s0 + %s5647_s14]]   ;;  %s5652_s26 = smov 14   ;;  %vm2412_vm13 = vcmask 130048  }
   0x5   :  { %s4350_s21 = sld [smem:[%s6707_s0 + %s5648_s18]]   ;;  %v5763_v54 = vsub.s32 0, %v5760_v53  ;;  %v5771_v59 = vsub.s32 1, %v5760_v53  ;;  %s5653_s30 = smov 16  }
   0x6   :  { %s5744_s25 = sld [smem:[%s6707_s0 + %s5649_s22]]   ;;  %s5655_s4 = smov 64  }
   0x7   :  { %v5494_v1 = vld [vmem:[%s5698_s6] sm:$0xff]   ;;  %v5495_v2 = vld [vmem:[%s5698_s6 + $0x8] sm:$0xff]   ;;  %v5496_v3 = vld [vmem:[%s5698_s6 + $0x10] sm:$0xff]   ;;  %s5758_s29 = sld [smem:[%s6707_s0 + %s5652_s26]]   ;;  %s5656_s5 = smov 96  }
   0x8   :  { %275 = vmatpush1.bf16.msra.mxu0 %v5494_v1  ;;  %v5497_v4 = vld [vmem:[%s5698_s6 + $0x18] sm:$0xff]   ;;  %v164_v5 = vld [vmem:[%s5705_s9 + $0x8] sm:$0xff]  ;;  %v5498_v7 = vld [vmem:[%s5698_s6 + $0x20] sm:$0xff]   ;;  %s5781_s3 = sld [smem:[%s6707_s0 + %s5653_s30]]   ;;  %s5659_s10 = smov 7  }
   0x9   :  { %276 = vmatprep.subr.bf16.mxu0 %v5644_v0  ;;  %v190_v6 = vpack.c.bf16 %v164_v5, %v164_v5  ;;  %v5499_v8 = vld [vmem:[%s5698_s6 + $0x28] sm:$0xff]   ;;  %v5500_v9 = vld [vmem:[%s5698_s6 + $0x30] sm:$0xff]   ;;  %v5501_v10 = vld [vmem:[%s5698_s6 + $0x38] sm:$0xff]   ;;  %s5660_s14 = smov 8   ;;  %s5661_s18 = smov 17  }
   0xa   :  { %v5502_v11 = vld [vmem:[%s5698_s6 + $0x40] sm:$0xff]   ;;  %v5503_v12 = vld [vmem:[%s5698_s6 + $0x48] sm:$0xff]   ;;  %v5504_v13 = vld [vmem:[%s5698_s6 + $0x50] sm:$0xff]   ;;  %s5662_s22 = smov 18   ;;  %s5663_s27 = smov 19  }
   0xb   :  { %4401 = vmatprep.mubr.msk.bf16.mxu0 %vm270_vm0, %v190_v6  ;;  %v5505_v14 = vld [vmem:[%s5698_s6 + $0x58] sm:$0xff]   ;;  %v163_v15 = vld [vmem:[%s5705_s9] sm:$0xff]  ;;  %v315_v23 = vld [vmem:[%s4351_s13 + $0x8] sm:$0x3]  ;;  %s5657_s6 = smov 6   ;;  %s5943_s26 = sld [smem:[%s6707_s0 + %s5662_s22]]  }
   0xc   :  { %277 = vmatpush1.bf16.msra.mxu0 %v5495_v2  ;;  %v189_v16 = vpack.c.bf16 %v163_v15, %v163_v15  ;;  %v314_v17 = vld [vmem:[%s4351_s13] sm:$0xff]  ;;  %v317_v27 = vld [vmem:[%s4350_s21 + $0x8] sm:$0x3]  ;;  %s4354_s9 = sld [smem:[%s6707_s0 + %s5657_s6]]   ;;  %s5664_s2 = smov 21  }
   0xd   :  { %278 = vmatprep.subr.bf16.mxu0 %v5644_v0  ;;  %4841 = vmatprep.mubr.msk.f32.mxu1 %vm318_vm1, %v314_v17  ;;  %v4388_v18 = vld [vmem:[%s4361_s17] ss:$0 sm:$0xff]  ;;  %v5507_v45 = vld [vmem:[%s5744_s25 + $0x8] sm:$0xff]   ;;  %s4355_s13 = sld [smem:[%s6707_s0 + %s5659_s10]]   ;;  %s5669_s22 = smov 27  }
   0xe   :  { %v316_v25 = vld [vmem:[%s4350_s21] sm:$0xff]  ;;  %s4356_s17 = sld [smem:[%s6707_s0 + %s5660_s14]]   ;;  %s5677_s28 = smov 11  }
   0xf   :  { %v5506_v43 = vld [vmem:[%s5744_s25] sm:$0xff]   ;;  %s5931_s21 = sld [smem:[%s6707_s0 + %s5661_s18]]   ;;  %s5668_s18 = smov 24  }
  0x10   :  { %279 = vmatpush1.bf16.msra.mxu0 %v5496_v3  ;;  %v5766_v55 = vld [vmem:[%s5758_s29] sm:$0xf]  ;;  %s5963_s1 = sld [smem:[%s6707_s0 + %s5663_s27]]   ;;  %s5670_s27 = smov 23  }
  0x11   :  { %280 = vmatprep.subr.bf16.mxu0 %v5644_v0  ;;  %v445_v57 = vrot.slane %v5766_v55, %v5763_v54  ;;  %v451_v63 = vrot.slane %v5766_v55, %v5771_v59  ;;  %v4404_v5 = vld [vmem:[%s5781_s3] ss:$0 sm:$0xff]  ;;  %s5985_s8 = sld [smem:[%s6707_s0 + %s5664_s2]]   ;;  %s5671_s2 = smov 1  }
  0x12   :  { %s5678_s6 = smov 29   ;;  %s5679_s10 = smov 31  }
  0x13   :  { %v5876_v49 = vld [vmem:[%s4355_s13 + $0x20] sm:$0xff]  ;;  %s5680_s14 = smov 30   ;;  %s5682_s20 = smov 32  }
  0x14   :  { %281 = vmatpush1.bf16.msra.mxu0 %v5497_v4  ;;  %v5654_v4 = vmov 0.0|0.0   ;;  %s6457_s23 = sld [smem:[%s6707_s0 + %s5682_s20]]   ;;  %s5683_s24 = smov 33  }
  0x15   :  { %282 = vmatprep.subr.bf16.mxu0 %v5644_v0  ;;  %s6471_s30 = sld [smem:[%s6707_s0 + %s5683_s24]]  }
  0x18   :  { %283 = vmatpush1.bf16.msra.mxu0 %v5498_v7 }
  0x19   :  { %284 = vmatprep.subr.bf16.mxu0 %v5644_v0 }
  0x1c   :  { %285 = vmatpush1.bf16.msra.mxu0 %v5499_v8 }
  0x1d   :  { %286 = vmatprep.subr.bf16.mxu0 %v5644_v0 }
  0x20   :  { %287 = vmatpush1.bf16.msra.mxu0 %v5500_v9 }
  0x21   :  { %288 = vmatprep.subr.bf16.mxu0 %v5644_v0 }
  0x24   :  { %289 = vmatpush1.bf16.msra.mxu0 %v5501_v10 }
  0x25   :  { %290 = vmatprep.subr.bf16.mxu0 %v5644_v0 }
  0x28   :  { %291 = vmatpush1.bf16.msra.mxu0 %v5502_v11 }
  0x29   :  { %292 = vmatprep.subr.bf16.mxu0 %v5644_v0 }
  0x2c   :  { %293 = vmatpush1.bf16.msra.mxu0 %v5503_v12 }
  0x2d   :  { %294 = vmatprep.subr.bf16.mxu0 %v5644_v0 }
  0x30   :  { %295 = vmatpush1.bf16.msra.mxu0 %v5504_v13 }
  0x31   :  { %296 = vmatprep.subr.bf16.mxu0 %v5644_v0 }
  0x34   :  { %297 = vmatpush1.bf16.msra.mxu0 %v5505_v14 }
  0x35   :  { %4900 = vmatprep.subr.bf16.mxu0 %v5650_v44 }
  0x37   :  { %307 = vmatmul.mubr.bf16.vlgmr.msra.gmra.mrb[0].mxu0 %v189_v16 }
  0x38   :  { %4906 = vmatprep.mubr.msk.bf16.mxu0 %vm5651_vm4, %v5650_v44 }
 0x10a   :  { %v308_v19 = vpop.f32.mrb[0].mxu0 }
 0x10b   :  { %v309_v20 = vadd.f32 %v4388_v18, %v308_v19  ;;  %v310_v21 = vpop.f32.mrb[1].mxu0 }
 0x10c   :  { %v311_v22 = vpop.f32.mrb[2].mxu0 }
 0x10d   :  { %v312_v24 = vpop.f32.mrb[3].mxu0  ;;  %4839 = vmatprep.subr.mxu1 %v309_v20  ;;  %v5805_v22 = vld [vmem:[%s4354_s9] sm:$0xff] }
 0x10e   :  { %4840 = vmatpush3.msra.mxu1 %v309_v20  ;;  %v5814_v24 = vld [vmem:[%s4354_s9 + $0x8] sm:$0xff] }
 0x10f   :  { %4842 = vmatmul.mubr.msk.f32.vlgmr.msra.gmra.mrb[0].mxu1 %vm318_vm1, %v315_v23  ;;  %4844 = vmatprep.subr.bf16.mxu1 %v5650_v44 }
 0x110   :  { %4845 = vmatpush3.bf16.msra.mxu1 %v5506_v43  ;;  %4848 = vmatprep.mubr.msk.bf16.mxu1 %vm5651_vm4, %v5650_v44  ;;  %v5871_v43 = vld [vmem:[%s4355_s13 + $0x18] sm:$0xff] }
 0x111   :  { %4846 = vmatprep.subr.bf16.mxu1 %v5650_v44 }
 0x114   :  { %4847 = vmatpush3.bf16.msra.mxu1 %v5507_v45 }
 0x115   :  { %5324 = vmatprep.subr.bf16.mxu1 %v5654_v4 }
 0x1e2   :  { %v4843_v26 = vpop.f32.mrb[0].mxu1 }
 0x1e3   :  { %v391_v28 = vpop.f32.mrb[1].mxu1  ;;  %v5731_v30 = vadd.f32 %v4843_v26, %v317_v27  ;;  %v5827_v26 = vld [vmem:[%s4354_s9 + $0x18] sm:$0xff]  ;;  %v5833_v27 = vld [vmem:[%s4354_s9 + $0x20] sm:$0xff] }
 0x1e4   :  { %v5729_v29 = vadd.f32 %v391_v28, %v316_v25  ;;  %v5821_v25 = vld [vmem:[%s4354_s9 + $0x10] sm:$0xff]  ;;  %s5665_s9 = smov 20  }
 0x1e5   :  { %v418_v32 = vsel %vm417_vm3, %v5731_v30, 0.0  ;;  %s5998_s12 = sld [smem:[%s6707_s0 + %s5665_s9]]   ;;  %s5672_s9 = smov 25  }
 0x1e6   :  { %v414_v31 = vsel %vm413_vm2, %v5729_v29, 0.0 }
 0x1e7   :  { %415 = vadd.xlane.f32.xlu0 %v414_v31 }
 0x1eb   :  { %419 = vadd.xlane.f32.xlu0 %v418_v32  ;;  %v5862_v32 = vld [vmem:[%s4355_s13] sm:$0xff] }
 0x274   :  { %v416_v33 = vpop.xlane.xlu0 %415 }
 0x275   :  { %v422_v34 = vmul.f32 0.03125, %v416_v33  ;;  %v5864_v33 = vld [vmem:[%s4355_s13 + $0x8] sm:$0xff] }
 0x277   :  { %v424_v35 = vsub.f32 %v5729_v29, %v422_v34 }
 0x278   :  { %v420_v36 = vpop.xlane.xlu0 %419 }
 0x279   :  { %v423_v37 = vmul.f32 0.03125, %v420_v36  ;;  %v426_v38 = vmul.f32 %v424_v35, %v424_v35 }
 0x27b   :  { %v425_v39 = vsub.f32 %v5731_v30, %v423_v37  ;;  %v428_v40 = vsel %vm413_vm2, %v426_v38, 0.0 }
 0x27c   :  { %429 = vadd.xlane.f32.xlu1 %v428_v40 }
 0x27d   :  { %v427_v41 = vmul.f32 %v425_v39, %v425_v39 }
 0x27f   :  { %v431_v42 = vsel %vm417_vm3, %v427_v41, 0.0 }
 0x280   :  { %432 = vadd.xlane.f32.xlu1 %v431_v42  ;;  %v5869_v42 = vld [vmem:[%s4355_s13 + $0x10] sm:$0xff]  ;;  %s5666_s13 = smov 22  }
 0x281   :  { %s6007_s16 = sld [smem:[%s6707_s0 + %s5666_s13]]   ;;  %s5673_s13 = smov 5  }
 0x309   :  { %v430_v46 = vpop.xlane.xlu1 %429 }
 0x30a   :  { %v434_v47 = vmul.f32 0.03125, %v430_v46 }
 0x30c   :  { %v436_v48 = vadd.f32 1e-05, %v434_v47 }
 0x30d   :  { %v433_v50 = vpop.xlane.xlu1 %432 }
 0x30e   :  { %5554 = vrsqrt.f32 %v436_v48  ;;  %v435_v51 = vmul.f32 0.03125, %v433_v50 }
 0x310   :  { %v437_v52 = vadd.f32 1e-05, %v435_v51 }
 0x312   :  { %5556 = vrsqrt.f32 %v437_v52 }
 0x318   :  { %v5555_v56 = vpop.eup %5554 }
 0x319   :  { %v440_v58 = vmul.f32 %v5555_v56, %v424_v35 }
 0x31b   :  { %v446_v61 = vmul.f32 %v445_v57, %v440_v58 }
 0x31c   :  { %v5557_v60 = vpop.eup %5556 }
 0x31d   :  { %v441_v62 = vmul.f32 %v5557_v60, %v425_v39  ;;  %v452_v1 = vadd.f32 %v451_v63, %v446_v61 }
 0x31f   :  { %v447_v0 = vmul.f32 %v445_v57, %v441_v62 }
 0x321   :  { %v453_v2 = vadd.f32 %v451_v63, %v447_v0 }
 0x323   :  { %v458_v3 = vpack.c.bf16 %v453_v2, %v452_v1 }
 0x325   :  { %4849 = vmatmul.mubr.msk.bf16.vlgmr.msra.gmra.mrb[4].mxu1 %vm413_vm2, %v458_v3 }
 0x326   :  { %4856 = vmatprep.mubr.msk.f32.mxu1 %vm5651_vm4, %v5650_v44 }
 0x3f8   :  { %v515_v6 = vpop.f32.mrb[4].mxu1 }
 0x3f9   :  { %v4850_v7 = vpop.f32.mrb[5].mxu1  ;;  %v5785_v9 = vadd.f32 %v4404_v5, %v515_v6 }
 0x3fa   :  { %v518_v8 = vpop.f32.mrb[6].mxu1 }
 0x3fb   :  { %v5787_v10 = vadd.f32 %v4404_v5, %v518_v8  ;;  %v4851_v11 = vpop.f32.mrb[7].mxu1 }
 0x3fd   :  { %v745_v12 = vpack.c.bf16 %v5787_v10, %v5785_v9  ;;  %v5459_v13 = vpack.i.bf16 %v5787_v10, %v5785_v9 }
 0x3ff   :  { %5460 = vrot.lane.b32.xlu1 %v5459_v13, %s5655_s4  ;;  %5455 = vrot.lane.b32.xlu0 %v5459_v13, %s5656_s5 }
 0x471   :  { %v5461_v14 = vpop.permute.xlu1 %5460  ;;  %v5456_v15 = vpop.permute.xlu0 %5455 }
 0x472   :  { %v5458_v16 = vunpack.i.h.bf16 %v5456_v15  ;;  %v5457_v17 = vunpack.i.l.bf16 %v5456_v15  ;;  %v5463_v19 = vunpack.i.h.bf16 %v5461_v14  ;;  %v5462_v20 = vunpack.i.l.bf16 %v5461_v14 }
 0x474   :  { %v5325_v21 = vpack.c.bf16 %v5458_v16, %v5457_v17  ;;  %v5329_v23 = vpack.c.bf16 %v5463_v19, %v5462_v20 }
 0x476   :  { %5327 = vmatpush3.bf16.msk.msra.mxu1 %vm5799_vm7, %v5325_v21 }
 0x477   :  { %5328 = vmatprep.subr.bf16.mxu1 %v5654_v4 }
 0x479   :  { %4857 = vmatmul.mubr.msk.f32.vlgmr.msra.gmra.mrb[2].mxu1 %vm529_vm8, %v5805_v22 }
 0x47a   :  { %5331 = vmatpush3.bf16.msk.msra.mxu1 %vm5799_vm7, %v5329_v23  ;;  %4859 = vmatprep.mubr.msk.f32.mxu1 %vm5651_vm4, %v5650_v44 }
 0x47b   :  { %4890 = vmatprep.subr.bf16.mxu1 %v5650_v44 }
 0x47d   :  { %4860 = vmatmul.mubr.msk.f32.gmra.mrb[8].mxu1 %vm529_vm8, %v5814_v24 }
 0x47e   :  { %4862 = vmatprep.mubr.msk.f32.mxu1 %vm5651_vm4, %v5650_v44 }
 0x481   :  { %4863 = vmatmul.mubr.msk.f32.gmra.mrb[10].mxu1 %vm529_vm8, %v5821_v25 }
 0x482   :  { %4865 = vmatprep.mubr.msk.f32.mxu1 %vm5651_vm4, %v5650_v44 }
 0x485   :  { %4866 = vmatmul.mubr.msk.f32.gmra.mrb[12].mxu1 %vm529_vm8, %v5827_v26 }
 0x486   :  { %4868 = vmatprep.mubr.msk.f32.mxu1 %vm5651_vm4, %v5650_v44 }
 0x489   :  { %4869 = vmatmul.mubr.msk.f32.gmra.mrb[14].mxu1 %vm529_vm8, %v5833_v27 }
 0x48a   :  { %4875 = vmatprep.mubr.msk.f32.mxu1 %vm5651_vm4, %v5650_v44 }
 0x48d   :  { %4876 = vmatmul.mubr.msk.f32.vlgmr.msra.gmra.mrb[16].mxu1 %vm529_vm8, %v5805_v22 }
 0x48e   :  { %4878 = vmatprep.mubr.msk.f32.mxu1 %vm5651_vm4, %v5650_v44 }
 0x491   :  { %4879 = vmatmul.mubr.msk.f32.gmra.mrb[18].mxu1 %vm529_vm8, %v5814_v24 }
 0x492   :  { %4881 = vmatprep.mubr.msk.f32.mxu1 %vm5651_vm4, %v5650_v44 }
 0x495   :  { %4882 = vmatmul.mubr.msk.f32.gmra.mrb[20].mxu1 %vm529_vm8, %v5821_v25 }
 0x496   :  { %4884 = vmatprep.mubr.msk.f32.mxu1 %vm5651_vm4, %v5650_v44 }
 0x499   :  { %4885 = vmatmul.mubr.msk.f32.gmra.mrb[22].mxu1 %vm529_vm8, %v5827_v26 }
 0x49a   :  { %4887 = vmatprep.mubr.msk.f32.mxu1 %vm5651_vm4, %v5650_v44 }
 0x49d   :  { %4888 = vmatmul.mubr.msk.f32.gmra.mrb[24].mxu1 %vm529_vm8, %v5833_v27 }
 0x49e   :  { %4896 = vmatprep.mubr.msk.bf16.mxu1 %vm5651_vm4, %v5650_v44 }
 0x54c   :  { %v614_v28 = vpop.f32.mrb[2].mxu1 }
 0x54d   :  { %v4858_v31 = vpop.f32.mrb[3].mxu1  ;;  %v638_v35 = vmul.f32 %v614_v28, %v5862_v32  ;;  %v5902_v28 = vld [vmem:[%s4356_s17 + $0x8] sm:$0x3] }
 0x550   :  { %v619_v34 = vpop.f32.mrb[8].mxu1 }
 0x551   :  { %v639_v36 = vmul.f32 %v619_v34, %v5864_v33  ;;  %v4861_v37 = vpop.f32.mrb[9].mxu1 }
 0x553   :  { %v746_v38 = vpack.c.bf16 %v639_v36, %v638_v35 }
 0x554   :  { %v624_v39 = vpop.f32.mrb[10].mxu1 }
 0x555   :  { %v4864_v40 = vpop.f32.mrb[11].mxu1  ;;  %v753_v41 = vsel %vm413_vm2, %v746_v38, 0  ;;  %v640_v46 = vmul.f32 %v624_v39, %v5869_v42  ;;  %v5910_v39 = vpack.c.bf16 %v5864_v33, %v5862_v32 }
 0x556   :  { %4891 = vmatpush3.bf16.xpose.msra.mxu1 %v753_v41 }
 0x557   :  { %4892 = vmatprep.subr.bf16.mxu1 %v5650_v44 }
 0x558   :  { %v629_v45 = vpop.f32.mrb[12].mxu1 }
 0x559   :  { %v641_v47 = vmul.f32 %v629_v45, %v5871_v43  ;;  %v4867_v48 = vpop.f32.mrb[13].mxu1 }
 0x55b   :  { %v747_v50 = vpack.c.bf16 %v641_v47, %v640_v46 }
 0x55c   :  { %v634_v51 = vpop.f32.mrb[14].mxu1 }
 0x55d   :  { %v756_v52 = vsel %vm413_vm2, %v747_v50, 0  ;;  %v642_v56 = vmul.f32 %v634_v51, %v5876_v49  ;;  %v4870_v57 = vpop.f32.mrb[15].mxu1 }
 0x55e   :  { %4893 = vmatpush3.bf16.xpose.msra.mxu1 %v756_v52  ;;  %v5508_v57 = vld [vmem:[%s5931_s21] sm:$0xff]  }
 0x55f   :  { %v748_v58 = vpack.c.bf16 %v642_v56, %v642_v56  ;;  %4894 = vmatprep.subr.bf16.mxu1 %v5650_v44  ;;  %v5915_v56 = vpack.c.bf16 %v5871_v43, %v5869_v42 }
 0x560   :  { %v716_v60 = vpop.f32.mrb[16].mxu1 }
 0x561   :  { %v4877_v61 = vpop.f32.mrb[17].mxu1  ;;  %v759_v62 = vsel %vm413_vm2, %v748_v58, 0  ;;  %v740_v63 = vmul.f32 %v716_v60, %v5862_v32  ;;  %v5509_v58 = vld [vmem:[%s5931_s21 + $0x8] sm:$0xff]  }
 0x564   :  { %v721_v0 = vpop.f32.mrb[18].mxu1 }
 0x565   :  { %v741_v1 = vmul.f32 %v721_v0, %v5864_v33  ;;  %v4880_v2 = vpop.f32.mrb[19].mxu1 }
 0x566   :  { %4895 = vmatpush3.bf16.xpose.msra.mxu1 %v759_v62 }
 0x567   :  { %v821_v3 = vpack.c.bf16 %v741_v1, %v740_v63  ;;  %4923 = vmatprep.subr.bf16.mxu1 %v5650_v44 }
 0x568   :  { %v726_v5 = vpop.f32.mrb[20].mxu1 }
 0x569   :  { %4901 = vmatpush3.bf16.msra.mxu0 %v821_v3  ;;  %v4883_v6 = vpop.f32.mrb[21].mxu1  ;;  %v742_v7 = vmul.f32 %v726_v5, %v5869_v42 }
 0x56a   :  { %4902 = vmatprep.subr.bf16.mxu0 %v5650_v44 }
 0x56c   :  { %v731_v8 = vpop.f32.mrb[22].mxu1 }
 0x56d   :  { %4897 = vmatmul.mubr.msk.bf16.vlgmr.msra.gmra.mrb[28].mxu1 %vm413_vm2, %v745_v12  ;;  %v743_v11 = vmul.f32 %v731_v8, %v5871_v43  ;;  %v4886_v13 = vpop.f32.mrb[23].mxu1  ;;  %v5900_v12 = vld [vmem:[%s4356_s17] sm:$0xff] }
 0x56e   :  { %4927 = vmatprep.mubr.msk.bf16.mxu1 %vm5651_vm4, %v5650_v44  ;;  %4924 = vmatpush3.bf16.msra.mxu1 %v5508_v57 }
 0x56f   :  { %v822_v14 = vpack.c.bf16 %v743_v11, %v742_v7  ;;  %4925 = vmatprep.subr.bf16.mxu1 %v5650_v44 }
 0x570   :  { %v736_v15 = vpop.f32.mrb[24].mxu1 }
 0x571   :  { %4903 = vmatpush3.bf16.msra.mxu0 %v822_v14  ;;  %v744_v16 = vmul.f32 %v736_v15, %v5876_v49  ;;  %v4889_v17 = vpop.f32.mrb[25].mxu1  ;;  %v4427_v14 = vld [vmem:[%s5943_s26] ss:$0 sm:$0xff] }
 0x572   :  { %4904 = vmatprep.subr.bf16.mxu0 %v5650_v44  ;;  %4926 = vmatpush3.bf16.msra.mxu1 %v5509_v58  ;;  %v5970_v58 = vsub.s32 2, %v5760_v53 }
 0x573   :  { %v823_v19 = vpack.c.bf16 %v744_v16, %v744_v16  ;;  %4939 = vmatprep.subr.bf16.mxu1 %v5650_v44 }
 0x575   :  { %v829_v9 = vsel %vm827_vm9, %v823_v19, 0 }
 0x576   :  { %4905 = vmatpush3.bf16.msra.mxu0 %v829_v9 }
 0x577   :  { %5333 = vmatprep.subr.bf16.mxu0 %v5910_v39 }
 0x640   :  { %v795_v10 = vpop.f32.mrb[28].mxu1 }
 0x641   :  { %v802_v20 = vmul.f32 0.35355338, %v795_v10  ;;  %v4898_v21 = vpop.f32.mrb[29].mxu1 }
 0x642   :  { %v798_v23 = vpop.f32.mrb[30].mxu1 }
 0x643   :  { %v803_v31 = vmul.f32 0.35355338, %v798_v23  ;;  %v4899_v34 = vpop.f32.mrb[31].mxu1  ;;  %v804_v35 = vadd.f32 %v802_v20, %v5900_v12 }
 0x645   :  { %v807_v36 = vsel %vm806_vm10, %v804_v35, -inf  ;;  %v805_v37 = vadd.f32 %v803_v31, %v5902_v28 }
 0x646   :  { %808 = vmax.xlane.f32.xlu1 %v807_v36 }
 0x647   :  { %v811_v38 = vsel %vm810_vm11, %v805_v37, -inf }
 0x648   :  { %812 = vmax.xlane.f32.xlu0 %v811_v38 }
 0x6d3   :  { %v809_v40 = vpop.xlane.xlu1 %808 }
 0x6d4   :  { %v814_v41 = vsub.f32 %v804_v35, %v809_v40 }
 0x6d5   :  { %v813_v45 = vpop.xlane.xlu0 %812 }
 0x6d6   :  { %v816_v46 = vmul.f32 1.442695, %v814_v41  ;;  %v815_v47 = vsub.f32 %v805_v37, %v813_v45  ;;  %v5510_v45 = vld [vmem:[%s5963_s1] sm:$0xff]  }
 0x6d8   :  { %v818_v48 = vmul.f32 1.442695, %v815_v47  ;;  %5558 = vpow2.f32 %v816_v46  ;;  %v5511_v46 = vld [vmem:[%s5963_s1 + $0x8] sm:$0xff]  }
 0x6da   :  { %5560 = vpow2.f32 %v818_v48 }
 0x6e2   :  { %v5559_v50 = vpop.eup %5558 }
 0x6e4   :  { %v5561_v51 = vpop.eup %5560 }
 0x6e5   :  { %v820_v52 = vpack.c.bf16 %v5561_v51, %v5559_v50 }
 0x6e7   :  { %4907 = vmatmul.mubr.msk.bf16.vlgmr.msra.gmra.mrb[4].mxu0 %vm806_vm10, %v820_v52 }
 0x6e8   :  { %5335 = vmatpush3.bf16.msra.mxu0 %v5910_v39  ;;  %4920 = vmatprep.mubr.msk.f32.mxu0 %vm806_vm10, %v5559_v50 }
 0x6e9   :  { %5337 = vmatprep.subr.bf16.mxu0 %v5915_v56 }
 0x6ec   :  { %5339 = vmatpush3.bf16.msra.mxu0 %v5915_v56 }
 0x6ed   :  { %4918 = vmatprep.subr.mxu0 %v5876_v49 }
 0x6f0   :  { %4919 = vmatpush3.msra.mxu0 %v5876_v49 }
 0x6f1   :  { %4921 = vmatmul.mubr.msk.f32.vlgmr.msra.gmra.mrb[8].mxu0 %vm806_vm10, %v5561_v51  ;;  %4931 = vmatprep.subr.bf16.mxu0 %v5650_v44 }
 0x6f2   :  { %4935 = vmatprep.mubr.msk.bf16.mxu0 %vm5651_vm4, %v5650_v44  ;;  %4932 = vmatpush3.bf16.msra.mxu0 %v5510_v45 }
 0x6f3   :  { %4933 = vmatprep.subr.bf16.mxu0 %v5650_v44 }
 0x6f6   :  { %4934 = vmatpush3.bf16.msra.mxu0 %v5511_v46 }
 0x6f7   :  { %4951 = vmatprep.subr.bf16.mxu0 %v5650_v44 }
 0x7ba   :  { %v865_v60 = vpop.f32.mrb[4].mxu0 }
 0x7bb   :  { %v4908_v61 = vpop.f32.mrb[5].mxu0 }
 0x7bc   :  { %v868_v62 = vpop.f32.mrb[6].mxu0  ;;  %v5975_v61 = vsub.s32 3, %v5760_v53 }
 0x7bd   :  { %v4909_v63 = vpop.f32.mrb[7].mxu0 }
 0x7c4   :  { %v4922_v0 = vpop.f32.mrb[8].mxu0 }
 0x7c5   :  { %v954_v1 = vmax.f32 %v4922_v0, 1e-30  ;;  %v944_v2 = vpop.f32.mrb[9].mxu0 }
 0x7c6   :  { %v953_v3 = vmax.f32 %v944_v2, 1e-30 }
 0x7c7   :  { %5562 = vrcp.f32 %v954_v1 }
 0x7c8   :  { %5564 = vrcp.f32 %v953_v3  ;;  %v1066_v3 = vrot.slane %v5766_v55, %v5975_v61 }
 0x7d1   :  { %v5563_v5 = vpop.eup %5562 }
 0x7d2   :  { %v5565_v6 = vpop.eup %5564  ;;  %v958_v7 = vmul.f32 %v5563_v5, %v868_v62 }
 0x7d3   :  { %v957_v8 = vmul.f32 %v5565_v6, %v865_v60  ;;  %v1060_v60 = vrot.slane %v5766_v55, %v5970_v58  ;;  %v5512_v55 = vld [vmem:[%s5985_s8] sm:$0xff]  }
 0x7d5   :  { %v963_v11 = vpack.c.bf16 %v958_v7, %v957_v8 }
 0x7d7   :  { %4928 = vmatmul.mubr.msk.bf16.vlgmr.msra.gmra.mrb[32].mxu1 %vm413_vm2, %v963_v11  ;;  %v5513_v11 = vld [vmem:[%s5985_s8 + $0x8] sm:$0xff]  }
 0x7d8   :  { %4947 = vmatprep.mubr.msk.bf16.mxu1 %vm5651_vm4, %v5650_v44  ;;  %4940 = vmatpush3.bf16.msra.mxu1 %v5512_v55 }
 0x7d9   :  { %4941 = vmatprep.subr.bf16.mxu1 %v5650_v44 }
 0x7dc   :  { %4942 = vmatpush3.bf16.msra.mxu1 %v5513_v11 }
 0x7dd   :  { %4943 = vmatprep.subr.bf16.mxu1 %v5650_v44 }
 0x8aa   :  { %v1013_v13 = vpop.f32.mrb[32].mxu1 }
 0x8ab   :  { %v1020_v15 = vadd.f32 %v1013_v13, %v5729_v29  ;;  %v4929_v16 = vpop.f32.mrb[33].mxu1  ;;  %v5514_v13 = vld [vmem:[%s5985_s8 + $0x10] sm:$0xff]  }
 0x8ac   :  { %v1016_v17 = vpop.f32.mrb[34].mxu1  ;;  %4944 = vmatpush3.bf16.msra.mxu1 %v5514_v13 }
 0x8ad   :  { %v5947_v19 = vadd.f32 %v4427_v14, %v1020_v15  ;;  %v1021_v9 = vadd.f32 %v1016_v17, %v5731_v30  ;;  %v4930_v10 = vpop.f32.mrb[35].mxu1  ;;  %4945 = vmatprep.subr.bf16.mxu1 %v5650_v44  ;;  %v4428_v15 = vld [vmem:[%s5998_s12] ss:$0 sm:$0xff] }
 0x8af   :  { %v5950_v20 = vadd.f32 %v4427_v14, %v1021_v9  ;;  %v1031_v21 = vsel %vm413_vm2, %v5947_v19, 0.0  ;;  %v5515_v14 = vld [vmem:[%s5985_s8 + $0x18] sm:$0xff]  }
 0x8b0   :  { %1032 = vadd.xlane.f32.xlu0 %v1031_v21  ;;  %4946 = vmatpush3.bf16.msra.mxu1 %v5515_v14 }
 0x8b1   :  { %v1034_v23 = vsel %vm417_vm3, %v5950_v20, 0.0  ;;  %5344 = vmatprep.subr.bf16.mxu1 %v5654_v4 }
 0x8b2   :  { %1035 = vadd.xlane.f32.xlu1 %v1034_v23 }
 0x93d   :  { %v1033_v31 = vpop.xlane.xlu0 %1032 }
 0x93e   :  { %v1037_v34 = vmul.f32 0.03125, %v1033_v31 }
 0x93f   :  { %v1036_v29 = vpop.xlane.xlu1 %1035 }
 0x940   :  { %v1039_v35 = vsub.f32 %v5947_v19, %v1037_v34  ;;  %v1038_v36 = vmul.f32 0.03125, %v1036_v29 }
 0x942   :  { %v1040_v37 = vsub.f32 %v5950_v20, %v1038_v36  ;;  %v1041_v30 = vmul.f32 %v1039_v35, %v1039_v35 }
 0x944   :  { %v1043_v38 = vsel %vm413_vm2, %v1041_v30, 0.0  ;;  %v1042_v40 = vmul.f32 %v1040_v37, %v1040_v37 }
 0x945   :  { %1044 = vadd.xlane.f32.xlu0 %v1043_v38 }
 0x946   :  { %v1046_v41 = vsel %vm417_vm3, %v1042_v40, 0.0 }
 0x947   :  { %1047 = vadd.xlane.f32.xlu1 %v1046_v41 }
 0x9d2   :  { %v1045_v47 = vpop.xlane.xlu0 %1044 }
 0x9d3   :  { %v1049_v48 = vmul.f32 0.03125, %v1045_v47 }
 0x9d4   :  { %v1048_v50 = vpop.xlane.xlu1 %1047 }
 0x9d5   :  { %v1051_v51 = vadd.f32 1e-05, %v1049_v48  ;;  %v1050_v52 = vmul.f32 0.03125, %v1048_v50 }
 0x9d7   :  { %5566 = vrsqrt.f32 %v1051_v51  ;;  %v1052_v57 = vadd.f32 1e-05, %v1050_v52 }
 0x9d9   :  { %5568 = vrsqrt.f32 %v1052_v57 }
 0x9e1   :  { %v5567_v62 = vpop.eup %5566 }
 0x9e2   :  { %v1055_v63 = vmul.f32 %v5567_v62, %v1039_v35 }
 0x9e3   :  { %v5569_v0 = vpop.eup %5568 }
 0x9e4   :  { %v1061_v1 = vmul.f32 %v1060_v60, %v1055_v63  ;;  %v1056_v2 = vmul.f32 %v5569_v0, %v1040_v37  ;;  %v4437_v63 = vld [vmem:[%s6007_s16] ss:$0 sm:$0xff] }
 0x9e6   :  { %v1062_v5 = vmul.f32 %v1060_v60, %v1056_v2  ;;  %v1067_v6 = vadd.f32 %v1066_v3, %v1061_v1 }
 0x9e8   :  { %v1068_v7 = vadd.f32 %v1066_v3, %v1062_v5 }
 0x9ea   :  { %v1073_v8 = vpack.c.bf16 %v1068_v7, %v1067_v6 }
 0x9ec   :  { %4936 = vmatmul.mubr.msk.bf16.vlgmr.msra.gmra.mrb[12].mxu0 %vm413_vm2, %v1073_v8 }
 0x9ed   :  { %4955 = vmatprep.mubr.msk.bf16.mxu0 %vm5651_vm4, %v5650_v44 }
 0xabf   :  { %v1130_v16 = vpop.f32.mrb[12].mxu0 }
 0xac0   :  { %v1131_v17 = vadd.f32 %v4428_v15, %v1130_v16  ;;  %v4937_v9 = vpop.f32.mrb[13].mxu0 }
 0xac1   :  { %v1133_v10 = vpop.f32.mrb[14].mxu0 }
 0xac2   :  { %v1137_v21 = vmul.f32 %v1131_v17, %v1131_v17  ;;  %v1134_v23 = vadd.f32 %v4428_v15, %v1133_v10  ;;  %v4938_v31 = vpop.f32.mrb[15].mxu0 }
 0xac4   :  { %v1139_v34 = vmul.f32 %v1137_v21, %v1131_v17  ;;  %v1138_v29 = vmul.f32 %v1134_v23, %v1134_v23  ;;  %v5516_v21 = vld [vmem:[%s5744_s25 + $0x10] sm:$0xff]  }
 0xac5   :  { %4952 = vmatpush3.bf16.msra.mxu0 %v5516_v21 }
 0xac6   :  { %v1141_v35 = vmul.f32 0.044715, %v1139_v34  ;;  %v1140_v36 = vmul.f32 %v1138_v29, %v1134_v23  ;;  %4953 = vmatprep.subr.bf16.mxu0 %v5650_v44 }
 0xac8   :  { %v1143_v37 = vadd.f32 %v1141_v35, %v1131_v17  ;;  %v1142_v30 = vmul.f32 0.044715, %v1140_v36 }
 0xaca   :  { %v1145_v38 = vmul.f32 0.7978846, %v1143_v37  ;;  %v1144_v40 = vadd.f32 %v1142_v30, %v1134_v23  ;;  %v6029_v30 = vld [vmem:[%s5758_s29 + $0x4] sm:$0xf]  ;;  %s5681_s29 = smov 26  }
 0xacb   :  { %s6449_s19 = sld [smem:[%s6707_s0 + %s5681_s29]]  }
 0xacc   :  { %5570 = vtanh.f32 %v1145_v38  ;;  %v1146_v41 = vmul.f32 0.7978846, %v1144_v40  ;;  %v1274_v38 = vrot.slane %v6029_v30, %v5763_v54 }
 0xace   :  { %5572 = vtanh.f32 %v1146_v41 }
 0xad6   :  { %v5571_v45 = vpop.eup %5570 }
 0xad7   :  { %v1149_v46 = vadd.f32 1.0, %v5571_v45 }
 0xad8   :  { %v5573_v47 = vpop.eup %5572 }
 0xad9   :  { %v1151_v48 = vmul.f32 0.5, %v1149_v46  ;;  %v1150_v50 = vadd.f32 1.0, %v5573_v47 }
 0xadb   :  { %v1152_v51 = vmul.f32 0.5, %v1150_v50  ;;  %v1153_v52 = vmul.f32 %v1151_v48, %v1131_v17  ;;  %v1280_v48 = vrot.slane %v6029_v30, %v5771_v59 }
 0xadd   :  { %v1154_v57 = vmul.f32 %v1152_v51, %v1134_v23  ;;  %v5517_v23 = vld [vmem:[%s5744_s25 + $0x18] sm:$0xff]   ;;  %s5667_s25 = smov 4  }
 0xade   :  { %4954 = vmatpush3.bf16.msra.mxu0 %v5517_v23  ;;  %s4352_s17 = sld [smem:[%s6707_s0 + %s5667_s25]]   ;;  %s5674_s25 = smov 28  }
 0xadf   :  { %v1163_v60 = vpack.c.bf16 %v1154_v57, %v1153_v52  ;;  %5340 = vmatprep.subr.bf16.mxu0 %v5654_v4 }
 0xae1   :  { %4948 = vmatmul.mubr.msk.bf16.vlgmr.msra.gmra.mrb[36].mxu1 %vm270_vm0, %v1163_v60  ;;  %v4444_v60 = vld [vmem:[%s5781_s3 + $0x1] ss:$0 sm:$0xff] }
 0xae2   :  { %4982 = vmatprep.mubr.msk.f32.mxu1 %vm5651_vm4, %v5650_v44 }
 0xbb4   :  { %v1225_v62 = vpop.f32.mrb[36].mxu1 }
 0xbb5   :  { %v1232_v0 = vadd.f32 %v1225_v62, %v5947_v19  ;;  %v4949_v1 = vpop.f32.mrb[37].mxu1 }
 0xbb6   :  { %v1228_v2 = vpop.f32.mrb[38].mxu1 }
 0xbb7   :  { %v6011_v3 = vadd.f32 %v4437_v63, %v1232_v0  ;;  %v1233_v5 = vadd.f32 %v1228_v2, %v5950_v20  ;;  %v4950_v6 = vpop.f32.mrb[39].mxu1 }
 0xbb9   :  { %v6014_v7 = vadd.f32 %v4437_v63, %v1233_v5  ;;  %v1245_v8 = vsel %vm413_vm2, %v6011_v3, 0.0 }
 0xbba   :  { %1246 = vadd.xlane.f32.xlu0 %v1245_v8 }
 0xbbb   :  { %v1248_v55 = vsel %vm417_vm3, %v6014_v7, 0.0 }
 0xbbc   :  { %1249 = vadd.xlane.f32.xlu1 %v1248_v55 }
 0xc47   :  { %v1247_v19 = vpop.xlane.xlu0 %1246 }
 0xc48   :  { %v1251_v11 = vmul.f32 0.03125, %v1247_v19 }
 0xc49   :  { %v1250_v13 = vpop.xlane.xlu1 %1249 }
 0xc4a   :  { %v1253_v14 = vsub.f32 %v6011_v3, %v1251_v11  ;;  %v1252_v15 = vmul.f32 0.03125, %v1250_v13 }
 0xc4c   :  { %v1254_v20 = vsub.f32 %v6014_v7, %v1252_v15  ;;  %v1255_v16 = vmul.f32 %v1253_v14, %v1253_v14 }
 0xc4e   :  { %v1257_v17 = vsel %vm413_vm2, %v1255_v16, 0.0  ;;  %v1256_v9 = vmul.f32 %v1254_v20, %v1254_v20 }
 0xc4f   :  { %1258 = vadd.xlane.f32.xlu0 %v1257_v17 }
 0xc50   :  { %v1260_v10 = vsel %vm417_vm3, %v1256_v9, 0.0 }
 0xc51   :  { %1261 = vadd.xlane.f32.xlu1 %v1260_v10 }
 0xcdc   :  { %v1259_v31 = vpop.xlane.xlu0 %1258 }
 0xcdd   :  { %v1263_v34 = vmul.f32 0.03125, %v1259_v31 }
 0xcde   :  { %v1262_v29 = vpop.xlane.xlu1 %1261 }
 0xcdf   :  { %v1265_v35 = vadd.f32 1e-05, %v1263_v34  ;;  %v1264_v36 = vmul.f32 0.03125, %v1262_v29 }
 0xce1   :  { %5574 = vrsqrt.f32 %v1265_v35  ;;  %v1266_v37 = vadd.f32 1e-05, %v1264_v36 }
 0xce3   :  { %5576 = vrsqrt.f32 %v1266_v37 }
 0xceb   :  { %v5575_v40 = vpop.eup %5574 }
 0xcec   :  { %v1269_v41 = vmul.f32 %v5575_v40, %v1253_v14 }
 0xced   :  { %v5577_v45 = vpop.eup %5576 }
 0xcee   :  { %v1275_v46 = vmul.f32 %v1274_v38, %v1269_v41  ;;  %v1270_v47 = vmul.f32 %v5577_v45, %v1254_v20 }
 0xcf0   :  { %v1276_v50 = vmul.f32 %v1274_v38, %v1270_v47  ;;  %v1281_v51 = vadd.f32 %v1280_v48, %v1275_v46 }
 0xcf2   :  { %v1282_v52 = vadd.f32 %v1280_v48, %v1276_v50 }
 0xcf4   :  { %v1288_v57 = vpack.c.bf16 %v1282_v52, %v1281_v51 }
 0xcf6   :  { %4956 = vmatmul.mubr.msk.bf16.vlgmr.msra.gmra.mrb[16].mxu0 %vm413_vm2, %v1288_v57 }
 0xcf7   :  { %4963 = vmatprep.mubr.msk.f32.mxu0 %vm5651_vm4, %v5650_v44 }
 0xdc9   :  { %v1346_v62 = vpop.f32.mrb[16].mxu0 }
 0xdca   :  { %v4957_v63 = vpop.f32.mrb[17].mxu0  ;;  %v6039_v1 = vadd.f32 %v4444_v60, %v1346_v62 }
 0xdcb   :  { %v1349_v0 = vpop.f32.mrb[18].mxu0 }
 0xdcc   :  { %v6041_v2 = vadd.f32 %v4444_v60, %v1349_v0  ;;  %v4958_v5 = vpop.f32.mrb[19].mxu0 }
 0xdce   :  { %v1559_v6 = vpack.c.bf16 %v6041_v2, %v6039_v1  ;;  %v5469_v8 = vpack.i.bf16 %v6041_v2, %v6039_v1 }
 0xdd0   :  { %5470 = vrot.lane.b32.xlu1 %v5469_v8, %s5655_s4  ;;  %5465 = vrot.lane.b32.xlu0 %v5469_v8, %s5656_s5 }
 0xe42   :  { %v5471_v55 = vpop.permute.xlu1 %5470  ;;  %v5466_v19 = vpop.permute.xlu0 %5465 }
 0xe43   :  { %v5473_v11 = vunpack.i.h.bf16 %v5471_v55  ;;  %v5472_v13 = vunpack.i.l.bf16 %v5471_v55  ;;  %v5468_v14 = vunpack.i.h.bf16 %v5466_v19  ;;  %v5467_v15 = vunpack.i.l.bf16 %v5466_v19 }
 0xe45   :  { %v5345_v20 = vpack.c.bf16 %v5473_v11, %v5472_v13  ;;  %v5341_v16 = vpack.c.bf16 %v5468_v14, %v5467_v15 }
 0xe47   :  { %5343 = vmatpush3.bf16.msk.msra.mxu0 %vm5799_vm7, %v5341_v16  ;;  %5347 = vmatpush3.bf16.msk.msra.mxu1 %vm5799_vm7, %v5345_v20 }
 0xe48   :  { %4997 = vmatprep.subr.bf16.mxu0 %v5650_v44  ;;  %5007 = vmatprep.subr.bf16.mxu1 %v5650_v44 }
 0xe4a   :  { %4964 = vmatmul.mubr.msk.f32.vlgmr.msra.gmra.mrb[10].mxu0 %vm529_vm8, %v5805_v22  ;;  %4983 = vmatmul.mubr.msk.f32.vlgmr.msra.gmra.mrb[26].mxu1 %vm529_vm8, %v5805_v22 }
 0xe4b   :  { %4966 = vmatprep.mubr.msk.f32.mxu0 %vm5651_vm4, %v5650_v44  ;;  %4985 = vmatprep.mubr.msk.f32.mxu1 %vm5651_vm4, %v5650_v44 }
 0xe4e   :  { %4967 = vmatmul.mubr.msk.f32.gmra.mrb[20].mxu0 %vm529_vm8, %v5814_v24  ;;  %4986 = vmatmul.mubr.msk.f32.gmra.mrb[40].mxu1 %vm529_vm8, %v5814_v24 }
 0xe4f   :  { %4969 = vmatprep.mubr.msk.f32.mxu0 %vm5651_vm4, %v5650_v44  ;;  %4988 = vmatprep.mubr.msk.f32.mxu1 %vm5651_vm4, %v5650_v44 }
 0xe52   :  { %4970 = vmatmul.mubr.msk.f32.gmra.mrb[22].mxu0 %vm529_vm8, %v5821_v25  ;;  %4989 = vmatmul.mubr.msk.f32.gmra.mrb[42].mxu1 %vm529_vm8, %v5821_v25 }
 0xe53   :  { %4972 = vmatprep.mubr.msk.f32.mxu0 %vm5651_vm4, %v5650_v44  ;;  %4991 = vmatprep.mubr.msk.f32.mxu1 %vm5651_vm4, %v5650_v44 }
 0xe56   :  { %4973 = vmatmul.mubr.msk.f32.gmra.mrb[24].mxu0 %vm529_vm8, %v5827_v26  ;;  %4992 = vmatmul.mubr.msk.f32.gmra.mrb[44].mxu1 %vm529_vm8, %v5827_v26 }
 0xe57   :  { %4975 = vmatprep.mubr.msk.f32.mxu0 %vm5651_vm4, %v5650_v44  ;;  %4994 = vmatprep.mubr.msk.f32.mxu1 %vm5651_vm4, %v5650_v44 }
 0xe5a   :  { %4976 = vmatmul.mubr.msk.f32.gmra.mrb[26].mxu0 %vm529_vm8, %v5833_v27  ;;  %4995 = vmatmul.mubr.msk.f32.gmra.mrb[46].mxu1 %vm529_vm8, %v5833_v27 }
 0xe5b   :  { %5003 = vmatprep.mubr.msk.bf16.mxu0 %vm5651_vm4, %v5650_v44  ;;  %5013 = vmatprep.mubr.msk.bf16.mxu1 %vm5651_vm4, %v5650_v44 }
 0xf1d   :  { %v1428_v22 = vpop.f32.mrb[10].mxu0  ;;  %v1530_v47 = vpop.f32.mrb[26].mxu1 }
 0xf1e   :  { %v4965_v24 = vpop.f32.mrb[11].mxu0  ;;  %v1452_v26 = vmul.f32 %v1428_v22, %v5862_v32  ;;  %v1554_v48 = vmul.f32 %v1530_v47, %v5862_v32  ;;  %v4984_v50 = vpop.f32.mrb[27].mxu1 }
 0xf21   :  { %v1433_v25 = vpop.f32.mrb[20].mxu0  ;;  %v1535_v51 = vpop.f32.mrb[40].mxu1 }
 0xf22   :  { %v1453_v17 = vmul.f32 %v1433_v25, %v5864_v33  ;;  %v4968_v9 = vpop.f32.mrb[21].mxu0  ;;  %v1555_v52 = vmul.f32 %v1535_v51, %v5864_v33  ;;  %v4987_v57 = vpop.f32.mrb[41].mxu1 }
 0xf24   :  { %v1560_v10 = vpack.c.bf16 %v1453_v17, %v1452_v26  ;;  %v1633_v60 = vpack.c.bf16 %v1555_v52, %v1554_v48  ;;  %v4472_v48 = vld [vmem:[%s5943_s26 + $0x1] ss:$0 sm:$0xff]  ;;  %s6198_s26 = sld [smem:[%s6707_s0 + %s5669_s22]]   ;;  %s5676_s22 = smov 10  }
 0xf25   :  { %v1438_v21 = vpop.f32.mrb[22].mxu0  ;;  %v1540_v55 = vpop.f32.mrb[42].mxu1 }
 0xf26   :  { %v4971_v23 = vpop.f32.mrb[23].mxu0  ;;  %v1567_v31 = vsel %vm413_vm2, %v1560_v10, 0  ;;  %v1454_v34 = vmul.f32 %v1438_v21, %v5869_v42  ;;  %5008 = vmatpush3.bf16.msra.mxu1 %v1633_v60  ;;  %v4990_v19 = vpop.f32.mrb[43].mxu1  ;;  %v1556_v13 = vmul.f32 %v1540_v55, %v5869_v42 }
 0xf27   :  { %4998 = vmatpush3.bf16.xpose.msra.mxu0 %v1567_v31  ;;  %5009 = vmatprep.subr.bf16.mxu1 %v5650_v44  ;;  %v5518_v31 = vld [vmem:[%s5931_s21 + $0x10] sm:$0xff]  }
 0xf28   :  { %4999 = vmatprep.subr.bf16.mxu0 %v5650_v44 }
 0xf29   :  { %v1443_v27 = vpop.f32.mrb[24].mxu0  ;;  %v1545_v11 = vpop.f32.mrb[44].mxu1 }
 0xf2a   :  { %v1455_v29 = vmul.f32 %v1443_v27, %v5871_v43  ;;  %v4974_v35 = vpop.f32.mrb[25].mxu0  ;;  %v1557_v14 = vmul.f32 %v1545_v11, %v5871_v43  ;;  %v4993_v15 = vpop.f32.mrb[45].mxu1  ;;  %v5520_v11 = vld [vmem:[%s5963_s1 + $0x10] sm:$0xff]  }
 0xf2c   :  { %v1561_v36 = vpack.c.bf16 %v1455_v29, %v1454_v34  ;;  %v1634_v20 = vpack.c.bf16 %v1557_v14, %v1556_v13  ;;  %v5521_v13 = vld [vmem:[%s5963_s1 + $0x18] sm:$0xff]   ;;  %s4371_s1 = sld [smem:[%s6707_s0 + %s5670_s27]]  }
 0xf2d   :  { %v1448_v37 = vpop.f32.mrb[26].mxu0  ;;  %s4358_s27 = sld [smem:[%s6707_s0 + %s5676_s22]]  }
 0xf2e   :  { %v1570_v38 = vsel %vm413_vm2, %v1561_v36, 0  ;;  %v1456_v40 = vmul.f32 %v1448_v37, %v5876_v49  ;;  %v4977_v41 = vpop.f32.mrb[27].mxu0  ;;  %5010 = vmatpush3.bf16.msra.mxu1 %v1634_v20 }
 0xf2f   :  { %5000 = vmatpush3.bf16.xpose.msra.mxu0 %v1570_v38  ;;  %5011 = vmatprep.subr.bf16.mxu1 %v5650_v44 }
 0xf30   :  { %v1562_v45 = vpack.c.bf16 %v1456_v40, %v1456_v40  ;;  %5001 = vmatprep.subr.bf16.mxu0 %v5650_v44 }
 0xf32   :  { %v1573_v46 = vsel %vm413_vm2, %v1562_v45, 0 }
 0xf37   :  { %5002 = vmatpush3.bf16.xpose.msra.mxu0 %v1573_v46 }
 0xf38   :  { %5030 = vmatprep.subr.bf16.mxu0 %v5650_v44 }
 0xf3e   :  { %5004 = vmatmul.mubr.msk.bf16.vlgmr.msra.gmra.mrb[28].mxu0 %vm413_vm2, %v1559_v6 }
 0xf3f   :  { %5034 = vmatprep.mubr.msk.bf16.mxu0 %vm5651_vm4, %v5650_v44  ;;  %5031 = vmatpush3.bf16.msra.mxu0 %v5518_v31  ;;  %v5523_v31 = vld [vmem:[%s5985_s8 + $0x28] sm:$0xff]  }
 0xf40   :  { %5032 = vmatprep.subr.bf16.mxu0 %v5650_v44 }
0x1011   :  { %v1609_v62 = vpop.f32.mrb[28].mxu0 }
0x1012   :  { %v1616_v63 = vmul.f32 0.35355338, %v1609_v62  ;;  %v5005_v0 = vpop.f32.mrb[29].mxu0 }
0x1013   :  { %v1612_v1 = vpop.f32.mrb[30].mxu0 }
0x1014   :  { %v1617_v2 = vmul.f32 0.35355338, %v1612_v1  ;;  %v5006_v5 = vpop.f32.mrb[31].mxu0  ;;  %v1618_v6 = vadd.f32 %v1616_v63, %v5900_v12  ;;  %v1550_v12 = vpop.f32.mrb[46].mxu1 }
0x1015   :  { %v4996_v16 = vpop.f32.mrb[47].mxu1 }
0x1016   :  { %v1620_v8 = vsel %vm806_vm10, %v1618_v6, -inf  ;;  %v1619_v32 = vadd.f32 %v1617_v2, %v5902_v28  ;;  %v1558_v28 = vmul.f32 %v1550_v12, %v5876_v49 }
0x1017   :  { %1621 = vmax.xlane.f32.xlu1 %v1620_v8 }
0x1018   :  { %v1623_v33 = vsel %vm810_vm11, %v1619_v32, -inf  ;;  %v1635_v22 = vpack.c.bf16 %v1558_v28, %v1558_v28 }
0x1019   :  { %1624 = vmax.xlane.f32.xlu0 %v1623_v33 }
0x101a   :  { %v1640_v24 = vsel %vm827_vm9, %v1635_v22, 0  ;;  %v1873_v22 = vrot.slane %v6029_v30, %v5970_v58 }
0x101b   :  { %5012 = vmatpush3.bf16.msra.mxu1 %v1640_v24 }
0x101c   :  { %5349 = vmatprep.subr.bf16.mxu1 %v5910_v39 }
0x10a4   :  { %v1622_v25 = vpop.xlane.xlu1 %1621 }
0x10a5   :  { %v1626_v26 = vsub.f32 %v1618_v6, %v1622_v25 }
0x10a6   :  { %v1625_v42 = vpop.xlane.xlu0 %1624 }
0x10a7   :  { %v1628_v17 = vmul.f32 1.442695, %v1626_v26  ;;  %v1627_v43 = vsub.f32 %v1619_v32, %v1625_v42 }
0x10a9   :  { %v1630_v9 = vmul.f32 1.442695, %v1627_v43  ;;  %5578 = vpow2.f32 %v1628_v17 }
0x10ab   :  { %5580 = vpow2.f32 %v1630_v9 }
0x10b3   :  { %v5579_v10 = vpop.eup %5578 }
0x10b5   :  { %v5581_v21 = vpop.eup %5580 }
0x10b6   :  { %v1632_v23 = vpack.c.bf16 %v5581_v21, %v5579_v10 }
0x10b8   :  { %5014 = vmatmul.mubr.msk.bf16.vlgmr.msra.gmra.mrb[48].mxu1 %vm806_vm10, %v1632_v23  ;;  %v5522_v23 = vld [vmem:[%s5985_s8 + $0x20] sm:$0xff]  }
0x10b9   :  { %5351 = vmatpush3.bf16.msra.mxu1 %v5910_v39  ;;  %5027 = vmatprep.mubr.msk.f32.mxu1 %vm806_vm10, %v5579_v10  ;;  %v5519_v39 = vld [vmem:[%s5931_s21 + $0x18] sm:$0xff]   ;;  %s4372_s21 = sld [smem:[%s6707_s0 + %s5668_s18]]   ;;  %s5675_s18 = smov 9  }
0x10ba   :  { %5353 = vmatprep.subr.bf16.mxu1 %v5915_v56  ;;  %5033 = vmatpush3.bf16.msra.mxu0 %v5519_v39  ;;  %v5525_v39 = vld [vmem:[%s5985_s8 + $0x38] sm:$0xff]  }
0x10bb   :  { %5046 = vmatprep.subr.bf16.mxu0 %v5650_v44 }
0x10bd   :  { %5355 = vmatpush3.bf16.msra.mxu1 %v5915_v56 }
0x10be   :  { %5025 = vmatprep.subr.mxu1 %v5876_v49 }
0x10c1   :  { %5026 = vmatpush3.msra.mxu1 %v5876_v49 }
0x10c2   :  { %5028 = vmatmul.mubr.msk.f32.vlgmr.msra.gmra.mrb[52].mxu1 %vm806_vm10, %v5581_v21  ;;  %5038 = vmatprep.subr.bf16.mxu1 %v5650_v44 }
0x10c3   :  { %5042 = vmatprep.mubr.msk.bf16.mxu1 %vm5651_vm4, %v5650_v44  ;;  %5039 = vmatpush3.bf16.msra.mxu1 %v5520_v11 }
0x10c4   :  { %5040 = vmatprep.subr.bf16.mxu1 %v5650_v44 }
0x10c7   :  { %5041 = vmatpush3.bf16.msra.mxu1 %v5521_v13 }
0x10c8   :  { %5356 = vmatprep.subr.bf16.mxu1 %v5654_v4  ;;  %v1879_v4 = vrot.slane %v6029_v30, %v5975_v61  ;;  %v5524_v30 = vld [vmem:[%s5985_s8 + $0x30] sm:$0xff]   ;;  %s4349_s8 = sld [smem:[%s6707_s0 + %s5671_s2]]  }
0x10c9   :  { %s4359_s2 = sld [smem:[%s6707_s0 + %s5677_s28]]  }
0x118b   :  { %v1676_v56 = vpop.f32.mrb[48].mxu1 }
0x118c   :  { %v5015_v27 = vpop.f32.mrb[49].mxu1 }
0x118d   :  { %v1679_v34 = vpop.f32.mrb[50].mxu1 }
0x118e   :  { %v5016_v49 = vpop.f32.mrb[51].mxu1 }
0x1195   :  { %v5029_v29 = vpop.f32.mrb[52].mxu1 }
0x1196   :  { %v1765_v35 = vmax.f32 %v5029_v29, 1e-30  ;;  %v1755_v36 = vpop.f32.mrb[53].mxu1 }
0x1197   :  { %v1764_v37 = vmax.f32 %v1755_v36, 1e-30 }
0x1198   :  { %5582 = vrcp.f32 %v1765_v35 }
0x1199   :  { %5584 = vrcp.f32 %v1764_v37 }
0x11a2   :  { %v5583_v38 = vpop.eup %5582 }
0x11a3   :  { %v5585_v40 = vpop.eup %5584  ;;  %v1769_v41 = vmul.f32 %v5583_v38, %v1679_v34 }
0x11a4   :  { %v1768_v45 = vmul.f32 %v5585_v40, %v1676_v56  ;;  %v4478_v56 = vld [vmem:[%s5998_s12 + $0x1] ss:$0 sm:$0xff]  ;;  %s4373_s12 = sld [smem:[%s6707_s0 + %s5672_s9]]  }
0x11a5   :  { %s6412_s9 = sld [smem:[%s6707_s0 + %s5678_s6]]  }
0x11a6   :  { %v1775_v46 = vpack.c.bf16 %v1769_v41, %v1768_v45 }
0x11a8   :  { %5035 = vmatmul.mubr.msk.bf16.vlgmr.msra.gmra.mrb[32].mxu0 %vm413_vm2, %v1775_v46 }
0x11a9   :  { %5054 = vmatprep.mubr.msk.bf16.mxu0 %vm5651_vm4, %v5650_v44  ;;  %5047 = vmatpush3.bf16.msra.mxu0 %v5522_v23 }
0x11aa   :  { %5048 = vmatprep.subr.bf16.mxu0 %v5650_v44 }
0x11ad   :  { %5049 = vmatpush3.bf16.msra.mxu0 %v5523_v31 }
0x11ae   :  { %5050 = vmatprep.subr.bf16.mxu0 %v5650_v44 }
0x11b1   :  { %5051 = vmatpush3.bf16.msra.mxu0 %v5524_v30 }
0x11b2   :  { %5052 = vmatprep.subr.bf16.mxu0 %v5650_v44 }
0x11b5   :  { %5053 = vmatpush3.bf16.msra.mxu0 %v5525_v39  ;;  %v5528_v39 = vld [vmem:[%s6198_s26] sm:$0xff]  }
0x127b   :  { %v1825_v47 = vpop.f32.mrb[32].mxu0 }
0x127c   :  { %v1832_v50 = vadd.f32 %v1825_v47, %v6011_v3  ;;  %v5036_v51 = vpop.f32.mrb[33].mxu0 }
0x127d   :  { %v1828_v52 = vpop.f32.mrb[34].mxu0 }
0x127e   :  { %v6145_v57 = vadd.f32 %v4472_v48, %v1832_v50  ;;  %v1833_v60 = vadd.f32 %v1828_v52, %v6014_v7  ;;  %v5037_v62 = vpop.f32.mrb[35].mxu0 }
0x1280   :  { %v6148_v63 = vadd.f32 %v4472_v48, %v1833_v60  ;;  %v1844_v0 = vsel %vm413_vm2, %v6145_v57, 0.0 }
0x1281   :  { %1845 = vadd.xlane.f32.xlu0 %v1844_v0 }
0x1282   :  { %v1847_v1 = vsel %vm417_vm3, %v6148_v63, 0.0 }
0x1283   :  { %1848 = vadd.xlane.f32.xlu1 %v1847_v1 }
0x130e   :  { %v1846_v3 = vpop.xlane.xlu0 %1845 }
0x130f   :  { %v1850_v2 = vmul.f32 0.03125, %v1846_v3 }
0x1310   :  { %v1849_v5 = vpop.xlane.xlu1 %1848 }
0x1311   :  { %v1852_v6 = vsub.f32 %v6145_v57, %v1850_v2  ;;  %v1851_v8 = vmul.f32 0.03125, %v1849_v5 }
0x1313   :  { %v1853_v7 = vsub.f32 %v6148_v63, %v1851_v8  ;;  %v1854_v32 = vmul.f32 %v1852_v6, %v1852_v6 }
0x1315   :  { %v1856_v33 = vsel %vm413_vm2, %v1854_v32, 0.0  ;;  %v1855_v55 = vmul.f32 %v1853_v7, %v1853_v7 }
0x1316   :  { %1857 = vadd.xlane.f32.xlu0 %v1856_v33  ;;  %v4496_v33 = vld [vmem:[%s6007_s16 + $0x1] ss:$0 sm:$0xff]  ;;  %s4353_s16 = sld [smem:[%s6707_s0 + %s5673_s13]]  }
0x1317   :  { %v1859_v19 = vsel %vm417_vm3, %v1855_v55, 0.0  ;;  %s6418_s13 = sld [smem:[%s6707_s0 + %s5679_s10]]  }
0x1318   :  { %1860 = vadd.xlane.f32.xlu1 %v1859_v19 }
0x13a3   :  { %v1858_v14 = vpop.xlane.xlu0 %1857 }
0x13a4   :  { %v1862_v15 = vmul.f32 0.03125, %v1858_v14 }
0x13a5   :  { %v1861_v20 = vpop.xlane.xlu1 %1860 }
0x13a6   :  { %v1864_v12 = vadd.f32 1e-05, %v1862_v15  ;;  %v1863_v16 = vmul.f32 0.03125, %v1861_v20  ;;  %v2060_v20 = vld [vmem:[%s4352_s17] sm:$0x3]  ;;  %s6232_s17 = sld [smem:[%s6707_s0 + %s5674_s25]]  }
0x13a7   :  { %s6437_s25 = sld [smem:[%s6707_s0 + %s5680_s14]]   ;;  %s5686_s14 = smov 36  }
0x13a8   :  { %5586 = vrsqrt.f32 %v1864_v12  ;;  %v1865_v28 = vadd.f32 1e-05, %v1863_v16  ;;  %s6508_s29 = sld [smem:[%s6707_s0 + %s5686_s14]]  }
0x13aa   :  { %5588 = vrsqrt.f32 %v1865_v28 }
0x13b2   :  { %v5587_v24 = vpop.eup %5586 }
0x13b3   :  { %v1868_v25 = vmul.f32 %v5587_v24, %v1852_v6 }
0x13b4   :  { %v5589_v26 = vpop.eup %5588 }
0x13b5   :  { %v1874_v42 = vmul.f32 %v1873_v22, %v1868_v25  ;;  %v1869_v17 = vmul.f32 %v5589_v26, %v1853_v7  ;;  %v5526_v25 = vld [vmem:[%s4372_s21] sm:$0xff]   ;;  %v5527_v26 = vld [vmem:[%s4372_s21 + $0x8] sm:$0xff]   ;;  %s6237_s21 = sld [smem:[%s6707_s0 + %s5675_s18]]   ;;  %s5689_s18 = smov 39  }
0x13b7   :  { %v1875_v43 = vmul.f32 %v1873_v22, %v1869_v17  ;;  %v1880_v9 = vadd.f32 %v1879_v4, %v1874_v42 }
0x13b9   :  { %v1881_v10 = vadd.f32 %v1879_v4, %v1875_v43  ;;  %v2137_v43 = vld [vmem:[%s4371_s1] sm:$0x3]  ;;  %s5684_s1 = smov 35  }
0x13ba   :  { %v2159_v23 = vrot.slane %v2137_v43, %v5771_v59  ;;  %s6487_s7 = sld [smem:[%s6707_s0 + %s5684_s1]]  }
0x13bb   :  { %v1887_v21 = vpack.c.bf16 %v1881_v10, %v1880_v9  ;;  %v2154_v9 = vrot.slane %v2137_v43, %v5763_v54 }
0x13bd   :  { %5043 = vmatmul.mubr.msk.bf16.vlgmr.msra.gmra.mrb[56].mxu1 %vm413_vm2, %v1887_v21 }
0x13be   :  { %5062 = vmatprep.mubr.msk.f32.mxu1 %vm5651_vm4, %v5650_v44 }
0x1490   :  { %v1945_v27 = vpop.f32.mrb[56].mxu1 }
0x1491   :  { %v1946_v34 = vadd.f32 %v4478_v56, %v1945_v27  ;;  %v5044_v49 = vpop.f32.mrb[57].mxu1  ;;  %v5529_v27 = vld [vmem:[%s6198_s26 + $0x8] sm:$0xff]  }
0x1492   :  { %v1948_v29 = vpop.f32.mrb[58].mxu1  ;;  %v6217_v49 = vld [vmem:[%s4349_s8 + $0x8] sm:$0xff] }
0x1493   :  { %v1952_v35 = vmul.f32 %v1946_v34, %v1946_v34  ;;  %v1949_v36 = vadd.f32 %v4478_v56, %v1948_v29  ;;  %v5045_v37 = vpop.f32.mrb[59].mxu1 }
0x1495   :  { %v1954_v38 = vmul.f32 %v1952_v35, %v1946_v34  ;;  %v1953_v40 = vmul.f32 %v1949_v36, %v1949_v36  ;;  %v4499_v35 = vld [vmem:[%s4373_s12] ss:$0 sm:$0xff] }
0x1497   :  { %v1956_v41 = vmul.f32 0.044715, %v1954_v38  ;;  %v1955_v45 = vmul.f32 %v1953_v40, %v1949_v36 }
0x1499   :  { %v1958_v46 = vadd.f32 %v1956_v41, %v1946_v34  ;;  %v1957_v47 = vmul.f32 0.044715, %v1955_v45  ;;  %v2228_v45 = vld [vmem:[%s4353_s16] sm:$0xff] }
0x149b   :  { %v1960_v48 = vmul.f32 0.7978846, %v1958_v46  ;;  %v1959_v50 = vadd.f32 %v1957_v47, %v1949_v36  ;;  %v2229_v46 = vld [vmem:[%s4353_s16 + $0x8] sm:$0xff]  ;;  %v4506_v47 = vld [vmem:[%s6232_s17] ss:$0 sm:$0xff] }
0x149d   :  { %5590 = vtanh.f32 %v1960_v48  ;;  %v1961_v51 = vmul.f32 0.7978846, %v1959_v50  ;;  %v6243_v50 = vld [vmem:[%s6237_s21] sm:$0xff] }
0x149f   :  { %5592 = vtanh.f32 %v1961_v51 }
0x14a7   :  { %v5591_v52 = vpop.eup %5590 }
0x14a8   :  { %v1964_v60 = vadd.f32 1.0, %v5591_v52 }
0x14a9   :  { %v5593_v62 = vpop.eup %5592 }
0x14aa   :  { %v1966_v0 = vmul.f32 0.5, %v1964_v60  ;;  %v1965_v1 = vadd.f32 1.0, %v5593_v62 }
0x14ac   :  { %v1967_v3 = vmul.f32 0.5, %v1965_v1  ;;  %v1968_v2 = vmul.f32 %v1966_v0, %v1946_v34  ;;  %v6215_v34 = vld [vmem:[%s4349_s8] sm:$0xff]  ;;  %s5685_s8 = smov 34  }
0x14ad   :  { %v2340_v29 = vpack.c.bf16 %v6217_v49, %v6215_v34  ;;  %s6499_s12 = sld [smem:[%s6707_s0 + %s5685_s8]]  }
0x14ae   :  { %v1969_v5 = vmul.f32 %v1967_v3, %v1949_v36 }
0x14b0   :  { %v1979_v6 = vpack.c.bf16 %v1969_v5, %v1968_v2 }
0x14b2   :  { %5055 = vmatmul.mubr.msk.bf16.vlgmr.msra.gmra.mrb[36].mxu0 %vm270_vm0, %v1979_v6 }
0x14b3   :  { %5075 = vmatprep.mubr.msk.f32.mxu0 %vm2230_vm12, %v2228_v45 }
0x1585   :  { %v2041_v8 = vpop.f32.mrb[36].mxu0 }
0x1586   :  { %v2048_v7 = vadd.f32 %v2041_v8, %v6145_v57  ;;  %v5056_v32 = vpop.f32.mrb[37].mxu0 }
0x1587   :  { %v2044_v55 = vpop.f32.mrb[38].mxu0 }
0x1588   :  { %v2049_v19 = vadd.f32 %v2044_v55, %v6148_v63  ;;  %v5057_v11 = vpop.f32.mrb[39].mxu0  ;;  %v2058_v13 = vadd.f32 %v4496_v33, %v2048_v7 }
0x1589   :  { %v6263_v11 = vld [vmem:[%s6237_s21 + $0x10] sm:$0xff] }
0x158a   :  { %v2059_v14 = vadd.f32 %v4496_v33, %v2049_v19  ;;  %v6260_v19 = vld [vmem:[%s6237_s21 + $0x8] sm:$0xff] }
0x158c   :  { %v5357_v15 = vpack.c.bf16 %v2059_v14, %v2058_v13  ;;  %v6274_v13 = vld [vmem:[%s6237_s21 + $0x18] sm:$0xff]  ;;  %v6279_v14 = vld [vmem:[%s6237_s21 + $0x20] sm:$0xff] }
0x158e   :  { %5359 = vmatpush3.bf16.msk.msra.mxu1 %vm5799_vm7, %v5357_v15  ;;  %v6288_v15 = vld [vmem:[%s6237_s21 + $0x28] sm:$0xff] }
0x158f   :  { %5065 = vmatprep.subr.bf16.mxu1 %v5650_v44 }
0x1591   :  { %5063 = vmatmul.mubr.msk.f32.vlgmr.msra.gmra.mrb[54].mxu1 %vm529_vm8, %v2060_v20  ;;  %v6293_v20 = vld [vmem:[%s6237_s21 + $0x30] sm:$0xff] }
0x1592   :  { %5069 = vmatprep.mubr.msk.bf16.mxu1 %vm5651_vm4, %v5650_v44  ;;  %5066 = vmatpush3.bf16.msra.mxu1 %v5526_v25 }
0x1593   :  { %5067 = vmatprep.subr.bf16.mxu1 %v5650_v44 }
0x1596   :  { %5068 = vmatpush3.bf16.msra.mxu1 %v5527_v26 }
0x1597   :  { %5078 = vmatprep.subr.bf16.mxu1 %v5650_v44 }
0x1664   :  { %v2133_v57 = vpop.f32.mrb[54].mxu1 }
0x1665   :  { %v5064_v12 = vpop.f32.mrb[55].mxu1  ;;  %v2138_v16 = vsel %vm417_vm3, %v2133_v57, 0.0 }
0x1666   :  { %2139 = vadd.xlane.f32.xlu0 %v2138_v16 }
0x16f3   :  { %v2140_v63 = vpop.xlane.xlu0 %2139 }
0x16f4   :  { %v2141_v28 = vmul.f32 0.03125, %v2140_v63 }
0x16f6   :  { %v2142_v22 = vsub.f32 %v2133_v57, %v2141_v28  ;;  %v6302_v57 = vld [vmem:[%s6237_s21 + $0x38] sm:$0xff]  ;;  %v6319_v28 = vld [vmem:[%s4358_s27 + $0x8] sm:$0xff]  ;;  %s4387_s21 = sld [smem:[%s6707_s0 + %s5689_s18]]  }
0x16f8   :  { %v2143_v24 = vmul.f32 %v2142_v22, %v2142_v22 }
0x16fa   :  { %v2144_v18 = vsel %vm417_vm3, %v2143_v24, 0.0 }
0x16fb   :  { %2145 = vadd.xlane.f32.xlu1 %v2144_v18 }
0x1788   :  { %v2146_v42 = vpop.xlane.xlu1 %2145 }
0x1789   :  { %v2147_v17 = vmul.f32 0.03125, %v2146_v42  ;;  %v6325_v42 = vld [vmem:[%s4358_s27 + $0x18] sm:$0xff] }
0x178b   :  { %v2148_v4 = vadd.f32 1e-05, %v2147_v17  ;;  %v6327_v17 = vld [vmem:[%s4358_s27 + $0x10] sm:$0xff] }
0x178d   :  { %5594 = vrsqrt.f32 %v2148_v4 }
0x1797   :  { %v5595_v10 = vpop.eup %5594 }
0x1798   :  { %v2150_v21 = vmul.f32 %v5595_v10, %v2142_v22  ;;  %v6321_v22 = vld [vmem:[%s4358_s27] sm:$0xff] }
0x179a   :  { %v2155_v31 = vmul.f32 %v2154_v9, %v2150_v21 }
0x179c   :  { %v2160_v30 = vadd.f32 %v2159_v23, %v2155_v31  ;;  %v6332_v31 = vld [vmem:[%s4358_s27 + $0x28] sm:$0xff] }
0x179e   :  { %v2165_v56 = vpack.c.bf16 %v2160_v30, %v2160_v30  ;;  %v6334_v30 = vld [vmem:[%s4358_s27 + $0x20] sm:$0xff] }
0x17a0   :  { %5070 = vmatmul.mubr.msk.bf16.vlgmr.msra.gmra.mrb[60].mxu1 %vm413_vm2, %v2165_v56 }
0x17a1   :  { %5079 = vmatpush3.bf16.msra.mxu1 %v5528_v39  ;;  %5082 = vmatprep.mubr.msk.bf16.mxu1 %vm5651_vm4, %v5650_v44 }
0x17a2   :  { %5080 = vmatprep.subr.bf16.mxu1 %v5650_v44 }
0x17a5   :  { %5081 = vmatpush3.bf16.msra.mxu1 %v5529_v27 }
0x17a8   :  { %5083 = vmatmul.mubr.msk.bf16.vlgmr.msra.gmra.mrb[64].mxu1 %vm413_vm2, %v2340_v29 }
0x17a9   :  { %5106 = vmatprep.mubr.msk.f32.mxu1 %vm2412_vm13, %v6243_v50 }
0x1873   :  { %v2222_v36 = vpop.f32.mrb[60].mxu1 }
0x1874   :  { %v2223_v37 = vadd.f32 %v4499_v35, %v2222_v36  ;;  %v5071_v38 = vpop.f32.mrb[61].mxu1  ;;  %v6339_v36 = vld [vmem:[%s4358_s27 + $0x38] sm:$0xff] }
0x1875   :  { %v2225_v40 = vpop.f32.mrb[62].mxu1 }
0x1876   :  { %v5072_v41 = vpop.f32.mrb[63].mxu1  ;;  %5073 = vmatprep.subr.msk.mxu0 %vm545_vm5, %v2223_v37 }
0x1877   :  { %5074 = vmatpush3.msk.msra.mxu0 %vm545_vm5, %v2223_v37  ;;  %v6341_v37 = vld [vmem:[%s4358_s27 + $0x30] sm:$0xff] }
0x1878   :  { %5076 = vmatmul.mubr.msk.f32.vlgmr.msra.gmra.mrb[40].mxu0 %vm2230_vm12, %v2229_v46 }
0x1879   :  { %5090 = vmatprep.mubr.msk.f32.mxu0 %vm2412_vm13, %v6243_v50 }
0x187b   :  { %v2397_v48 = vpop.f32.mrb[64].mxu1 }
0x187c   :  { %v5084_v51 = vpop.f32.mrb[65].mxu1  ;;  %v6249_v60 = vadd.f32 %v4506_v47, %v2397_v48 }
0x187d   :  { %v2400_v52 = vpop.f32.mrb[66].mxu1 }
0x187e   :  { %v6251_v62 = vadd.f32 %v4506_v47, %v2400_v52  ;;  %v5085_v0 = vpop.f32.mrb[67].mxu1 }
0x1880   :  { %v2669_v1 = vpack.c.bf16 %v6251_v62, %v6249_v60  ;;  %v5479_v3 = vpack.i.bf16 %v6251_v62, %v6249_v60  ;;  %v6363_v62 = vld [vmem:[%s4359_s2] sm:$0xff] }
0x1882   :  { %5480 = vrot.lane.b32.xlu1 %v5479_v3, %s5655_s4  ;;  %5475 = vrot.lane.b32.xlu0 %v5479_v3, %s5656_s5 }
0x18f4   :  { %v5481_v2 = vpop.permute.xlu1 %5480  ;;  %v5476_v5 = vpop.permute.xlu0 %5475 }
0x18f5   :  { %v5483_v6 = vunpack.i.h.bf16 %v5481_v2  ;;  %v5482_v8 = vunpack.i.l.bf16 %v5481_v2  ;;  %v5478_v7 = vunpack.i.h.bf16 %v5476_v5  ;;  %v5477_v32 = vunpack.i.l.bf16 %v5476_v5 }
0x18f7   :  { %v5364_v33 = vpack.c.bf16 %v5483_v6, %v5482_v8  ;;  %v5360_v55 = vpack.c.bf16 %v5478_v7, %v5477_v32  ;;  %v6365_v32 = vld [vmem:[%s4359_s2 + $0x8] sm:$0xff] }
0x18f9   :  { %5361 = vmatprep.subr.bf16.mxu0 %v5360_v55  ;;  %5365 = vmatprep.subr.bf16.mxu1 %v5364_v33 }
0x18fa   :  { %5363 = vmatpush3.bf16.msra.mxu0 %v5360_v55  ;;  %5367 = vmatpush3.bf16.msra.mxu1 %v5364_v33 }
0x18fb   :  { %5118 = vmatprep.subr.bf16.mxu0 %v5650_v44  ;;  %5130 = vmatprep.subr.bf16.mxu1 %v5650_v44 }
0x18fd   :  { %5091 = vmatmul.mubr.msk.f32.vlgmr.msra.gmra.mrb[42].mxu0 %vm2412_vm13, %v6260_v19  ;;  %5107 = vmatmul.mubr.msk.f32.vlgmr.msra.gmra.mrb[68].mxu1 %vm2412_vm13, %v6260_v19 }
0x18fe   :  { %5093 = vmatprep.mubr.msk.f32.mxu0 %vm2412_vm13, %v6263_v11  ;;  %5109 = vmatprep.mubr.msk.f32.mxu1 %vm2412_vm13, %v6263_v11 }
0x1901   :  { %5094 = vmatmul.mubr.msk.f32.gmra.mrb[44].mxu0 %vm2412_vm13, %v6274_v13  ;;  %5110 = vmatmul.mubr.msk.f32.gmra.mrb[70].mxu1 %vm2412_vm13, %v6274_v13 }
0x1902   :  { %5096 = vmatprep.mubr.msk.f32.mxu0 %vm2412_vm13, %v6279_v14  ;;  %5112 = vmatprep.mubr.msk.f32.mxu1 %vm2412_vm13, %v6279_v14 }
0x1905   :  { %5097 = vmatmul.mubr.msk.f32.gmra.mrb[46].mxu0 %vm2412_vm13, %v6288_v15  ;;  %5113 = vmatmul.mubr.msk.f32.gmra.mrb[72].mxu1 %vm2412_vm13, %v6288_v15 }
0x1906   :  { %5099 = vmatprep.mubr.msk.f32.mxu0 %vm2412_vm13, %v6293_v20  ;;  %5115 = vmatprep.mubr.msk.f32.mxu1 %vm2412_vm13, %v6293_v20 }
0x1909   :  { %5100 = vmatmul.mubr.msk.f32.gmra.mrb[48].mxu0 %vm2412_vm13, %v6302_v57  ;;  %5116 = vmatmul.mubr.msk.f32.gmra.mrb[74].mxu1 %vm2412_vm13, %v6302_v57 }
0x190a   :  { %5126 = vmatprep.mubr.msk.bf16.mxu0 %vm5651_vm4, %v5650_v44  ;;  %5138 = vmatprep.mubr.msk.bf16.mxu1 %vm5651_vm4, %v5650_v44 }
0x194b   :  { %v5077_v12 = vpop.f32.mrb[40].mxu0 }
0x194c   :  { %v2306_v16 = vpop.f32.mrb[41].mxu0 }
0x194d   :  { %v6314_v63 = vpack.c.bf16 %v5077_v12, %v2306_v16 }
0x19d0   :  { %v5092_v24 = vpop.f32.mrb[42].mxu0  ;;  %v5108_v0 = vpop.f32.mrb[68].mxu1 }
0x19d1   :  { %v2543_v18 = vmul.f32 %v5092_v24, %v6319_v28  ;;  %v2503_v25 = vpop.f32.mrb[43].mxu0  ;;  %v2662_v3 = vmul.f32 %v5108_v0, %v6319_v28  ;;  %v2622_v2 = vpop.f32.mrb[69].mxu1 }
0x19d2   :  { %v2542_v26 = vmul.f32 %v2503_v25, %v6321_v22  ;;  %v2661_v5 = vmul.f32 %v2622_v2, %v6321_v22 }
0x19d4   :  { %v2670_v4 = vpack.c.bf16 %v2543_v18, %v2542_v26  ;;  %v5095_v43 = vpop.f32.mrb[44].mxu0  ;;  %v2747_v6 = vpack.c.bf16 %v2662_v3, %v2661_v5  ;;  %v5111_v25 = vpop.f32.mrb[70].mxu1  ;;  %v6386_v5 = vpack.c.bf16 %v6325_v42, %v6327_v17 }
0x19d5   :  { %v2545_v9 = vmul.f32 %v5095_v43, %v6325_v42  ;;  %v2513_v10 = vpop.f32.mrb[45].mxu0  ;;  %v2632_v26 = vpop.f32.mrb[71].mxu1 }
0x19d6   :  { %v2678_v21 = vsel %vm413_vm2, %v2670_v4, 0  ;;  %v2544_v23 = vmul.f32 %v2513_v10, %v6327_v17  ;;  %5131 = vmatpush3.bf16.msra.mxu1 %v2747_v6  ;;  %v2664_v4 = vmul.f32 %v5111_v25, %v6325_v42  ;;  %v2663_v43 = vmul.f32 %v2632_v26, %v6327_v17 }
0x19d7   :  { %5119 = vmatpush3.bf16.xpose.msra.mxu0 %v2678_v21  ;;  %5132 = vmatprep.subr.bf16.mxu1 %v5650_v44  ;;  %v6394_v6 = vpack.c.bf16 %v6332_v31, %v6334_v30 }
0x19d8   :  { %v2671_v39 = vpack.c.bf16 %v2545_v9, %v2544_v23  ;;  %5120 = vmatprep.subr.bf16.mxu0 %v5650_v44  ;;  %v5098_v56 = vpop.f32.mrb[46].mxu0  ;;  %v2748_v9 = vpack.c.bf16 %v2664_v4, %v2663_v43  ;;  %v5114_v10 = vpop.f32.mrb[72].mxu1 }
0x19d9   :  { %v2547_v27 = vmul.f32 %v5098_v56, %v6332_v31  ;;  %v2523_v29 = vpop.f32.mrb[47].mxu0  ;;  %v2642_v21 = vpop.f32.mrb[73].mxu1  ;;  %v2666_v23 = vmul.f32 %v5114_v10, %v6332_v31  ;;  %v5532_v10 = vld [vmem:[%s6418_s13] sm:$0xff]  }
0x19da   :  { %v2546_v35 = vmul.f32 %v2523_v29, %v6334_v30  ;;  %v2681_v38 = vsel %vm413_vm2, %v2671_v39, 0  ;;  %v2665_v39 = vmul.f32 %v2642_v21, %v6334_v30  ;;  %5133 = vmatpush3.bf16.msra.mxu1 %v2748_v9 }
0x19db   :  { %5134 = vmatprep.subr.bf16.mxu1 %v5650_v44 }
0x19dc   :  { %v2672_v40 = vpack.c.bf16 %v2547_v27, %v2546_v35  ;;  %v5101_v41 = vpop.f32.mrb[48].mxu0  ;;  %v2749_v56 = vpack.c.bf16 %v2666_v23, %v2665_v39  ;;  %v5117_v27 = vpop.f32.mrb[74].mxu1  ;;  %v5533_v23 = vld [vmem:[%s6418_s13 + $0x8] sm:$0xff]  }
0x19dd   :  { %v2549_v45 = vmul.f32 %v5101_v41, %v6339_v36  ;;  %v2533_v46 = vpop.f32.mrb[49].mxu0  ;;  %v2652_v29 = vpop.f32.mrb[75].mxu1  ;;  %v2668_v35 = vmul.f32 %v5117_v27, %v6339_v36  ;;  %v6381_v41 = vpack.c.bf16 %v6319_v28, %v6321_v22 }
0x19de   :  { %v2548_v47 = vmul.f32 %v2533_v46, %v6341_v37  ;;  %v2684_v51 = vsel %vm413_vm2, %v2672_v40, 0  ;;  %5135 = vmatpush3.bf16.msra.mxu1 %v2749_v56  ;;  %v4533_v56 = vld [vmem:[%s6437_s25] ss:$0 sm:$0xff] }
0x19df   :  { %5121 = vmatpush3.bf16.xpose.msra.mxu0 %v2681_v38  ;;  %v2667_v38 = vmul.f32 %v2652_v29, %v6341_v37  ;;  %5136 = vmatprep.subr.bf16.mxu1 %v5650_v44 }
0x19e0   :  { %5122 = vmatprep.subr.bf16.mxu0 %v5650_v44  ;;  %v2673_v48 = vpack.c.bf16 %v2549_v45, %v2548_v47 }
0x19e1   :  { %v2750_v40 = vpack.c.bf16 %v2668_v35, %v2667_v38 }
0x19e2   :  { %v2687_v52 = vsel %vm413_vm2, %v2673_v48, 0 }
0x19e3   :  { %5137 = vmatpush3.bf16.msra.mxu1 %v2750_v40 }
0x19e4   :  { %5369 = vmatprep.subr.bf16.mxu1 %v6381_v41 }
0x19e7   :  { %5123 = vmatpush3.bf16.xpose.msra.mxu0 %v2684_v51 }
0x19e8   :  { %5124 = vmatprep.subr.bf16.mxu0 %v5650_v44 }
0x19ef   :  { %5125 = vmatpush3.bf16.xpose.msra.mxu0 %v2687_v52 }
0x19f0   :  { %5161 = vmatprep.subr.bf16.mxu0 %v5650_v44 }
0x19f6   :  { %5127 = vmatmul.mubr.msk.bf16.vlgmr.msra.gmra.mrb[52].mxu0 %vm413_vm2, %v2669_v1 }
0x19f7   :  { %5165 = vmatprep.mubr.msk.bf16.mxu0 %vm5651_vm4, %v5650_v44 }
0x1ac9   :  { %v2723_v60 = vpop.f32.mrb[52].mxu0 }
0x1aca   :  { %v2730_v1 = vmul.f32 0.35355338, %v2723_v60  ;;  %v5128_v8 = vpop.f32.mrb[53].mxu0  ;;  %v6400_v60 = vpack.c.bf16 %v6339_v36, %v6341_v37 }
0x1acb   :  { %v2726_v7 = vpop.f32.mrb[54].mxu0  ;;  %v5531_v8 = vld [vmem:[%s6412_s9 + $0x8] sm:$0xff]  }
0x1acc   :  { %v2731_v33 = vmul.f32 0.35355338, %v2726_v7  ;;  %v5129_v55 = vpop.f32.mrb[55].mxu0  ;;  %v2732_v12 = vadd.f32 %v2730_v1, %v6363_v62  ;;  %v5530_v1 = vld [vmem:[%s6412_s9] sm:$0xff]  }
0x1acd   :  { %5162 = vmatpush3.bf16.msra.mxu0 %v5530_v1 }
0x1ace   :  { %v2734_v16 = vsel %vm270_vm0, %v2732_v12, -inf  ;;  %v2733_v24 = vadd.f32 %v2731_v33, %v6365_v32  ;;  %5163 = vmatprep.subr.bf16.mxu0 %v5650_v44 }
0x1acf   :  { %2735 = vmax.xlane.f32.xlu1 %v2734_v16 }
0x1ad0   :  { %v2737_v18 = vsel %vm270_vm0, %v2733_v24, -inf }
0x1ad1   :  { %2738 = vmax.xlane.f32.xlu0 %v2737_v18  ;;  %5164 = vmatpush3.bf16.msra.mxu0 %v5531_v8 }
0x1ad2   :  { %5169 = vmatprep.subr.bf16.mxu0 %v5650_v44 }
0x1b5c   :  { %v2736_v45 = vpop.xlane.xlu1 %2735 }
0x1b5d   :  { %v2740_v46 = vsub.f32 %v2732_v12, %v2736_v45 }
0x1b5e   :  { %v2739_v47 = vpop.xlane.xlu0 %2738 }
0x1b5f   :  { %v2742_v48 = vmul.f32 1.442695, %v2740_v46  ;;  %v2741_v51 = vsub.f32 %v2733_v24, %v2739_v47 }
0x1b61   :  { %v2744_v52 = vmul.f32 1.442695, %v2741_v51  ;;  %5596 = vpow2.f32 %v2742_v48 }
0x1b63   :  { %5598 = vpow2.f32 %v2744_v52 }
0x1b6b   :  { %v5597_v0 = vpop.eup %5596 }
0x1b6d   :  { %v5599_v3 = vpop.eup %5598 }
0x1b6e   :  { %v2746_v2 = vpack.c.bf16 %v5599_v3, %v5597_v0 }
0x1b70   :  { %5139 = vmatmul.mubr.msk.bf16.vlgmr.msra.gmra.mrb[76].mxu1 %vm270_vm0, %v2746_v2 }
0x1b71   :  { %5371 = vmatpush3.bf16.msra.mxu1 %v6381_v41  ;;  %5158 = vmatprep.mubr.msk.f32.mxu1 %vm270_vm0, %v5597_v0 }
0x1b72   :  { %5373 = vmatprep.subr.bf16.mxu1 %v6386_v5 }
0x1b75   :  { %5375 = vmatpush3.bf16.msra.mxu1 %v6386_v5 }
0x1b76   :  { %5377 = vmatprep.subr.bf16.mxu1 %v6394_v6 }
0x1b79   :  { %5379 = vmatpush3.bf16.msra.mxu1 %v6394_v6 }
0x1b7a   :  { %5381 = vmatprep.subr.bf16.mxu1 %v6400_v60 }
0x1b7d   :  { %5383 = vmatpush3.bf16.msra.mxu1 %v6400_v60 }
0x1b7e   :  { %5177 = vmatprep.subr.bf16.mxu1 %v5650_v44 }
0x1b80   :  { %5159 = vmatmul.mubr.msk.f32.vlgmr.msra.gmra.mrb[80].mxu1 %vm270_vm0, %v5599_v3 }
0x1b81   :  { %5181 = vmatprep.mubr.msk.bf16.mxu1 %vm5651_vm4, %v5650_v44 }
0x1c43   :  { %v2788_v7 = vpop.f32.mrb[76].mxu1 }
0x1c44   :  { %v5140_v33 = vpop.f32.mrb[77].mxu1 }
0x1c45   :  { %v2791_v55 = vpop.f32.mrb[78].mxu1 }
0x1c46   :  { %v5141_v12 = vpop.f32.mrb[79].mxu1 }
0x1c53   :  { %v5160_v16 = vpop.f32.mrb[80].mxu1 }
0x1c54   :  { %v2877_v24 = vmax.f32 %v5160_v16, 1e-30  ;;  %v2867_v18 = vpop.f32.mrb[81].mxu1 }
0x1c55   :  { %v2876_v25 = vmax.f32 %v2867_v18, 1e-30 }
0x1c56   :  { %5600 = vrcp.f32 %v2877_v24 }
0x1c57   :  { %5602 = vrcp.f32 %v2876_v25 }
0x1c60   :  { %v5601_v26 = vpop.eup %5600 }
0x1c61   :  { %v5603_v4 = vpop.eup %5602  ;;  %v2881_v43 = vmul.f32 %v5601_v26, %v2791_v55 }
0x1c62   :  { %v2880_v9 = vmul.f32 %v5603_v4, %v2788_v7 }
0x1c64   :  { %v2886_v21 = vpack.c.bf16 %v2881_v43, %v2880_v9  ;;  %v6452_v9 = vld [vmem:[%s6449_s19] sm:$0x3f] }
0x1c66   :  { %5166 = vmatmul.mubr.msk.bf16.vlgmr.msra.gmra.mrb[56].mxu0 %vm413_vm2, %v2886_v21 }
0x1c67   :  { %5170 = vmatpush3.bf16.msra.mxu0 %v5532_v10  ;;  %5173 = vmatprep.mubr.msk.bf16.mxu0 %vm5651_vm4, %v5650_v44  ;;  %v2983_v10 = vrot.slane %v6452_v9, %v5763_v54 }
0x1c68   :  { %5171 = vmatprep.subr.bf16.mxu0 %v5650_v44 }
0x1c6b   :  { %5172 = vmatpush3.bf16.msra.mxu0 %v5533_v23 }
0x1c6c   :  { %5185 = vmatprep.subr.bf16.mxu0 %v5650_v44 }
0x1c6e   :  { %5174 = vmatmul.mubr.msk.bf16.vlgmr.msra.gmra.mrb[60].mxu0 %vm413_vm2, %v6314_v63 }
0x1c6f   :  { %5193 = vmatprep.mubr.msk.bf16.mxu0 %vm5651_vm4, %v5650_v44 }
0x1d39   :  { %v2936_v39 = vpop.f32.mrb[56].mxu0 }
0x1d3a   :  { %v2943_v27 = vadd.f32 %v2936_v39, %v6215_v34  ;;  %v5167_v29 = vpop.f32.mrb[57].mxu0  ;;  %v2989_v39 = vrot.slane %v6452_v9, %v5771_v59 }
0x1d3b   :  { %v2939_v35 = vpop.f32.mrb[58].mxu0 }
0x1d3c   :  { %v2944_v38 = vadd.f32 %v2939_v35, %v6217_v49  ;;  %v5168_v40 = vpop.f32.mrb[59].mxu0  ;;  %v2952_v45 = vadd.f32 %v4533_v56, %v2943_v27 }
0x1d3d   :  { %v4537_v40 = vld [vmem:[%s6457_s23] ss:$0 sm:$0xff] }
0x1d3e   :  { %v2954_v46 = vsel %vm413_vm2, %v2952_v45, 0.0  ;;  %v2953_v47 = vadd.f32 %v4533_v56, %v2944_v38 }
0x1d3f   :  { %2955 = vadd.xlane.f32.xlu0 %v2954_v46 }
0x1d40   :  { %v2957_v48 = vsel %vm413_vm2, %v2953_v47, 0.0 }
0x1d41   :  { %2958 = vadd.xlane.f32.xlu1 %v2957_v48  ;;  %v3046_v51 = vpop.f32.mrb[60].mxu0 }
0x1d42   :  { %v5175_v52 = vpop.f32.mrb[61].mxu0 }
0x1d43   :  { %v3049_v0 = vpop.f32.mrb[62].mxu0 }
0x1d44   :  { %v5176_v3 = vpop.f32.mrb[63].mxu0 }
0x1dcc   :  { %v2956_v2 = vpop.xlane.xlu0 %2955 }
0x1dcd   :  { %v2960_v1 = vmul.f32 0.03125, %v2956_v2 }
0x1dce   :  { %v2959_v34 = vpop.xlane.xlu1 %2958 }
0x1dcf   :  { %v2962_v8 = vsub.f32 %v2952_v45, %v2960_v1  ;;  %v2961_v7 = vmul.f32 0.03125, %v2959_v34 }
0x1dd1   :  { %v2963_v33 = vsub.f32 %v2953_v47, %v2961_v7  ;;  %v2964_v49 = vmul.f32 %v2962_v8, %v2962_v8 }
0x1dd3   :  { %v2966_v55 = vsel %vm413_vm2, %v2964_v49, 0.0  ;;  %v2965_v12 = vmul.f32 %v2963_v33, %v2963_v33 }
0x1dd4   :  { %2967 = vadd.xlane.f32.xlu0 %v2966_v55 }
0x1dd5   :  { %v2969_v16 = vsel %vm413_vm2, %v2965_v12, 0.0 }
0x1dd6   :  { %2970 = vadd.xlane.f32.xlu1 %v2969_v16  ;;  %v5534_v16 = vld [vmem:[%s6471_s30] sm:$0xff]  }
0x1dd7   :  { %5178 = vmatpush3.bf16.msra.mxu1 %v5534_v16 }
0x1dd8   :  { %5179 = vmatprep.subr.bf16.mxu1 %v5650_v44 }
0x1e61   :  { %v2968_v24 = vpop.xlane.xlu0 %2967 }
0x1e62   :  { %v2972_v18 = vmul.f32 0.03125, %v2968_v24  ;;  %v5535_v24 = vld [vmem:[%s6471_s30 + $0x8] sm:$0xff]  }
0x1e63   :  { %v2971_v25 = vpop.xlane.xlu1 %2970  ;;  %5180 = vmatpush3.bf16.msra.mxu1 %v5535_v24 }
0x1e64   :  { %v2974_v26 = vadd.f32 1e-05, %v2972_v18  ;;  %v2973_v4 = vmul.f32 0.03125, %v2971_v25  ;;  %5197 = vmatprep.subr.bf16.mxu1 %v5650_v44 }
0x1e66   :  { %5604 = vrsqrt.f32 %v2974_v26  ;;  %v2975_v43 = vadd.f32 1e-05, %v2973_v4 }
0x1e68   :  { %5606 = vrsqrt.f32 %v2975_v43 }
0x1e70   :  { %v5605_v21 = vpop.eup %5604 }
0x1e71   :  { %v2978_v23 = vmul.f32 %v5605_v21, %v2962_v8  ;;  %v3093_v21 = vrot.slane %v6452_v9, %v5970_v58 }
0x1e72   :  { %v5607_v56 = vpop.eup %5606 }
0x1e73   :  { %v2984_v27 = vmul.f32 %v2983_v10, %v2978_v23  ;;  %v2979_v29 = vmul.f32 %v5607_v56, %v2963_v33 }
0x1e75   :  { %v2990_v35 = vadd.f32 %v2989_v39, %v2984_v27  ;;  %v2985_v38 = vmul.f32 %v2983_v10, %v2979_v29 }
0x1e77   :  { %v3053_v45 = vadd.f32 %v3046_v51, %v2990_v35  ;;  %v2991_v46 = vadd.f32 %v2989_v39, %v2985_v38  ;;  %v3099_v35 = vrot.slane %v6452_v9, %v5975_v61 }
0x1e79   :  { %v3062_v47 = vadd.f32 %v4537_v40, %v3053_v45  ;;  %v3054_v48 = vadd.f32 %v3049_v0, %v2991_v46 }
0x1e7b   :  { %v3064_v52 = vsel %vm413_vm2, %v3062_v47, 0.0  ;;  %v3063_v3 = vadd.f32 %v4537_v40, %v3054_v48  ;;  %v5537_v48 = vld [vmem:[%s6487_s7 + $0x8] sm:$0xff]  }
0x1e7c   :  { %3065 = vadd.xlane.f32.xlu0 %v3064_v52  ;;  %v5538_v52 = vld [vmem:[%s6487_s7 + $0x10] sm:$0xff]  }
0x1e7d   :  { %v3067_v2 = vsel %vm413_vm2, %v3063_v3, 0.0 }
0x1e7e   :  { %3068 = vadd.xlane.f32.xlu1 %v3067_v2  ;;  %v4538_v2 = vld [vmem:[%s6499_s12] ss:$0 sm:$0xff] }
0x1f09   :  { %v3066_v1 = vpop.xlane.xlu0 %3065 }
0x1f0a   :  { %v3070_v34 = vmul.f32 0.03125, %v3066_v1 }
0x1f0b   :  { %v3069_v8 = vpop.xlane.xlu1 %3068 }
0x1f0c   :  { %v3072_v7 = vsub.f32 %v3062_v47, %v3070_v34  ;;  %v3071_v49 = vmul.f32 0.03125, %v3069_v8  ;;  %v5536_v47 = vld [vmem:[%s6487_s7] sm:$0xff]  }
0x1f0d   :  { %5186 = vmatpush3.bf16.msra.mxu0 %v5536_v47 }
0x1f0e   :  { %v3073_v33 = vsub.f32 %v3063_v3, %v3071_v49  ;;  %v3074_v55 = vmul.f32 %v3072_v7, %v3072_v7  ;;  %5187 = vmatprep.subr.bf16.mxu0 %v5650_v44  ;;  %v5539_v3 = vld [vmem:[%s6487_s7 + $0x18] sm:$0xff]  }
0x1f10   :  { %v3076_v12 = vsel %vm413_vm2, %v3074_v55, 0.0  ;;  %v3075_v51 = vmul.f32 %v3073_v33, %v3073_v33 }
0x1f11   :  { %3077 = vadd.xlane.f32.xlu0 %v3076_v12  ;;  %5188 = vmatpush3.bf16.msra.mxu0 %v5537_v48 }
0x1f12   :  { %v3079_v0 = vsel %vm413_vm2, %v3075_v51, 0.0  ;;  %5189 = vmatprep.subr.bf16.mxu0 %v5650_v44 }
0x1f13   :  { %3080 = vadd.xlane.f32.xlu1 %v3079_v0 }
0x1f15   :  { %5190 = vmatpush3.bf16.msra.mxu0 %v5538_v52 }
0x1f16   :  { %5191 = vmatprep.subr.bf16.mxu0 %v5650_v44 }
0x1f19   :  { %5192 = vmatpush3.bf16.msra.mxu0 %v5539_v3 }
0x1f9e   :  { %v3078_v18 = vpop.xlane.xlu0 %3077 }
0x1f9f   :  { %v3082_v25 = vmul.f32 0.03125, %v3078_v18 }
0x1fa0   :  { %v3081_v26 = vpop.xlane.xlu1 %3080 }
0x1fa1   :  { %v3084_v4 = vadd.f32 1e-05, %v3082_v25  ;;  %v3083_v43 = vmul.f32 0.03125, %v3081_v26 }
0x1fa3   :  { %5608 = vrsqrt.f32 %v3084_v4  ;;  %v3085_v10 = vadd.f32 1e-05, %v3083_v43 }
0x1fa5   :  { %5610 = vrsqrt.f32 %v3085_v10 }
0x1fad   :  { %v5609_v23 = vpop.eup %5608 }
0x1fae   :  { %v3088_v39 = vmul.f32 %v5609_v23, %v3072_v7 }
0x1faf   :  { %v5611_v56 = vpop.eup %5610 }
0x1fb0   :  { %v3094_v27 = vmul.f32 %v3093_v21, %v3088_v39  ;;  %v3089_v29 = vmul.f32 %v5611_v56, %v3073_v33 }
0x1fb2   :  { %v3095_v38 = vmul.f32 %v3093_v21, %v3089_v29  ;;  %v3100_v40 = vadd.f32 %v3099_v35, %v3094_v27 }
0x1fb4   :  { %v3101_v45 = vadd.f32 %v3099_v35, %v3095_v38 }
0x1fb6   :  { %v3106_v46 = vpack.c.bf16 %v3101_v45, %v3100_v40 }
0x1fb8   :  { %5182 = vmatmul.mubr.msk.bf16.vlgmr.msra.gmra.mrb[84].mxu1 %vm413_vm2, %v3106_v46  ;;  %v4547_v46 = vld [vmem:[%s6508_s29] ss:$0 sm:$0xff] }
0x1fb9   :  { %5201 = vmatprep.mubr.msk.bf16.mxu1 %vm5651_vm4, %v5650_v44 }
0x208b   :  { %v3163_v1 = vpop.f32.mrb[84].mxu1 }
0x208c   :  { %v3164_v34 = vadd.f32 %v4538_v2, %v3163_v1  ;;  %v5183_v8 = vpop.f32.mrb[85].mxu1 }
0x208d   :  { %v3166_v7 = vpop.f32.mrb[86].mxu1 }
0x208e   :  { %v3170_v49 = vmul.f32 %v3164_v34, %v3164_v34  ;;  %v3167_v33 = vadd.f32 %v4538_v2, %v3166_v7  ;;  %v5184_v55 = vpop.f32.mrb[87].mxu1 }
0x2090   :  { %v3172_v12 = vmul.f32 %v3170_v49, %v3164_v34  ;;  %v3171_v51 = vmul.f32 %v3167_v33, %v3167_v33 }
0x2092   :  { %v3174_v0 = vmul.f32 0.044715, %v3172_v12  ;;  %v3173_v16 = vmul.f32 %v3171_v51, %v3167_v33 }
0x2094   :  { %v3176_v24 = vadd.f32 %v3174_v0, %v3164_v34  ;;  %v3175_v18 = vmul.f32 0.044715, %v3173_v16 }
0x2096   :  { %v3178_v25 = vmul.f32 0.7978846, %v3176_v24  ;;  %v3177_v26 = vadd.f32 %v3175_v18, %v3167_v33  ;;  %v5540_v18 = vld [vmem:[%s6198_s26 + $0x10] sm:$0xff]  }
0x2097   :  { %5198 = vmatpush3.bf16.msra.mxu1 %v5540_v18 }
0x2098   :  { %5612 = vtanh.f32 %v3178_v25  ;;  %v3179_v4 = vmul.f32 0.7978846, %v3177_v26  ;;  %5199 = vmatprep.subr.bf16.mxu1 %v5650_v44  ;;  %v5541_v25 = vld [vmem:[%s6198_s26 + $0x18] sm:$0xff]  }
0x209a   :  { %5614 = vtanh.f32 %v3179_v4 }
0x209b   :  { %5200 = vmatpush3.bf16.msra.mxu1 %v5541_v25 }
0x20a2   :  { %v5613_v43 = vpop.eup %5612 }
0x20a3   :  { %v3182_v10 = vadd.f32 1.0, %v5613_v43 }
0x20a4   :  { %v5615_v21 = vpop.eup %5614 }
0x20a5   :  { %v3184_v23 = vmul.f32 0.5, %v3182_v10  ;;  %v3183_v39 = vadd.f32 1.0, %v5615_v21 }
0x20a7   :  { %v3185_v56 = vmul.f32 0.5, %v3183_v39  ;;  %v3186_v27 = vmul.f32 %v3184_v23, %v3164_v34  ;;  %v3304_v39 = vsub.s32 4, %v5760_v53 }
0x20a9   :  { %v3187_v29 = vmul.f32 %v3185_v56, %v3167_v33  ;;  %v3305_v56 = vrot.slane %v6452_v9, %v3304_v39 }
0x20ab   :  { %v3196_v35 = vpack.c.bf16 %v3187_v29, %v3186_v27  ;;  %v3310_v27 = vsub.s32 5, %v5760_v53 }
0x20ad   :  { %5194 = vmatmul.mubr.msk.bf16.vlgmr.msra.gmra.mrb[64].mxu0 %vm270_vm0, %v3196_v35 }
0x20ae   :  { %5225 = vmatprep.mubr.msk.f32.mxu0 %vm2412_vm13, %v6243_v50 }
0x2180   :  { %v3258_v38 = vpop.f32.mrb[64].mxu0 }
0x2181   :  { %v3265_v47 = vadd.f32 %v3258_v38, %v3100_v40  ;;  %v5195_v48 = vpop.f32.mrb[65].mxu0 }
0x2182   :  { %v3261_v52 = vpop.f32.mrb[66].mxu0  ;;  %v3311_v48 = vrot.slane %v6452_v9, %v3310_v27 }
0x2183   :  { %v3266_v3 = vadd.f32 %v3261_v52, %v3101_v45  ;;  %v5196_v2 = vpop.f32.mrb[67].mxu0  ;;  %v3274_v1 = vadd.f32 %v4547_v46, %v3265_v47 }
0x2185   :  { %v3276_v34 = vsel %vm413_vm2, %v3274_v1, 0.0  ;;  %v3275_v8 = vadd.f32 %v4547_v46, %v3266_v3 }
0x2186   :  { %3277 = vadd.xlane.f32.xlu0 %v3276_v34  ;;  %v4554_v34 = vld [vmem:[%s6232_s17 + $0x1] ss:$0 sm:$0xff] }
0x2187   :  { %v3279_v7 = vsel %vm413_vm2, %v3275_v8, 0.0 }
0x2188   :  { %3280 = vadd.xlane.f32.xlu1 %v3279_v7 }
0x2213   :  { %v3278_v49 = vpop.xlane.xlu0 %3277 }
0x2214   :  { %v3282_v33 = vmul.f32 0.03125, %v3278_v49 }
0x2215   :  { %v3281_v55 = vpop.xlane.xlu1 %3280 }
0x2216   :  { %v3284_v12 = vsub.f32 %v3274_v1, %v3282_v33  ;;  %v3283_v51 = vmul.f32 0.03125, %v3281_v55 }
0x2218   :  { %v3285_v40 = vsub.f32 %v3275_v8, %v3283_v51  ;;  %v3286_v0 = vmul.f32 %v3284_v12, %v3284_v12 }
0x221a   :  { %v3288_v45 = vsel %vm413_vm2, %v3286_v0, 0.0  ;;  %v3287_v16 = vmul.f32 %v3285_v40, %v3285_v40 }
0x221b   :  { %3289 = vadd.xlane.f32.xlu0 %v3288_v45 }
0x221c   :  { %v3291_v24 = vsel %vm413_vm2, %v3287_v16, 0.0 }
0x221d   :  { %3292 = vadd.xlane.f32.xlu1 %v3291_v24 }
0x22a8   :  { %v3290_v26 = vpop.xlane.xlu0 %3289 }
0x22a9   :  { %v3294_v4 = vmul.f32 0.03125, %v3290_v26 }
0x22aa   :  { %v3293_v43 = vpop.xlane.xlu1 %3292 }
0x22ab   :  { %v3296_v10 = vadd.f32 1e-05, %v3294_v4  ;;  %v3295_v21 = vmul.f32 0.03125, %v3293_v43 }
0x22ad   :  { %5616 = vrsqrt.f32 %v3296_v10  ;;  %v3297_v23 = vadd.f32 1e-05, %v3295_v21 }
0x22af   :  { %5618 = vrsqrt.f32 %v3297_v23 }
0x22b7   :  { %v5617_v29 = vpop.eup %5616 }
0x22b8   :  { %v3300_v35 = vmul.f32 %v5617_v29, %v3284_v12 }
0x22b9   :  { %v5619_v38 = vpop.eup %5618 }
0x22ba   :  { %v3306_v46 = vmul.f32 %v3305_v56, %v3300_v35  ;;  %v3301_v47 = vmul.f32 %v5619_v38, %v3285_v40 }
0x22bc   :  { %v3307_v52 = vmul.f32 %v3305_v56, %v3301_v47  ;;  %v6526_v3 = vadd.f32 %v3311_v48, %v3306_v46 }
0x22be   :  { %v6528_v2 = vadd.f32 %v3311_v48, %v3307_v52 }
0x22c0   :  { %v3321_v1 = vpack.c.bf16 %v6528_v2, %v6526_v3 }
0x22c2   :  { %5202 = vmatmul.mubr.msk.bf16.vlgmr.msra.gmra.mrb[88].mxu1 %vm413_vm2, %v3321_v1 }
0x22c3   :  { %5209 = vmatprep.mubr.msk.f32.mxu1 %vm2412_vm13, %v6243_v50 }
0x2395   :  { %v3379_v8 = vpop.f32.mrb[88].mxu1 }
0x2396   :  { %v5203_v7 = vpop.f32.mrb[89].mxu1  ;;  %v6536_v33 = vadd.f32 %v4554_v34, %v3379_v8 }
0x2397   :  { %v3382_v49 = vpop.f32.mrb[90].mxu1 }
0x2398   :  { %v6538_v9 = vadd.f32 %v4554_v34, %v3382_v49  ;;  %v5204_v55 = vpop.f32.mrb[91].mxu1 }
0x239a   :  { %v3626_v12 = vpack.c.bf16 %v6538_v9, %v6536_v33  ;;  %v5489_v51 = vpack.i.bf16 %v6538_v9, %v6536_v33 }
0x239c   :  { %5490 = vrot.lane.b32.xlu1 %v5489_v51, %s5655_s4  ;;  %5485 = vrot.lane.b32.xlu0 %v5489_v51, %s5656_s5  ;;  %s5687_s4 = smov 37  }
0x239d   :  { %s4385_s17 = sld [smem:[%s6707_s0 + %s5687_s4]]  }
0x240e   :  { %v5491_v50 = vpop.permute.xlu1 %5490  ;;  %v5486_v40 = vpop.permute.xlu0 %5485 }
0x240f   :  { %v5493_v0 = vunpack.i.h.bf16 %v5491_v50  ;;  %v5492_v45 = vunpack.i.l.bf16 %v5491_v50  ;;  %v5488_v16 = vunpack.i.h.bf16 %v5486_v40  ;;  %v5487_v24 = vunpack.i.l.bf16 %v5486_v40 }
0x2411   :  { %v5388_v18 = vpack.c.bf16 %v5493_v0, %v5492_v45  ;;  %v5384_v25 = vpack.c.bf16 %v5488_v16, %v5487_v24 }
0x2413   :  { %5385 = vmatprep.subr.bf16.mxu1 %v5384_v25  ;;  %5389 = vmatprep.subr.bf16.mxu0 %v5388_v18 }
0x2414   :  { %5387 = vmatpush3.bf16.msra.mxu1 %v5384_v25  ;;  %5391 = vmatpush3.bf16.msra.mxu0 %v5388_v18 }
0x2415   :  { %5237 = vmatprep.subr.bf16.mxu1 %v5650_v44  ;;  %5249 = vmatprep.subr.bf16.mxu0 %v5650_v44 }
0x2417   :  { %5210 = vmatmul.mubr.msk.f32.vlgmr.msra.gmra.mrb[82].mxu1 %vm2412_vm13, %v6260_v19  ;;  %5226 = vmatmul.mubr.msk.f32.vlgmr.msra.gmra.mrb[50].mxu0 %vm2412_vm13, %v6260_v19 }
0x2418   :  { %5212 = vmatprep.mubr.msk.f32.mxu1 %vm2412_vm13, %v6263_v11  ;;  %5228 = vmatprep.mubr.msk.f32.mxu0 %vm2412_vm13, %v6263_v11 }
0x241b   :  { %5213 = vmatmul.mubr.msk.f32.gmra.mrb[92].mxu1 %vm2412_vm13, %v6274_v13  ;;  %5229 = vmatmul.mubr.msk.f32.gmra.mrb[68].mxu0 %vm2412_vm13, %v6274_v13 }
0x241c   :  { %5215 = vmatprep.mubr.msk.f32.mxu1 %vm2412_vm13, %v6279_v14  ;;  %5231 = vmatprep.mubr.msk.f32.mxu0 %vm2412_vm13, %v6279_v14 }
0x241f   :  { %5216 = vmatmul.mubr.msk.f32.gmra.mrb[94].mxu1 %vm2412_vm13, %v6288_v15  ;;  %5232 = vmatmul.mubr.msk.f32.gmra.mrb[70].mxu0 %vm2412_vm13, %v6288_v15 }
0x2420   :  { %5218 = vmatprep.mubr.msk.f32.mxu1 %vm2412_vm13, %v6293_v20  ;;  %5234 = vmatprep.mubr.msk.f32.mxu0 %vm2412_vm13, %v6293_v20 }
0x2423   :  { %5219 = vmatmul.mubr.msk.f32.gmra.mrb[96].mxu1 %vm2412_vm13, %v6302_v57  ;;  %5235 = vmatmul.mubr.msk.f32.gmra.mrb[72].mxu0 %vm2412_vm13, %v6302_v57 }
0x2424   :  { %5245 = vmatprep.mubr.msk.bf16.mxu1 %vm5651_vm4, %v5650_v44  ;;  %5257 = vmatprep.mubr.msk.bf16.mxu0 %vm5651_vm4, %v5650_v44 }
0x24ea   :  { %v5211_v19 = vpop.f32.mrb[82].mxu1  ;;  %v5227_v7 = vpop.f32.mrb[50].mxu0 }
0x24eb   :  { %v3500_v11 = vmul.f32 %v5211_v19, %v6319_v28  ;;  %v3460_v13 = vpop.f32.mrb[83].mxu1  ;;  %v3619_v49 = vmul.f32 %v5227_v7, %v6319_v28  ;;  %v3579_v55 = vpop.f32.mrb[51].mxu0 }
0x24ec   :  { %v3499_v14 = vmul.f32 %v3460_v13, %v6321_v22  ;;  %v3618_v51 = vmul.f32 %v3579_v55, %v6321_v22 }
0x24ee   :  { %v3627_v15 = vpack.c.bf16 %v3500_v11, %v3499_v14  ;;  %v5214_v20 = vpop.f32.mrb[92].mxu1  ;;  %v3704_v50 = vpack.c.bf16 %v3619_v49, %v3618_v51  ;;  %v5230_v22 = vpop.f32.mrb[68].mxu0 }
0x24ef   :  { %v3502_v26 = vmul.f32 %v5214_v20, %v6325_v42  ;;  %v3470_v4 = vpop.f32.mrb[93].mxu1  ;;  %v3589_v25 = vpop.f32.mrb[69].mxu0  ;;  %v3621_v19 = vmul.f32 %v5230_v22, %v6325_v42 }
0x24f0   :  { %v3635_v43 = vsel %vm413_vm2, %v3627_v15, 0  ;;  %v3501_v57 = vmul.f32 %v3470_v4, %v6327_v17  ;;  %5250 = vmatpush3.bf16.msra.mxu0 %v3704_v50  ;;  %v3620_v11 = vmul.f32 %v3589_v25, %v6327_v17 }
0x24f1   :  { %5238 = vmatpush3.bf16.xpose.msra.mxu1 %v3635_v43  ;;  %5251 = vmatprep.subr.bf16.mxu0 %v5650_v44 }
0x24f2   :  { %v3628_v10 = vpack.c.bf16 %v3502_v26, %v3501_v57  ;;  %5239 = vmatprep.subr.bf16.mxu1 %v5650_v44  ;;  %v5217_v21 = vpop.f32.mrb[94].mxu1  ;;  %v3705_v13 = vpack.c.bf16 %v3621_v19, %v3620_v11  ;;  %v5233_v14 = vpop.f32.mrb[70].mxu0 }
0x24f3   :  { %v3504_v23 = vmul.f32 %v5217_v21, %v6332_v31  ;;  %v3480_v56 = vpop.f32.mrb[95].mxu1  ;;  %v3599_v15 = vpop.f32.mrb[71].mxu0  ;;  %v3623_v20 = vmul.f32 %v5233_v14, %v6332_v31 }
0x24f4   :  { %v3503_v29 = vmul.f32 %v3480_v56, %v6334_v30  ;;  %v3638_v35 = vsel %vm413_vm2, %v3628_v10, 0  ;;  %5252 = vmatpush3.bf16.msra.mxu0 %v3705_v13 }
0x24f5   :  { %5253 = vmatprep.subr.bf16.mxu0 %v5650_v44 }
0x24f6   :  { %v3629_v38 = vpack.c.bf16 %v3504_v23, %v3503_v29  ;;  %v5220_v46 = vpop.f32.mrb[96].mxu1  ;;  %v5236_v26 = vpop.f32.mrb[72].mxu0  ;;  %v5542_v29 = vld [vmem:[%s6418_s13 + $0x10] sm:$0xff]  }
0x24f7   :  { %v3506_v47 = vmul.f32 %v5220_v46, %v6339_v36  ;;  %v3490_v48 = vpop.f32.mrb[97].mxu1  ;;  %v3609_v4 = vpop.f32.mrb[73].mxu0  ;;  %v3625_v43 = vmul.f32 %v5236_v26, %v6339_v36 }
0x24f8   :  { %v3505_v52 = vmul.f32 %v3490_v48, %v6341_v37  ;;  %v3641_v34 = vsel %vm413_vm2, %v3629_v38, 0  ;;  %v3624_v57 = vmul.f32 %v3609_v4, %v6341_v37 }
0x24f9   :  { %5240 = vmatpush3.bf16.xpose.msra.mxu1 %v3638_v35 }
0x24fa   :  { %5241 = vmatprep.subr.bf16.mxu1 %v5650_v44  ;;  %v3630_v1 = vpack.c.bf16 %v3506_v47, %v3505_v52  ;;  %v3707_v42 = vpack.c.bf16 %v3625_v43, %v3624_v57 }
0x24fc   :  { %v3644_v8 = vsel %vm413_vm2, %v3630_v1, 0 }
0x2501   :  { %5242 = vmatpush3.bf16.xpose.msra.mxu1 %v3641_v34 }
0x2502   :  { %5243 = vmatprep.subr.bf16.mxu1 %v5650_v44 }
0x2509   :  { %5244 = vmatpush3.bf16.xpose.msra.mxu1 %v3644_v8 }
0x250a   :  { %5280 = vmatprep.subr.bf16.mxu1 %v5650_v44 }
0x2510   :  { %5246 = vmatmul.mubr.msk.bf16.vlgmr.msra.gmra.mrb[100].mxu1 %vm413_vm2, %v3626_v12 }
0x2511   :  { %5284 = vmatprep.mubr.msk.bf16.mxu1 %vm5651_vm4, %v5650_v44 }
0x25e3   :  { %v3680_v40 = vpop.f32.mrb[100].mxu1 }
0x25e4   :  { %v3687_v0 = vmul.f32 0.35355338, %v3680_v40  ;;  %v5247_v45 = vpop.f32.mrb[101].mxu1 }
0x25e5   :  { %v3683_v16 = vpop.f32.mrb[102].mxu1  ;;  %v4586_v45 = vld [vmem:[%s6437_s25 + $0x1] ss:$0 sm:$0xff] }
0x25e6   :  { %v3688_v33 = vmul.f32 0.35355338, %v3683_v16  ;;  %v5248_v9 = vpop.f32.mrb[103].mxu1  ;;  %v3689_v12 = vadd.f32 %v3687_v0, %v6363_v62  ;;  %v3622_v62 = vmul.f32 %v3599_v15, %v6334_v30 }
0x25e8   :  { %v3691_v24 = vsel %vm270_vm0, %v3689_v12, -inf  ;;  %v3690_v18 = vadd.f32 %v3688_v33, %v6365_v32  ;;  %v3706_v32 = vpack.c.bf16 %v3623_v20, %v3622_v62 }
0x25e9   :  { %3692 = vmax.xlane.f32.xlu1 %v3691_v24 }
0x25ea   :  { %v3694_v28 = vsel %vm270_vm0, %v3690_v18, -inf  ;;  %5254 = vmatpush3.bf16.msra.mxu0 %v3706_v32 }
0x25eb   :  { %3695 = vmax.xlane.f32.xlu0 %v3694_v28  ;;  %5255 = vmatprep.subr.bf16.mxu0 %v5650_v44 }
0x25ee   :  { %5256 = vmatpush3.bf16.msra.mxu0 %v3707_v42 }
0x25ef   :  { %5393 = vmatprep.subr.bf16.mxu0 %v6381_v41 }
0x2676   :  { %v3693_v17 = vpop.xlane.xlu1 %3692 }
0x2677   :  { %v3697_v31 = vsub.f32 %v3689_v12, %v3693_v17 }
0x2678   :  { %v3696_v30 = vpop.xlane.xlu0 %3695 }
0x2679   :  { %v3699_v10 = vmul.f32 1.442695, %v3697_v31  ;;  %v3698_v21 = vsub.f32 %v3690_v18, %v3696_v30  ;;  %v6654_v31 = vld [vmem:[%s6449_s19 + $0x8] sm:$0x3f] }
0x267a   :  { %v3942_v30 = vrot.slane %v6654_v31, %v5763_v54 }
0x267b   :  { %v3701_v23 = vmul.f32 1.442695, %v3698_v21  ;;  %5620 = vpow2.f32 %v3699_v10 }
0x267d   :  { %5622 = vpow2.f32 %v3701_v23  ;;  %v3948_v23 = vrot.slane %v6654_v31, %v5771_v59 }
0x2685   :  { %v5621_v56 = vpop.eup %5620 }
0x2687   :  { %v5623_v36 = vpop.eup %5622 }
0x2688   :  { %v3703_v37 = vpack.c.bf16 %v5623_v36, %v5621_v56 }
0x268a   :  { %5258 = vmatmul.mubr.msk.bf16.vlgmr.msra.gmra.mrb[76].mxu0 %vm270_vm0, %v3703_v37 }
0x268b   :  { %5395 = vmatpush3.bf16.msra.mxu0 %v6381_v41  ;;  %5277 = vmatprep.mubr.msk.f32.mxu0 %vm270_vm0, %v5621_v56  ;;  %v5543_v41 = vld [vmem:[%s6418_s13 + $0x18] sm:$0xff]  }
0x268c   :  { %5397 = vmatprep.subr.bf16.mxu0 %v6386_v5 }
0x268f   :  { %5399 = vmatpush3.bf16.msra.mxu0 %v6386_v5  ;;  %v5544_v5 = vld [vmem:[%s6412_s9 + $0x10] sm:$0xff]  }
0x2690   :  { %5401 = vmatprep.subr.bf16.mxu0 %v6394_v6  ;;  %5281 = vmatpush3.bf16.msra.mxu1 %v5544_v5  ;;  %v4595_v5 = vld [vmem:[%s6457_s23 + $0x1] ss:$0 sm:$0xff] }
0x2691   :  { %5282 = vmatprep.subr.bf16.mxu1 %v5650_v44 }
0x2693   :  { %5403 = vmatpush3.bf16.msra.mxu0 %v6394_v6  ;;  %v5545_v6 = vld [vmem:[%s6412_s9 + $0x18] sm:$0xff]   ;;  %s5688_s9 = smov 38  }
0x2694   :  { %5405 = vmatprep.subr.bf16.mxu0 %v6400_v60  ;;  %5283 = vmatpush3.bf16.msra.mxu1 %v5545_v6  ;;  %s4386_s3 = sld [smem:[%s6707_s0 + %s5688_s9]]  }
0x2695   :  { %5296 = vmatprep.subr.bf16.mxu1 %v5650_v44 }
0x2697   :  { %5407 = vmatpush3.bf16.msra.mxu0 %v6400_v60 }
0x2698   :  { %5288 = vmatprep.subr.bf16.mxu0 %v5650_v44 }
0x269a   :  { %5278 = vmatmul.mubr.msk.f32.vlgmr.msra.gmra.mrb[74].mxu0 %vm270_vm0, %v5623_v36 }
0x269b   :  { %5289 = vmatpush3.bf16.msra.mxu0 %v5542_v29  ;;  %5292 = vmatprep.mubr.msk.bf16.mxu0 %vm5651_vm4, %v5650_v44 }
0x269c   :  { %5290 = vmatprep.subr.bf16.mxu0 %v5650_v44 }
0x269f   :  { %5291 = vmatpush3.bf16.msra.mxu0 %v5543_v41 }
0x26a0   :  { %5304 = vmatprep.subr.bf16.mxu0 %v5650_v44 }
0x26a2   :  { %5293 = vmatmul.mubr.msk.bf16.vlgmr.msra.gmra.mrb[80].mxu0 %vm413_vm2, %v6314_v63 }
0x26a3   :  { %5312 = vmatprep.mubr.msk.bf16.mxu0 %vm5651_vm4, %v5650_v44 }
0x275d   :  { %v3745_v60 = vpop.f32.mrb[76].mxu0 }
0x275e   :  { %v5259_v35 = vpop.f32.mrb[77].mxu0 }
0x275f   :  { %v3748_v38 = vpop.f32.mrb[78].mxu0 }
0x2760   :  { %v5260_v46 = vpop.f32.mrb[79].mxu0 }
0x276d   :  { %v5279_v47 = vpop.f32.mrb[74].mxu0 }
0x276e   :  { %v3834_v48 = vmax.f32 %v5279_v47, 1e-30  ;;  %v3824_v52 = vpop.f32.mrb[75].mxu0 }
0x276f   :  { %v3833_v63 = vmax.f32 %v3824_v52, 1e-30 }
0x2770   :  { %5624 = vrcp.f32 %v3834_v48 }
0x2771   :  { %5626 = vrcp.f32 %v3833_v63 }
0x2775   :  { %v4002_v1 = vpop.f32.mrb[80].mxu0 }
0x2776   :  { %v5294_v34 = vpop.f32.mrb[81].mxu0 }
0x2777   :  { %v4005_v8 = vpop.f32.mrb[82].mxu0 }
0x2778   :  { %v5295_v7 = vpop.f32.mrb[83].mxu0 }
0x277a   :  { %v5625_v49 = vpop.eup %5624 }
0x277b   :  { %v5627_v55 = vpop.eup %5626  ;;  %v3838_v51 = vmul.f32 %v5625_v49, %v3748_v38 }
0x277c   :  { %v3837_v50 = vmul.f32 %v5627_v55, %v3745_v60 }
0x277e   :  { %v3844_v40 = vpack.c.bf16 %v3838_v51, %v3837_v50  ;;  %v5546_v51 = vld [vmem:[%s6471_s30 + $0x10] sm:$0xff]   ;;  %v5547_v50 = vld [vmem:[%s6471_s30 + $0x18] sm:$0xff]  }
0x2780   :  { %5285 = vmatmul.mubr.msk.bf16.vlgmr.msra.gmra.mrb[104].mxu1 %vm413_vm2, %v3844_v40 }
0x2781   :  { %5300 = vmatprep.mubr.msk.bf16.mxu1 %vm5651_vm4, %v5650_v44  ;;  %5297 = vmatpush3.bf16.msra.mxu1 %v5546_v51 }
0x2782   :  { %5298 = vmatprep.subr.bf16.mxu1 %v5650_v44 }
0x2785   :  { %5299 = vmatpush3.bf16.msra.mxu1 %v5547_v50 }
0x2786   :  { %5316 = vmatprep.subr.bf16.mxu1 %v5650_v44 }
0x2853   :  { %v3894_v0 = vpop.f32.mrb[104].mxu1 }
0x2854   :  { %v3901_v16 = vadd.f32 %v3894_v0, %v6526_v3  ;;  %v5286_v33 = vpop.f32.mrb[105].mxu1 }
0x2855   :  { %v3897_v9 = vpop.f32.mrb[106].mxu1 }
0x2856   :  { %v3902_v12 = vadd.f32 %v3897_v9, %v6528_v2  ;;  %v5287_v24 = vpop.f32.mrb[107].mxu1  ;;  %v3911_v18 = vadd.f32 %v4586_v45, %v3901_v16 }
0x2858   :  { %v3913_v28 = vsel %vm413_vm2, %v3911_v18, 0.0  ;;  %v3912_v22 = vadd.f32 %v4586_v45, %v3902_v12  ;;  %v4050_v12 = vrot.slane %v6654_v31, %v5970_v58  ;;  %v5548_v58 = vld [vmem:[%s6487_s7 + $0x20] sm:$0xff]  }
0x2859   :  { %3914 = vadd.xlane.f32.xlu0 %v3913_v28  ;;  %5305 = vmatpush3.bf16.msra.mxu0 %v5548_v58  ;;  %v4266_v58 = vrot.slane %v6654_v31, %v3304_v39  ;;  %v4620_v39 = vld [vmem:[%s4386_s3] ss:$0 sm:$0xff] }
0x285a   :  { %v3916_v25 = vsel %vm413_vm2, %v3912_v22, 0.0  ;;  %5306 = vmatprep.subr.bf16.mxu0 %v5650_v44 }
0x285b   :  { %3917 = vadd.xlane.f32.xlu1 %v3916_v25 }
0x28e6   :  { %v3915_v19 = vpop.xlane.xlu0 %3914 }
0x28e7   :  { %v3919_v11 = vmul.f32 0.03125, %v3915_v19  ;;  %v4056_v19 = vrot.slane %v6654_v31, %v5975_v61  ;;  %v5550_v61 = vld [vmem:[%s6487_s7 + $0x30] sm:$0xff]  }
0x28e8   :  { %v3918_v13 = vpop.xlane.xlu1 %3917 }
0x28e9   :  { %v3921_v14 = vsub.f32 %v3911_v18, %v3919_v11  ;;  %v3920_v15 = vmul.f32 0.03125, %v3918_v13 }
0x28eb   :  { %v3922_v3 = vsub.f32 %v3912_v22, %v3920_v15  ;;  %v3923_v20 = vmul.f32 %v3921_v14, %v3921_v14 }
0x28ed   :  { %v3925_v62 = vsel %vm413_vm2, %v3923_v20, 0.0  ;;  %v3924_v2 = vmul.f32 %v3922_v3, %v3922_v3  ;;  %v5551_v20 = vld [vmem:[%s6487_s7 + $0x38] sm:$0xff]  }
0x28ee   :  { %3926 = vadd.xlane.f32.xlu0 %v3925_v62  ;;  %v4601_v62 = vld [vmem:[%s6499_s12 + $0x1] ss:$0 sm:$0xff] }
0x28ef   :  { %v3928_v32 = vsel %vm413_vm2, %v3924_v2, 0.0 }
0x28f0   :  { %3929 = vadd.xlane.f32.xlu1 %v3928_v32 }
0x297b   :  { %v3927_v26 = vpop.xlane.xlu0 %3926 }
0x297c   :  { %v3931_v4 = vmul.f32 0.03125, %v3927_v26 }
0x297d   :  { %v3930_v43 = vpop.xlane.xlu1 %3929 }
0x297e   :  { %v3933_v57 = vadd.f32 1e-05, %v3931_v4  ;;  %v3932_v42 = vmul.f32 0.03125, %v3930_v43 }
0x2980   :  { %5628 = vrsqrt.f32 %v3933_v57  ;;  %v3934_v17 = vadd.f32 1e-05, %v3932_v42 }
0x2982   :  { %5630 = vrsqrt.f32 %v3934_v17 }
0x298a   :  { %v5629_v10 = vpop.eup %5628 }
0x298b   :  { %v3937_v21 = vmul.f32 %v5629_v10, %v3921_v14 }
0x298c   :  { %v5631_v56 = vpop.eup %5630 }
0x298d   :  { %v3943_v36 = vmul.f32 %v3942_v30, %v3937_v21  ;;  %v3938_v37 = vmul.f32 %v5631_v56, %v3922_v3  ;;  %v5549_v3 = vld [vmem:[%s6487_s7 + $0x28] sm:$0xff]  }
0x298e   :  { %5307 = vmatpush3.bf16.msra.mxu0 %v5549_v3 }
0x298f   :  { %v3949_v29 = vadd.f32 %v3948_v23, %v3943_v36  ;;  %v3944_v41 = vmul.f32 %v3942_v30, %v3938_v37  ;;  %5308 = vmatprep.subr.bf16.mxu0 %v5650_v44 }
0x2991   :  { %v4009_v6 = vadd.f32 %v4002_v1, %v3949_v29  ;;  %v3950_v60 = vadd.f32 %v3948_v23, %v3944_v41 }
0x2992   :  { %5309 = vmatpush3.bf16.msra.mxu0 %v5550_v61 }
0x2993   :  { %v4019_v35 = vadd.f32 %v4595_v5, %v4009_v6  ;;  %v4010_v38 = vadd.f32 %v4005_v8, %v3950_v60  ;;  %5310 = vmatprep.subr.bf16.mxu0 %v5650_v44 }
0x2995   :  { %v4021_v46 = vsel %vm413_vm2, %v4019_v35, 0.0  ;;  %v4020_v47 = vadd.f32 %v4595_v5, %v4010_v38 }
0x2996   :  { %4022 = vadd.xlane.f32.xlu0 %v4021_v46  ;;  %5311 = vmatpush3.bf16.msra.mxu0 %v5551_v20 }
0x2997   :  { %v4024_v54 = vsel %vm413_vm2, %v4020_v47, 0.0 }
0x2998   :  { %4025 = vadd.xlane.f32.xlu1 %v4024_v54 }
0x2a23   :  { %v4023_v59 = vpop.xlane.xlu0 %4022 }
0x2a24   :  { %v4027_v48 = vmul.f32 0.03125, %v4023_v59 }
0x2a25   :  { %v4026_v52 = vpop.xlane.xlu1 %4025 }
0x2a26   :  { %v4029_v63 = vsub.f32 %v4019_v35, %v4027_v48  ;;  %v4028_v34 = vmul.f32 0.03125, %v4026_v52  ;;  %v4619_v48 = vld [vmem:[%s6508_s29 + $0x1] ss:$0 sm:$0xff] }
0x2a28   :  { %v4030_v7 = vsub.f32 %v4020_v47, %v4028_v34  ;;  %v4031_v49 = vmul.f32 %v4029_v63, %v4029_v63 }
0x2a2a   :  { %v4033_v1 = vsel %vm413_vm2, %v4031_v49, 0.0  ;;  %v4032_v55 = vmul.f32 %v4030_v7, %v4030_v7 }
0x2a2b   :  { %4034 = vadd.xlane.f32.xlu0 %v4033_v1 }
0x2a2c   :  { %v4036_v8 = vsel %vm413_vm2, %v4032_v55, 0.0 }
0x2a2d   :  { %4037 = vadd.xlane.f32.xlu1 %v4036_v8 }
0x2ab8   :  { %v4035_v40 = vpop.xlane.xlu0 %4034 }
0x2ab9   :  { %v4039_v0 = vmul.f32 0.03125, %v4035_v40 }
0x2aba   :  { %v4038_v45 = vpop.xlane.xlu1 %4037 }
0x2abb   :  { %v4041_v16 = vadd.f32 1e-05, %v4039_v0  ;;  %v4040_v33 = vmul.f32 0.03125, %v4038_v45 }
0x2abd   :  { %5632 = vrsqrt.f32 %v4041_v16  ;;  %v4042_v9 = vadd.f32 1e-05, %v4040_v33 }
0x2abf   :  { %5634 = vrsqrt.f32 %v4042_v9 }
0x2ac7   :  { %v5633_v24 = vpop.eup %5632 }
0x2ac8   :  { %v4045_v18 = vmul.f32 %v5633_v24, %v4029_v63 }
0x2ac9   :  { %v5635_v28 = vpop.eup %5634 }
0x2aca   :  { %v4051_v22 = vmul.f32 %v4050_v12, %v4045_v18  ;;  %v4046_v25 = vmul.f32 %v5635_v28, %v4030_v7  ;;  %v5552_v28 = vld [vmem:[%s4385_s17] sm:$0xff]  }
0x2acc   :  { %v4052_v11 = vmul.f32 %v4050_v12, %v4046_v25  ;;  %v4057_v13 = vadd.f32 %v4056_v19, %v4051_v22  ;;  %v5553_v22 = vld [vmem:[%s4385_s17 + $0x8] sm:$0xff]  }
0x2ace   :  { %v4058_v14 = vadd.f32 %v4056_v19, %v4052_v11 }
0x2ad0   :  { %v4064_v15 = vpack.c.bf16 %v4058_v14, %v4057_v13 }
0x2ad2   :  { %5301 = vmatmul.mubr.msk.bf16.vlgmr.msra.gmra.mrb[108].mxu1 %vm413_vm2, %v4064_v15 }
0x2ad3   :  { %5320 = vmatprep.mubr.msk.bf16.mxu1 %vm5651_vm4, %v5650_v44  ;;  %5317 = vmatpush3.bf16.msra.mxu1 %v5552_v28 }
0x2ad4   :  { %5318 = vmatprep.subr.bf16.mxu1 %v5650_v44  ;;  %v4272_v44 = vrot.slane %v6654_v31, %v3310_v27 }
0x2ad7   :  { %5319 = vmatpush3.bf16.msra.mxu1 %v5553_v22 }
0x2ba5   :  { %v4122_v2 = vpop.f32.mrb[108].mxu1 }
0x2ba6   :  { %v4123_v32 = vadd.f32 %v4601_v62, %v4122_v2  ;;  %v5302_v26 = vpop.f32.mrb[109].mxu1 }
0x2ba7   :  { %v4125_v4 = vpop.f32.mrb[110].mxu1 }
0x2ba8   :  { %v4129_v43 = vmul.f32 %v4123_v32, %v4123_v32  ;;  %v4126_v57 = vadd.f32 %v4601_v62, %v4125_v4  ;;  %v5303_v42 = vpop.f32.mrb[111].mxu1 }
0x2baa   :  { %v4131_v17 = vmul.f32 %v4129_v43, %v4123_v32  ;;  %v4130_v30 = vmul.f32 %v4126_v57, %v4126_v57 }
0x2bac   :  { %v4133_v10 = vmul.f32 0.044715, %v4131_v17  ;;  %v4132_v21 = vmul.f32 %v4130_v30, %v4126_v57 }
0x2bae   :  { %v4135_v23 = vadd.f32 %v4133_v10, %v4123_v32  ;;  %v4134_v56 = vmul.f32 0.044715, %v4132_v21 }
0x2bb0   :  { %v4137_v36 = vmul.f32 0.7978846, %v4135_v23  ;;  %v4136_v37 = vadd.f32 %v4134_v56, %v4126_v57 }
0x2bb2   :  { %5636 = vtanh.f32 %v4137_v36  ;;  %v4138_v29 = vmul.f32 0.7978846, %v4136_v37 }
0x2bb4   :  { %5638 = vtanh.f32 %v4138_v29 }
0x2bbc   :  { %v5637_v41 = vpop.eup %5636 }
0x2bbd   :  { %v4141_v5 = vadd.f32 1.0, %v5637_v41 }
0x2bbe   :  { %v5639_v6 = vpop.eup %5638 }
0x2bbf   :  { %v4143_v60 = vmul.f32 0.5, %v4141_v5  ;;  %v4142_v35 = vadd.f32 1.0, %v5639_v6 }
0x2bc1   :  { %v4144_v38 = vmul.f32 0.5, %v4142_v35  ;;  %v4145_v46 = vmul.f32 %v4143_v60, %v4123_v32 }
0x2bc3   :  { %v4146_v47 = vmul.f32 %v4144_v38, %v4126_v57 }
0x2bc5   :  { %v4156_v54 = vpack.c.bf16 %v4146_v47, %v4145_v46 }
0x2bc7   :  { %5313 = vmatmul.mubr.msk.bf16.vlgmr.msra.gmra.mrb[84].mxu0 %vm270_vm0, %v4156_v54 }
0x2c9a   :  { %v4218_v59 = vpop.f32.mrb[84].mxu0 }
0x2c9b   :  { %v4225_v52 = vadd.f32 %v4218_v59, %v4057_v13  ;;  %v5314_v63 = vpop.f32.mrb[85].mxu0 }
0x2c9c   :  { %v4221_v34 = vpop.f32.mrb[86].mxu0 }
0x2c9d   :  { %v4226_v7 = vadd.f32 %v4221_v34, %v4058_v14  ;;  %v5315_v49 = vpop.f32.mrb[87].mxu0  ;;  %v4235_v1 = vadd.f32 %v4619_v48, %v4225_v52 }
0x2c9f   :  { %v4237_v55 = vsel %vm413_vm2, %v4235_v1, 0.0  ;;  %v4236_v8 = vadd.f32 %v4619_v48, %v4226_v7 }
0x2ca0   :  { %4238 = vadd.xlane.f32.xlu0 %v4237_v55 }
0x2ca1   :  { %v4240_v51 = vsel %vm413_vm2, %v4236_v8, 0.0 }
0x2ca2   :  { %4241 = vadd.xlane.f32.xlu1 %v4240_v51 }
0x2d2d   :  { %v4239_v50 = vpop.xlane.xlu0 %4238 }
0x2d2e   :  { %v4243_v40 = vmul.f32 0.03125, %v4239_v50 }
0x2d2f   :  { %v4242_v0 = vpop.xlane.xlu1 %4241 }
0x2d30   :  { %v4245_v45 = vsub.f32 %v4235_v1, %v4243_v40  ;;  %v4244_v16 = vmul.f32 0.03125, %v4242_v0 }
0x2d32   :  { %v4246_v33 = vsub.f32 %v4236_v8, %v4244_v16  ;;  %v4247_v9 = vmul.f32 %v4245_v45, %v4245_v45 }
0x2d34   :  { %v4249_v12 = vsel %vm413_vm2, %v4247_v9, 0.0  ;;  %v4248_v24 = vmul.f32 %v4246_v33, %v4246_v33 }
0x2d35   :  { %4250 = vadd.xlane.f32.xlu0 %v4249_v12 }
0x2d36   :  { %v4252_v18 = vsel %vm413_vm2, %v4248_v24, 0.0 }
0x2d37   :  { %4253 = vadd.xlane.f32.xlu1 %v4252_v18 }
0x2dc2   :  { %v4251_v25 = vpop.xlane.xlu0 %4250 }
0x2dc3   :  { %v4255_v19 = vmul.f32 0.03125, %v4251_v25 }
0x2dc4   :  { %v4254_v11 = vpop.xlane.xlu1 %4253 }
0x2dc5   :  { %v4257_v13 = vadd.f32 1e-05, %v4255_v19  ;;  %v4256_v14 = vmul.f32 0.03125, %v4254_v11 }
0x2dc7   :  { %5640 = vrsqrt.f32 %v4257_v13  ;;  %v4258_v15 = vadd.f32 1e-05, %v4256_v14 }
0x2dc9   :  { %5642 = vrsqrt.f32 %v4258_v15 }
0x2dd1   :  { %v5641_v3 = vpop.eup %5640 }
0x2dd2   :  { %v4261_v61 = vmul.f32 %v5641_v3, %v4245_v45 }
0x2dd3   :  { %v5643_v20 = vpop.eup %5642 }
0x2dd4   :  { %v4267_v62 = vmul.f32 %v4266_v58, %v4261_v61  ;;  %v4262_v2 = vmul.f32 %v5643_v20, %v4246_v33 }
0x2dd6   :  { %v4268_v32 = vmul.f32 %v4266_v58, %v4262_v2  ;;  %v4273_v26 = vadd.f32 %v4272_v44, %v4267_v62 }
0x2dd8   :  { %v4274_v4 = vadd.f32 %v4272_v44, %v4268_v32 }
0x2dda   :  { %v4279_v43 = vpack.c.bf16 %v4274_v4, %v4273_v26 }
0x2ddc   :  { %5321 = vmatmul.mubr.msk.bf16.vlgmr.msra.gmra.mrb[112].mxu1 %vm413_vm2, %v4279_v43 }
0x2eaf   :  { %v4336_v53 = vpop.f32.mrb[112].mxu1 }
0x2eb0   :  { %v4337_v57 = vadd.f32 %v4620_v39, %v4336_v53  ;;  %v5322_v27 = vpop.f32.mrb[113].mxu1 }
0x2eb1   :  { %v4339_v31 = vpop.f32.mrb[114].mxu1 }
0x2eb2   :  { %4343 = vst [vmem:[%s4387_s21] sm:$0xff] %v4337_v57  ;;  %v4340_v42 = vadd.f32 %v4620_v39, %v4339_v31  ;;  %v5323_v17 = vpop.f32.mrb[115].mxu1 }
0x2eb4   :  { %4344 = vst [vmem:[%s4387_s21 + $0x8] sm:$0xff] %v4340_v42 }

</bundles_post_ra>
